<compile_context>
chip_gen: v7x
topology: tpu7x:2x2x1
jax: 0.10.0
libtpu: 0.0.40
codegen_flags: <defaults>
</compile_context>

<pallas_src>
import functools
import math

import jax
import jax.numpy as jnp
from jax import lax
from jax.experimental import pallas as pl
from jax.experimental.pallas import tpu as pltpu

SQRT2 = math.sqrt(2.0)


# ----------------------------------------------------------------------------
# Pallas kernels
# ----------------------------------------------------------------------------
def _conv_act_kernel(xpad_ref, w_ref, b_ref, o_ref, *,
                     k, th, w_dim, c_in, neg_slope, act_gain):
    """kxk conv (stride 1, pad k//2) + bias + leaky_relu * act_gain, NHWC.

    xpad_ref: (1, H+2p, W+2p, C_in)  zero-padded input, VMEM-resident per batch
    w_ref:    (k*k, C_in, C_out)     pre-scaled weights (resident)
    b_ref:    (1, C_out)             FusedLeakyReLU bias
    o_ref:    (1, th*W, C_out)       output rows [t*th, t*th+th), row-major flat
    """
    t = pl.program_id(1)
    row0 = pl.multiple_of(t * th, th)
    c_out = o_ref.shape[-1]

    acc = jnp.zeros((th * w_dim, c_out), jnp.float32)
    for kh in range(k):
        for kw in range(k):
            xs = xpad_ref[0, pl.ds(row0 + kh, th), pl.ds(kw, w_dim), :]
            xs = xs.reshape(th * w_dim, c_in)
            acc = acc + jnp.dot(xs, w_ref[kh * k + kw],
                                preferred_element_type=jnp.float32,
                                precision=lax.Precision.HIGHEST)

    y = acc + b_ref[...]
    y = jnp.where(y >= 0.0, y, neg_slope * y) * act_gain
    o_ref[0] = y.astype(o_ref.dtype)


def _conv_act_skip_kernel(ypad_ref, xu_ref, w_ref, ws_ref, b_ref, o_ref, *,
                          k, th, w_dim, c_in, neg_slope, act_gain, res_scale):
    """Fused second half of ResUpBlock (after the two 2x upsamples):

        out = ( leaky_relu(conv3x3(y_up) + b2) * sqrt(2)   # ConvUpLayer conv2
                + conv1x1(x_up) )                           # skip branch
              / sqrt(2)
    """
    t = pl.program_id(1)
    row0 = pl.multiple_of(t * th, th)
    c_out = o_ref.shape[-1]

    acc = jnp.zeros((th * w_dim, c_out), jnp.float32)
    for kh in range(k):
        for kw in range(k):
            xs = ypad_ref[0, pl.ds(row0 + kh, th), pl.ds(kw, w_dim), :]
            xs = xs.reshape(th * w_dim, c_in)
            acc = acc + jnp.dot(xs, w_ref[kh * k + kw],
                                preferred_element_type=jnp.float32,
                                precision=lax.Precision.HIGHEST)

    y = acc + b_ref[...]
    y = jnp.where(y >= 0.0, y, neg_slope * y) * act_gain

    xu = xu_ref[0].reshape(th * w_dim, c_in)
    skip = jnp.dot(xu, ws_ref[...],
                   preferred_element_type=jnp.float32,
                   precision=lax.Precision.HIGHEST)

    o_ref[0] = ((y + skip) * res_scale).astype(o_ref.dtype)


# ----------------------------------------------------------------------------
# pallas_call wrappers
# ----------------------------------------------------------------------------
def _pick_row_tile(h, w, max_rows):
    """Largest divisor of h that is <= max_rows and keeps (th*w) 8-aligned."""
    best = h
    for th in range(1, h + 1):
        if h % th == 0 and th <= max_rows and ((th * w) % 8 == 0 or th == h):
            best = th
    return best


def _conv3x3_act(x_nhwc, w_taps, bias, *, row_tile, neg_slope=0.2, act_gain=SQRT2):
    """EqualConv2d(k=3, pad=1, no conv bias) + FusedLeakyReLU, NHWC -> NHWC."""
    B, H, W, C_in = x_nhwc.shape
    kk, _, C_out = w_taps.shape
    k = int(round(math.sqrt(kk)))
    p = k // 2
    th = _pick_row_tile(H, W, row_tile)

    xpad = jnp.pad(x_nhwc, ((0, 0), (p, p), (p, p), (0, 0)))
    bias2 = bias.reshape(1, C_out).astype(jnp.float32)

    kernel = functools.partial(_conv_act_kernel, k=k, th=th, w_dim=W,
                               c_in=C_in, neg_slope=neg_slope, act_gain=act_gain)
    out = pl.pallas_call(
        kernel,
        out_shape=jax.ShapeDtypeStruct((B, H * W, C_out), jnp.float32),
        grid_spec=pltpu.PrefetchScalarGridSpec(
            num_scalar_prefetch=0,
            grid=(B, H // th),
            in_specs=[
                pl.BlockSpec((1, H + 2 * p, W + 2 * p, C_in),
                             lambda b, t: (b, 0, 0, 0)),
                pl.BlockSpec((kk, C_in, C_out), lambda b, t: (0, 0, 0)),
                pl.BlockSpec((1, C_out), lambda b, t: (0, 0)),
            ],
            out_specs=pl.BlockSpec((1, th * W, C_out), lambda b, t: (b, t, 0)),
        ),
        compiler_params=pltpu.CompilerParams(
            dimension_semantics=("parallel", "parallel")),
    )(xpad, w_taps, bias2)
    return out.reshape(B, H, W, C_out)


def _conv3x3_act_skip(y_nhwc, xskip_nhwc, w_taps, w_skip, bias, *, row_tile,
                      neg_slope=0.2, act_gain=SQRT2, res_scale=1.0 / SQRT2):
    """Fused: conv3x3 + FusedLeakyReLU + 1x1 skip conv + residual scale."""
    B, H, W, C_in = y_nhwc.shape
    kk, _, C_out = w_taps.shape
    k = int(round(math.sqrt(kk)))
    p = k // 2
    th = _pick_row_tile(H, W, row_tile)

    ypad = jnp.pad(y_nhwc, ((0, 0), (p, p), (p, p), (0, 0)))
    bias2 = bias.reshape(1, C_out).astype(jnp.float32)

    kernel = functools.partial(_conv_act_skip_kernel, k=k, th=th, w_dim=W,
                               c_in=C_in, neg_slope=neg_slope,
                               act_gain=act_gain, res_scale=res_scale)
    out = pl.pallas_call(
        kernel,
        out_shape=jax.ShapeDtypeStruct((B, H * W, C_out), jnp.float32),
        grid_spec=pltpu.PrefetchScalarGridSpec(
            num_scalar_prefetch=0,
            grid=(B, H // th),
            in_specs=[
                pl.BlockSpec((1, H + 2 * p, W + 2 * p, C_in),
                             lambda b, t: (b, 0, 0, 0)),
                pl.BlockSpec((1, th, W, C_in), lambda b, t: (b, t, 0, 0)),
                pl.BlockSpec((kk, C_in, C_out), lambda b, t: (0, 0, 0)),
                pl.BlockSpec((C_in, C_out), lambda b, t: (0, 0)),
                pl.BlockSpec((1, C_out), lambda b, t: (0, 0)),
            ],
            out_specs=pl.BlockSpec((1, th * W, C_out), lambda b, t: (b, t, 0)),
        ),
        compiler_params=pltpu.CompilerParams(
            dimension_semantics=("parallel", "parallel")),
    )(ypad, xskip_nhwc, w_taps, w_skip, bias2)
    return out.reshape(B, H, W, C_out)


# ----------------------------------------------------------------------------
# JAX glue: bilinear 2x upsample (== F.interpolate(scale_factor=2, 'bilinear',
# align_corners=False)).  Cheap elementwise op kept outside the kernels.
# ----------------------------------------------------------------------------
def _bilinear_up2x_nhwc(x):
    def up(v, axis):
        n = v.shape[axis]
        first = lax.slice_in_dim(v, 0, 1, axis=axis)
        last = lax.slice_in_dim(v, n - 1, n, axis=axis)
        prev = jnp.concatenate([first, lax.slice_in_dim(v, 0, n - 1, axis=axis)],
                               axis=axis)
        nxt = jnp.concatenate([lax.slice_in_dim(v, 1, n, axis=axis), last],
                              axis=axis)
        even = 0.25 * prev + 0.75 * v
        odd = 0.75 * v + 0.25 * nxt
        out = jnp.stack([even, odd], axis=axis + 1)
        shape = list(v.shape)
        shape[axis] = 2 * n
        return out.reshape(shape)
    return up(up(x, 1), 2)


# ----------------------------------------------------------------------------
# Module
# ----------------------------------------------------------------------------
class ResUpBlockPallas:
    """JAX/Pallas forward of GFPGAN ResUpBlock (NCHW in / NCHW out)."""

    def __init__(self, in_channels, out_channels, key=None, row_tile=8):
        self.in_channels = in_channels
        self.out_channels = out_channels
        self.row_tile = row_tile
        k = 3

        if key is None:
            key = jax.random.PRNGKey(0)
        k1, k2, k3, k4, k5 = jax.random.split(key, 5)

        # conv1 = ConvLayer(in, in, 3, bias=True, activate=True)
        #       = EqualConv2d(in, in, 3, pad=1, bias=False) + FusedLeakyReLU(in)
        self.scale1 = 1.0 / math.sqrt(in_channels * k * k)
        self.w1 = jax.random.normal(k1, (in_channels, in_channels, k, k), jnp.float32)
        # FusedLeakyReLU biases are zero-init in PyTorch; random here so the
        # bias path is actually exercised by the correctness check.
        self.b1 = 0.1 * jax.random.normal(k4, (in_channels,), jnp.float32)

        # conv2 = ConvUpLayer(in, out, 3, pad=1, bias=True, activate=True)
        self.scale2 = 1.0 / math.sqrt(in_channels * k * k)
        self.w2 = jax.random.normal(k2, (out_channels, in_channels, k, k), jnp.float32)
        self.b2 = 0.1 * jax.random.normal(k5, (out_channels,), jnp.float32)

        # skip = ConvUpLayer(in, out, 1, bias=False, activate=False)
        self.scale_s = 1.0 / math.sqrt(in_channels)
        self.ws = jax.random.normal(k3, (out_channels, in_channels, 1, 1), jnp.float32)

    @staticmethod
    def _taps(w, scale):
        # (C_out, C_in, k, k) -> (k*k, C_in, C_out), equalized-lr scale folded in.
        c_out, c_in, k, _ = w.shape
        return (jnp.transpose(w, (2, 3, 1, 0)) * scale).reshape(k * k, c_in, c_out)

    def __call__(self, x):
        B, C, H, W = x.shape
        assert C == self.in_channels
        x_nhwc = jnp.transpose(x, (0, 2, 3, 1)).astype(jnp.float32)

        # conv1 + FusedLeakyReLU (Pallas kernel 1)
        w1_t = self._taps(self.w1, self.scale1)
        y1 = _conv3x3_act(x_nhwc, w1_t, self.b1, row_tile=self.row_tile)

        # bilinear x2 upsample of both branches (JAX glue)
        y1_up = _bilinear_up2x_nhwc(y1)
        x_up = _bilinear_up2x_nhwc(x_nhwc)

        # conv2 + FusedLeakyReLU + 1x1 skip + residual/sqrt(2) (Pallas kernel 2)
        w2_t = self._taps(self.w2, self.scale2)
        ws_t = jnp.transpose(self.ws[:, :, 0, 0], (1, 0)) * self.scale_s
        out = _conv3x3_act_skip(y1_up, x_up, w2_t, ws_t, self.b2,
                                row_tile=self.row_tile)

        return jnp.transpose(out, (0, 3, 1, 2))  # back to NCHW

    # ------------- pure-JAX reference (mirrors the PyTorch module) -----------
    def reference(self, x):
        neg = 0.2

        def lrelu_bias(v, b):
            v = v + b.reshape(1, -1, 1, 1)
            return jnp.where(v >= 0.0, v, neg * v) * SQRT2

        def up2x(v):
            b, c, h, w = v.shape
            return jax.image.resize(v, (b, c, 2 * h, 2 * w), method="bilinear")

        def conv(v, w, pad):
            return lax.conv_general_dilated(
                v, w, (1, 1), [(pad, pad), (pad, pad)],
                dimension_numbers=("NCHW", "OIHW", "NCHW"),
                precision=lax.Precision.HIGHEST)

        y = conv(x, self.w1 * self.scale1, 1)
        y = lrelu_bias(y, self.b1)
        y = up2x(y)
        y = conv(y, self.w2 * self.scale2, 1)
        y = lrelu_bias(y, self.b2)
        s = conv(up2x(x), self.ws * self.scale_s, 0)
        return (y + s) / SQRT2


# ----------------------------------------------------------------------------
if __name__ == "__main__":
    key = jax.random.PRNGKey(0)
    k_params, k_x = jax.random.split(key)

    B, C_in, C_out, H, W = 2, 4, 8, 16, 16
    block = ResUpBlockPallas(C_in, C_out, key=k_params, row_tile=8)

    x = jax.random.normal(k_x, (B, C_in, H, W), dtype=jnp.float32)

    out = jax.block_until_ready(block(x))
    assert out.shape == (B, C_out, 2 * H, 2 * W), out.shape

    ref = jax.block_until_ready(block.reference(x))
    max_err = float(jnp.max(jnp.abs(out - ref)))
    assert jnp.allclose(out, ref, atol=2e-2, rtol=2e-2), f"mismatch: {max_err}"

    print("KERNEL_OK")
</pallas_src>

<mosaic_0001>
module attributes {stable_mosaic.version = 11 : i64} {
  func.func @_conv_act_kernel(%arg0: i32, %arg1: i32, %arg2: memref<1x18x18x4xf32, #tpu.memory_space<vmem>>, %arg3: memref<9x4x4xf32, #tpu.memory_space<vmem>>, %arg4: memref<1x4xf32, #tpu.memory_space<vmem>>, %arg5: memref<1x128x4xf32, #tpu.memory_space<vmem>>) attributes {dimension_semantics = [#tpu.dimension_semantics<parallel>, #tpu.dimension_semantics<parallel>], iteration_bounds = array<i64: 2, 2>, scalar_prefetch = 0 : i64, scratch_operands = 0 : i64, tpu.core_type = #tpu.core_type<tc>, window_params = [{transform_indices = @transform_0, window_bounds = array<i64: 1, 18, 18, 4>}, {pipeline_mode = #tpu.pipeline_mode<synchronous>, transform_indices = @transform_1, window_bounds = array<i64: 9, 4, 4>}, {pipeline_mode = #tpu.pipeline_mode<synchronous>, transform_indices = @transform_2, window_bounds = array<i64: 1, 4>}, {transform_indices = @transform_3, window_bounds = array<i64: 1, 128, 4>}]} {
    %c8_i32 = arith.constant 8 : i32
    %0 = arith.muli %arg1, %c8_i32 : i32
    %1 = tpu.assume_multiple %0, 8 : i32
    %cst = arith.constant 0.000000e+00 : f32
    %2 = vector.broadcast %cst : f32 to vector<128x4xf32>
    %c0_i32 = arith.constant 0 : i32
    %3 = arith.addi %1, %c0_i32 : i32
    %c0 = arith.constant 0 : index
    %4 = arith.index_cast %3 : i32 to index
    %c0_0 = arith.constant 0 : index
    %c0_1 = arith.constant 0 : index
    %5 = vector.load %arg2[%c0, %4, %c0_0, %c0_1] : memref<1x18x18x4xf32, #tpu.memory_space<vmem>>, vector<1x8x16x4xf32>
    %6 = vector.shape_cast %5 : vector<1x8x16x4xf32> to vector<8x16x4xf32>
    %7 = vector.shape_cast %6 : vector<8x16x4xf32> to vector<128x4xf32>
    %c0_2 = arith.constant 0 : index
    %c0_3 = arith.constant 0 : index
    %c0_4 = arith.constant 0 : index
    %8 = vector.load %arg3[%c0_2, %c0_3, %c0_4] : memref<9x4x4xf32, #tpu.memory_space<vmem>>, vector<1x4x4xf32>
    %9 = vector.shape_cast %8 : vector<1x4x4xf32> to vector<4x4xf32>
    %cst_5 = arith.constant dense<0.000000e+00> : vector<128x4xf32>
    %10 = tpu.matmul %7, %9, %cst_5 {dimension_numbers = #tpu.dot_dimension_numbers<[1], [0], [0], [1], [0, 0, 1, 1], [], []>, precision = #tpu.contract_precision<fp32>} : vector<128x4xf32>, vector<4x4xf32>, vector<128x4xf32> -> vector<128x4xf32>
    %11 = arith.addf %2, %10 : vector<128x4xf32>
    %c0_i32_6 = arith.constant 0 : i32
    %12 = arith.addi %1, %c0_i32_6 : i32
    %c0_7 = arith.constant 0 : index
    %13 = arith.index_cast %12 : i32 to index
    %c1 = arith.constant 1 : index
    %c0_8 = arith.constant 0 : index
    %14 = vector.load %arg2[%c0_7, %13, %c1, %c0_8] : memref<1x18x18x4xf32, #tpu.memory_space<vmem>>, vector<1x8x16x4xf32>
    %15 = vector.shape_cast %14 : vector<1x8x16x4xf32> to vector<8x16x4xf32>
    %16 = vector.shape_cast %15 : vector<8x16x4xf32> to vector<128x4xf32>
    %c1_9 = arith.constant 1 : index
    %c0_10 = arith.constant 0 : index
    %c0_11 = arith.constant 0 : index
    %17 = vector.load %arg3[%c1_9, %c0_10, %c0_11] : memref<9x4x4xf32, #tpu.memory_space<vmem>>, vector<1x4x4xf32>
    %18 = vector.shape_cast %17 : vector<1x4x4xf32> to vector<4x4xf32>
    %cst_12 = arith.constant dense<0.000000e+00> : vector<128x4xf32>
    %19 = tpu.matmul %16, %18, %cst_12 {dimension_numbers = #tpu.dot_dimension_numbers<[1], [0], [0], [1], [0, 0, 1, 1], [], []>, precision = #tpu.contract_precision<fp32>} : vector<128x4xf32>, vector<4x4xf32>, vector<128x4xf32> -> vector<128x4xf32>
    %20 = arith.addf %11, %19 : vector<128x4xf32>
    %c0_i32_13 = arith.constant 0 : i32
    %21 = arith.addi %1, %c0_i32_13 : i32
    %c0_14 = arith.constant 0 : index
    %22 = arith.index_cast %21 : i32 to index
    %c2 = arith.constant 2 : index
    %c0_15 = arith.constant 0 : index
    %23 = vector.load %arg2[%c0_14, %22, %c2, %c0_15] : memref<1x18x18x4xf32, #tpu.memory_space<vmem>>, vector<1x8x16x4xf32>
    %24 = vector.shape_cast %23 : vector<1x8x16x4xf32> to vector<8x16x4xf32>
    %25 = vector.shape_cast %24 : vector<8x16x4xf32> to vector<128x4xf32>
    %c2_16 = arith.constant 2 : index
    %c0_17 = arith.constant 0 : index
    %c0_18 = arith.constant 0 : index
    %26 = vector.load %arg3[%c2_16, %c0_17, %c0_18] : memref<9x4x4xf32, #tpu.memory_space<vmem>>, vector<1x4x4xf32>
    %27 = vector.shape_cast %26 : vector<1x4x4xf32> to vector<4x4xf32>
    %cst_19 = arith.constant dense<0.000000e+00> : vector<128x4xf32>
    %28 = tpu.matmul %25, %27, %cst_19 {dimension_numbers = #tpu.dot_dimension_numbers<[1], [0], [0], [1], [0, 0, 1, 1], [], []>, precision = #tpu.contract_precision<fp32>} : vector<128x4xf32>, vector<4x4xf32>, vector<128x4xf32> -> vector<128x4xf32>
    %29 = arith.addf %20, %28 : vector<128x4xf32>
    %c1_i32 = arith.constant 1 : i32
    %30 = arith.addi %1, %c1_i32 : i32
    %c0_20 = arith.constant 0 : index
    %31 = arith.index_cast %30 : i32 to index
    %c0_21 = arith.constant 0 : index
    %c0_22 = arith.constant 0 : index
    %32 = vector.load %arg2[%c0_20, %31, %c0_21, %c0_22] : memref<1x18x18x4xf32, #tpu.memory_space<vmem>>, vector<1x8x16x4xf32>
    %33 = vector.shape_cast %32 : vector<1x8x16x4xf32> to vector<8x16x4xf32>
    %34 = vector.shape_cast %33 : vector<8x16x4xf32> to vector<128x4xf32>
    %c3 = arith.constant 3 : index
    %c0_23 = arith.constant 0 : index
    %c0_24 = arith.constant 0 : index
    %35 = vector.load %arg3[%c3, %c0_23, %c0_24] : memref<9x4x4xf32, #tpu.memory_space<vmem>>, vector<1x4x4xf32>
    %36 = vector.shape_cast %35 : vector<1x4x4xf32> to vector<4x4xf32>
    %cst_25 = arith.constant dense<0.000000e+00> : vector<128x4xf32>
    %37 = tpu.matmul %34, %36, %cst_25 {dimension_numbers = #tpu.dot_dimension_numbers<[1], [0], [0], [1], [0, 0, 1, 1], [], []>, precision = #tpu.contract_precision<fp32>} : vector<128x4xf32>, vector<4x4xf32>, vector<128x4xf32> -> vector<128x4xf32>
    %38 = arith.addf %29, %37 : vector<128x4xf32>
    %c1_i32_26 = arith.constant 1 : i32
    %39 = arith.addi %1, %c1_i32_26 : i32
    %c0_27 = arith.constant 0 : index
    %40 = arith.index_cast %39 : i32 to index
    %c1_28 = arith.constant 1 : index
    %c0_29 = arith.constant 0 : index
    %41 = vector.load %arg2[%c0_27, %40, %c1_28, %c0_29] : memref<1x18x18x4xf32, #tpu.memory_space<vmem>>, vector<1x8x16x4xf32>
    %42 = vector.shape_cast %41 : vector<1x8x16x4xf32> to vector<8x16x4xf32>
    %43 = vector.shape_cast %42 : vector<8x16x4xf32> to vector<128x4xf32>
    %c4 = arith.constant 4 : index
    %c0_30 = arith.constant 0 : index
    %c0_31 = arith.constant 0 : index
    %44 = vector.load %arg3[%c4, %c0_30, %c0_31] : memref<9x4x4xf32, #tpu.memory_space<vmem>>, vector<1x4x4xf32>
    %45 = vector.shape_cast %44 : vector<1x4x4xf32> to vector<4x4xf32>
    %cst_32 = arith.constant dense<0.000000e+00> : vector<128x4xf32>
    %46 = tpu.matmul %43, %45, %cst_32 {dimension_numbers = #tpu.dot_dimension_numbers<[1], [0], [0], [1], [0, 0, 1, 1], [], []>, precision = #tpu.contract_precision<fp32>} : vector<128x4xf32>, vector<4x4xf32>, vector<128x4xf32> -> vector<128x4xf32>
    %47 = arith.addf %38, %46 : vector<128x4xf32>
    %c1_i32_33 = arith.constant 1 : i32
    %48 = arith.addi %1, %c1_i32_33 : i32
    %c0_34 = arith.constant 0 : index
    %49 = arith.index_cast %48 : i32 to index
    %c2_35 = arith.constant 2 : index
    %c0_36 = arith.constant 0 : index
    %50 = vector.load %arg2[%c0_34, %49, %c2_35, %c0_36] : memref<1x18x18x4xf32, #tpu.memory_space<vmem>>, vector<1x8x16x4xf32>
    %51 = vector.shape_cast %50 : vector<1x8x16x4xf32> to vector<8x16x4xf32>
    %52 = vector.shape_cast %51 : vector<8x16x4xf32> to vector<128x4xf32>
    %c5 = arith.constant 5 : index
    %c0_37 = arith.constant 0 : index
    %c0_38 = arith.constant 0 : index
    %53 = vector.load %arg3[%c5, %c0_37, %c0_38] : memref<9x4x4xf32, #tpu.memory_space<vmem>>, vector<1x4x4xf32>
    %54 = vector.shape_cast %53 : vector<1x4x4xf32> to vector<4x4xf32>
    %cst_39 = arith.constant dense<0.000000e+00> : vector<128x4xf32>
    %55 = tpu.matmul %52, %54, %cst_39 {dimension_numbers = #tpu.dot_dimension_numbers<[1], [0], [0], [1], [0, 0, 1, 1], [], []>, precision = #tpu.contract_precision<fp32>} : vector<128x4xf32>, vector<4x4xf32>, vector<128x4xf32> -> vector<128x4xf32>
    %56 = arith.addf %47, %55 : vector<128x4xf32>
    %c2_i32 = arith.constant 2 : i32
    %57 = arith.addi %1, %c2_i32 : i32
    %c0_40 = arith.constant 0 : index
    %58 = arith.index_cast %57 : i32 to index
    %c0_41 = arith.constant 0 : index
    %c0_42 = arith.constant 0 : index
    %59 = vector.load %arg2[%c0_40, %58, %c0_41, %c0_42] : memref<1x18x18x4xf32, #tpu.memory_space<vmem>>, vector<1x8x16x4xf32>
    %60 = vector.shape_cast %59 : vector<1x8x16x4xf32> to vector<8x16x4xf32>
    %61 = vector.shape_cast %60 : vector<8x16x4xf32> to vector<128x4xf32>
    %c6 = arith.constant 6 : index
    %c0_43 = arith.constant 0 : index
    %c0_44 = arith.constant 0 : index
    %62 = vector.load %arg3[%c6, %c0_43, %c0_44] : memref<9x4x4xf32, #tpu.memory_space<vmem>>, vector<1x4x4xf32>
    %63 = vector.shape_cast %62 : vector<1x4x4xf32> to vector<4x4xf32>
    %cst_45 = arith.constant dense<0.000000e+00> : vector<128x4xf32>
    %64 = tpu.matmul %61, %63, %cst_45 {dimension_numbers = #tpu.dot_dimension_numbers<[1], [0], [0], [1], [0, 0, 1, 1], [], []>, precision = #tpu.contract_precision<fp32>} : vector<128x4xf32>, vector<4x4xf32>, vector<128x4xf32> -> vector<128x4xf32>
    %65 = arith.addf %56, %64 : vector<128x4xf32>
    %c2_i32_46 = arith.constant 2 : i32
    %66 = arith.addi %1, %c2_i32_46 : i32
    %c0_47 = arith.constant 0 : index
    %67 = arith.index_cast %66 : i32 to index
    %c1_48 = arith.constant 1 : index
    %c0_49 = arith.constant 0 : index
    %68 = vector.load %arg2[%c0_47, %67, %c1_48, %c0_49] : memref<1x18x18x4xf32, #tpu.memory_space<vmem>>, vector<1x8x16x4xf32>
    %69 = vector.shape_cast %68 : vector<1x8x16x4xf32> to vector<8x16x4xf32>
    %70 = vector.shape_cast %69 : vector<8x16x4xf32> to vector<128x4xf32>
    %c7 = arith.constant 7 : index
    %c0_50 = arith.constant 0 : index
    %c0_51 = arith.constant 0 : index
    %71 = vector.load %arg3[%c7, %c0_50, %c0_51] : memref<9x4x4xf32, #tpu.memory_space<vmem>>, vector<1x4x4xf32>
    %72 = vector.shape_cast %71 : vector<1x4x4xf32> to vector<4x4xf32>
    %cst_52 = arith.constant dense<0.000000e+00> : vector<128x4xf32>
    %73 = tpu.matmul %70, %72, %cst_52 {dimension_numbers = #tpu.dot_dimension_numbers<[1], [0], [0], [1], [0, 0, 1, 1], [], []>, precision = #tpu.contract_precision<fp32>} : vector<128x4xf32>, vector<4x4xf32>, vector<128x4xf32> -> vector<128x4xf32>
    %74 = arith.addf %65, %73 : vector<128x4xf32>
    %c2_i32_53 = arith.constant 2 : i32
    %75 = arith.addi %1, %c2_i32_53 : i32
    %c0_54 = arith.constant 0 : index
    %76 = arith.index_cast %75 : i32 to index
    %c2_55 = arith.constant 2 : index
    %c0_56 = arith.constant 0 : index
    %77 = vector.load %arg2[%c0_54, %76, %c2_55, %c0_56] : memref<1x18x18x4xf32, #tpu.memory_space<vmem>>, vector<1x8x16x4xf32>
    %78 = vector.shape_cast %77 : vector<1x8x16x4xf32> to vector<8x16x4xf32>
    %79 = vector.shape_cast %78 : vector<8x16x4xf32> to vector<128x4xf32>
    %c8 = arith.constant 8 : index
    %c0_57 = arith.constant 0 : index
    %c0_58 = arith.constant 0 : index
    %80 = vector.load %arg3[%c8, %c0_57, %c0_58] : memref<9x4x4xf32, #tpu.memory_space<vmem>>, vector<1x4x4xf32>
    %81 = vector.shape_cast %80 : vector<1x4x4xf32> to vector<4x4xf32>
    %cst_59 = arith.constant dense<0.000000e+00> : vector<128x4xf32>
    %82 = tpu.matmul %79, %81, %cst_59 {dimension_numbers = #tpu.dot_dimension_numbers<[1], [0], [0], [1], [0, 0, 1, 1], [], []>, precision = #tpu.contract_precision<fp32>} : vector<128x4xf32>, vector<4x4xf32>, vector<128x4xf32> -> vector<128x4xf32>
    %83 = arith.addf %74, %82 : vector<128x4xf32>
    %c0_60 = arith.constant 0 : index
    %c0_61 = arith.constant 0 : index
    %84 = vector.load %arg4[%c0_60, %c0_61] : memref<1x4xf32, #tpu.memory_space<vmem>>, vector<1x4xf32>
    %85 = vector.broadcast %84 : vector<1x4xf32> to vector<128x4xf32>
    %86 = arith.addf %83, %85 : vector<128x4xf32>
    %cst_62 = arith.constant 0.000000e+00 : f32
    %87 = vector.broadcast %cst_62 : f32 to vector<128x4xf32>
    %88 = arith.cmpf oge, %86, %87 : vector<128x4xf32>
    %cst_63 = arith.constant 2.000000e-01 : f32
    %89 = vector.broadcast %cst_63 : f32 to vector<128x4xf32>
    %90 = arith.mulf %89, %86 : vector<128x4xf32>
    %91 = arith.select %88, %86, %90 : vector<128x4xi1>, vector<128x4xf32>
    %cst_64 = arith.constant 1.41421354 : f32
    %92 = vector.broadcast %cst_64 : f32 to vector<128x4xf32>
    %93 = arith.mulf %91, %92 : vector<128x4xf32>
    %c0_65 = arith.constant 0 : index
    %c0_66 = arith.constant 0 : index
    %c0_67 = arith.constant 0 : index
    %94 = vector.load %arg5[%c0_65, %c0_66, %c0_67] : memref<1x128x4xf32, #tpu.memory_space<vmem>>, vector<1x128x4xf32>
    %95 = vector.shape_cast %94 : vector<1x128x4xf32> to vector<128x4xf32>
    %96 = vector.shape_cast %93 : vector<128x4xf32> to vector<1x128x4xf32>
    tpu.vector_store %arg5[%c0_65, %c0_66, %c0_67], %96 {strides = array<i32>} : memref<1x128x4xf32, #tpu.memory_space<vmem>>, vector<1x128x4xf32>,
    return
  }
  func.func @transform_0(%arg0: i32, %arg1: i32) -> (i32, i32, i32, i32) {
    %c0_i32 = arith.constant 0 : i32
    %c0_i32_0 = arith.constant 0 : i32
    %c0_i32_1 = arith.constant 0 : i32
    %c0_i32_2 = arith.constant 0 : i32
    return %arg0, %c0_i32, %c0_i32_0, %c0_i32_1 : i32, i32, i32, i32
  }
  func.func @transform_1(%arg0: i32, %arg1: i32) -> (i32, i32, i32) {
    %c0_i32 = arith.constant 0 : i32
    %c0_i32_0 = arith.constant 0 : i32
    %c0_i32_1 = arith.constant 0 : i32
    %c0_i32_2 = arith.constant 0 : i32
    return %c0_i32, %c0_i32_0, %c0_i32_1 : i32, i32, i32
  }
  func.func @transform_2(%arg0: i32, %arg1: i32) -> (i32, i32) {
    %c0_i32 = arith.constant 0 : i32
    %c0_i32_0 = arith.constant 0 : i32
    %c0_i32_1 = arith.constant 0 : i32
    return %c0_i32, %c0_i32_0 : i32, i32
  }
  func.func @transform_3(%arg0: i32, %arg1: i32) -> (i32, i32, i32) {
    %c0_i32 = arith.constant 0 : i32
    %c0_i32_0 = arith.constant 0 : i32
    return %arg0, %arg1, %c0_i32 : i32, i32, i32
  }
}

</mosaic_0001>

<bundles_post_ra>
// kernel: tpu_custom_call.1
= control target key start
LH: loop header
LB: loop body
LE: loop exit
PB: predicated region body
PF: predicated region fallthrough
CT: control target
= control target key end

     0   :  { %s14346_s12 = smov 0   ;;  %s14348_s13 = smov 0   ;;  %s16942_s0 = inlined_call_operand.vmem [shape: f32[2,18,18,4], index: 0, kind: input, shape index: {}]   ;;  %s16943_s1 = inlined_call_operand.vmem [shape: f32[9,4,4], index: 1, kind: input, shape index: {}]   ;;  %s16944_s2 = inlined_call_operand.vmem [shape: f32[1,4], index: 2, kind: input, shape index: {}]   ;;  %s16945_s3 = inlined_call_operand.vmem [shape: f32[2,256,4], index: 3, kind: output, shape index: {}]  }
   0x1   :  { %s14350_s14 = smov 0   ;;  %s14352_s15 = smov 0  }
   0x2   :  { %s14354_s16 = smov 0  }
   0x3 LB: > { %s22_s17 = sadd.s32 1, %s14316_s14  ;;  %s25_s18 = sadd.s32 1, %s14320_s15  ;;  %s14324_s16 = sphi %s14354_s16, %s13_s16   ;;  %s14320_s15 = sphi %s14352_s15, %s17605_s15   ;;  %s14316_s14 = sphi %s14350_s14, %s17604_s14   ;;  %s14312_s13 = sphi %s14348_s13, %s17603_s13   ;;  %s14308_s12 = sphi %s14346_s12, %s17602_s12  }
   0x4   : > { %p23_p0 = scmp.ge.s32.totalorder %s22_s17, 2  ;;  %p10957_p1 = scmp.ge.s32.totalorder %s14324_s16, 1 }
   0x5   : > { %p151_p2 = scmp.lt.s32.totalorder %s14324_s16, 5 }
   0x6   : > { %s17607_s17 = smov (%p23_p0, %s22_s17), 0  ;;  %s17609_s18 = smov (!%p23_p0, %s25_s18), %s14320_s15 }
   0x7   : > { %p152_p3 = pnand %p10957_p1, %p151_p2  ;;  %p27_p4 = scmp.ge.s32.totalorder %s17609_s18, 2 }
   0x9   : > { %s17611_s18 = smov (%p27_p4, %s17609_s18), 0  ;;  %155 = sbr.rel (%p152_p3) target bundleno = 1120 (0x460), region = 32 }
  0x10   : > { %vm281_vm0 = vcmask 1043456   ;;  %v11001_v0 = vld [vmem:[%s16943_s1 + $0x10] sm:$0xf]  ;;  %p179_p5 = scmp.lt.s32.totalorder %s14312_s13, 1  ;;  %v10964_v2 = vld [vmem:[%s16943_s1 + $0x4] sm:$0xf] }
  0x11   : > { %v4940_v1 = vsel %vm281_vm0, %v11001_v0, 0  ;;  %v283_v4 = vsel %vm281_vm0, %v10964_v2, 0  ;;  %s10963_s23 = smul.u32 192, %s14308_s12  ;;  %vm232_vm1 = vcmask 31744  }
  0x12   : > { %v14385_v3 = vand.u32 4294901760, %v4940_v1  ;;  %s17613_s13 = smov (!%p179_p5, %s14312_s13), 1  ;;  %v14391_v5 = vand.u32 4294901760, %v283_v4 }
  0x13   : > { %s14245_s24 = smul.u32 432, %s17613_s13 }
  0x14   : > { %17216 = vst [vmem:[#allocation2_spill] sm:$0xff] %v14385_v3  ;;  %12695 = vmatprep.subr.mxu0 %v14385_v3  ;;  %v14396_v6 = vsub.f32 %v4940_v1, %v14385_v3  ;;  %11993 = vmatprep.subr.mxu1 %v14391_v5  ;;  %v14401_v7 = vsub.f32 %v283_v4, %v14391_v5 }
  0x15   : > { %12696 = vmatpush3.msra.mxu0 %v14385_v3  ;;  %s183_s27 = scalar_lea.vmem %s16942_s0, %s14245_s24  ;;  %11994 = vmatpush3.msra.mxu1 %v14391_v5  ;;  %s10960_s24 = sshll.u32 %s17613_s13, 5 }
  0x16   : > { %17217 = vst [vmem:[#allocation3_spill] sm:$0xff] %v14396_v6  ;;  %v14408_v8 = vand.u32 4294901760, %v14396_v6  ;;  %s14410_s28 = scalar_lea.vmem %s183_s27, %s10963_s23  ;;  %v14413_v9 = vand.u32 4294901760, %v14401_v7  ;;  %s10959_s23 = sshll.u32 %s14308_s12, 4 }
  0x17   : > { %v10985_v10 = vld [vmem:[%s14410_s28 + $0x19] sm:$0xff]  ;;  %v10986_v11 = vld [vmem:[%s14410_s28 + $0x21] sm:$0xff]  ;;  %v10987_v17 = vld [vmem:[%s14410_s28 + $0x31] sm:$0xff]  ;;  %p187_p6 = scmp.lt.s32.totalorder %s10959_s23, 31 }
  0x18   : > { %17218 = vst [vmem:[#allocation4_spill] sm:$0xff] %v14408_v8  ;;  %v214_v12 = vld [vmem:[%s14410_s28 + $0x1] sm:$0xff]  ;;  %12721 = vmatprep.subr.mxu0 %v14408_v8  ;;  %v4892_v13 = vsel %vm232_vm1, %v10985_v10, 0  ;;  %v4895_v14 = vsel %vm232_vm1, %v10986_v11, 0  ;;  %v515_v16 = vsub.f32 %v14401_v7, %v14413_v9  ;;  %v215_v18 = vld [vmem:[%s14410_s28 + $0x9] sm:$0xff]  ;;  %v10988_v19 = vld [vmem:[%s14410_s28 + $0x39] sm:$0xff] }
  0x19   : > { %v234_v15 = vsel %vm232_vm1, %v214_v12, 0  ;;  %v14427_v20 = vand.u32 4294901760, %v4892_v13  ;;  %v14429_v21 = vand.u32 4294901760, %v4895_v14  ;;  %v4898_v23 = vsel %vm232_vm1, %v10987_v17, 0  ;;  %v10989_v24 = vld [vmem:[%s14410_s28 + $0x49] sm:$0xff]  ;;  %v10990_v25 = vld [vmem:[%s14410_s28 + $0x51] sm:$0xff] }
  0x1a   : > { %v14431_v22 = vand.u32 4294901760, %v234_v15  ;;  %v516_v26 = vand.u32 4294901760, %v515_v16  ;;  %v14436_v27 = vand.u32 4294901760, %v4898_v23  ;;  %v237_v28 = vsel %vm232_vm1, %v215_v18, 0  ;;  %v10991_v50 = vld [vmem:[%s14410_s28 + $0x61] sm:$0xff]  ;;  %v10992_v55 = vld [vmem:[%s14410_s28 + $0x69] sm:$0xff] }
  0x1b   : > { %17219 = vst [vmem:[#allocation5_spill] sm:$0xff] %v14427_v20  ;;  %17220 = vst [vmem:[#allocation6_spill] sm:$0xff] %v14429_v21  ;;  %v4901_v29 = vsel %vm232_vm1, %v10988_v19, 0  ;;  %v14441_v30 = vsub.f32 %v4892_v13, %v14427_v20  ;;  %v14444_v31 = vsub.f32 %v4895_v14, %v14429_v21  ;;  %v14449_v33 = vand.u32 4294901760, %v237_v28  ;;  %v10993_v58 = vld [vmem:[%s14410_s28 + $0x79] sm:$0xff]  ;;  %v10994_v62 = vld [vmem:[%s14410_s28 + $0x81] sm:$0xff] }
  0x1c   : > { %17221 = vst [vmem:[#allocation7_spill] sm:$0xff] %v14436_v27  ;;  %v14447_v32 = vsub.f32 %v234_v15, %v14431_v22  ;;  %12019 = vmatprep.subr.mxu1 %v516_v26  ;;  %v14452_v34 = vsub.f32 %v4898_v23, %v14436_v27  ;;  %v14454_v35 = vand.u32 4294901760, %v4901_v29  ;;  %v4904_v36 = vsel %vm232_vm1, %v10989_v24, 0  ;;  %v10995_v13 = vld [vmem:[%s14410_s28 + $0x91] sm:$0xff]  ;;  %v10996_v14 = vld [vmem:[%s14410_s28 + $0x99] sm:$0xff]  ;;  %s17615_s23 = smov (!%p187_p6, %s10959_s23), 31 }
  0x1d   : > { %17222 = vst [vmem:[#allocation8_spill] sm:$0xff] %v14441_v30  ;;  %17223 = vst [vmem:[#allocation9_spill] sm:$0xff] %v14444_v31  ;;  %v4907_v37 = vsel %vm232_vm1, %v10990_v25, 0  ;;  %v14459_v38 = vand.u32 4294901760, %v14441_v30  ;;  %v14462_v39 = vand.u32 4294901760, %v14444_v31  ;;  %v14466_v41 = vsub.f32 %v237_v28, %v14449_v33  ;;  %v10997_v28 = vld [vmem:[%s14410_s28 + $0xa9] sm:$0xff]  ;;  %s190_s27 = sadd.s32 %s10960_s24, %s17615_s23 }
  0x1e   : > { %17224 = vst [vmem:[#allocation10_spill] sm:$0xff] %v14452_v34  ;;  %17225 = vst [vmem:[#allocation11_spill] sm:$0xff] %v14454_v35  ;;  %v16947_v40 = vand.u32 4294901760, %v14447_v32  ;;  %v14469_v42 = vand.u32 4294901760, %v14452_v34  ;;  %v14472_v43 = vsub.f32 %v4901_v29, %v14454_v35  ;;  %v14474_v44 = vand.u32 4294901760, %v4904_v36  ;;  %v10998_v29 = vld [vmem:[%s14410_s28 + $0xb1] sm:$0xff] }
  0x1f   : > { %v14476_v45 = vand.u32 4294901760, %v4907_v37  ;;  %v5011_v46 = vsub.f32 %v14441_v30, %v14459_v38  ;;  %12697 = vmatprep.mubr.f32.mxu0 %v14459_v38  ;;  %v5021_v47 = vsub.f32 %v14444_v31, %v14462_v39  ;;  %v16946_v49 = vand.u32 4294901760, %v14466_v41  ;;  %s10961_s12 = sshll.u32 %s190_s27, 3 }
  0x20   : > { %17226 = vst [vmem:[#allocation12_spill] sm:$0xff] %v14472_v43  ;;  %17227 = vst [vmem:[#allocation13_spill] sm:$0xff] %v14474_v44  ;;  %v354_v48 = vsub.f32 %v14447_v32, %v16947_v40  ;;  %12698 = vmatmul.mubr.f32.vlgmr.msra.gmra.mrb[0].mxu0 %v14462_v39  ;;  %v14490_v51 = vand.u32 4294901760, %v14472_v43  ;;  %v14493_v52 = vsub.f32 %v4904_v36, %v14474_v44  ;;  %v4910_v61 = vsel %vm232_vm1, %v10991_v50, 0  ;;  %s16879_s29 = scalar_lea.vmem %s16945_s3, %s10961_s12 }
  0x21   : > { %17228 = vst [vmem:[#allocation14_spill] sm:$0xff] %v14476_v45  ;;  %v14496_v53 = vsub.f32 %v4907_v37, %v14476_v45  ;;  %v394_v54 = vsub.f32 %v14452_v34, %v14469_v42  ;;  %12700 = vmatprep.mubr.f32.mxu0 %v14469_v42  ;;  %v364_v57 = vsub.f32 %v14466_v41, %v16946_v49  ;;  %v14507_v59 = vand.u32 4294901760, %v5011_v46 }
  0x22   : > { %17229 = vst [vmem:[#allocation15_spill] sm:$0xff] %v14493_v52  ;;  %v355_v56 = vand.u32 4294901760, %v354_v48  ;;  %12722 = vmatpush3.msra.mxu0 %v14408_v8  ;;  %v14510_v60 = vand.u32 4294901760, %v14493_v52  ;;  %v14515_v63 = vand.u32 4294901760, %v5021_v47  ;;  %v14517_v1 = vand.u32 4294901760, %v4910_v61 }
  0x23   : > { %17230 = vst [vmem:[#allocation16_spill] sm:$0xff] %v14496_v53  ;;  %17231 = vst [vmem:[#allocation17_spill] sm:$0xff] %v14507_v59  ;;  %12747 = vmatprep.subr.mxu0 %v14385_v3  ;;  %v365_v0 = vand.u32 4294901760, %v364_v57  ;;  %v4913_v2 = vsel %vm232_vm1, %v10992_v55, 0  ;;  %v14522_v4 = vand.u32 4294901760, %v14496_v53  ;;  %v14524_v10 = vand.u32 4294901760, %v394_v54 }
  0x24   : > { %17232 = vst [vmem:[#allocation18_spill] sm:$0xff] %v14515_v63  ;;  %11995 = vmatprep.mubr.f32.mxu1 %v355_v56  ;;  %17233 = vst [vmem:[#allocation19_spill] sm:$0xff] %v14517_v1  ;;  %12701 = vmatmul.mubr.f32.gmra.mrb[2].mxu0 %v14490_v51  ;;  %v14526_v11 = vand.u32 4294901760, %v4913_v2  ;;  %v4916_v12 = vsel %vm232_vm1, %v10993_v58, 0  ;;  %v14533_v15 = vsub.f32 %v4910_v61, %v14517_v1  ;;  %v4919_v18 = vsel %vm232_vm1, %v10994_v62, 0 }
  0x25   : > { %17234 = vst [vmem:[#allocation20_spill] sm:$0xff] %v14524_v10  ;;  %11996 = vmatmul.mubr.f32.vlgmr.msra.gmra.mrb[0].mxu1 %v365_v0  ;;  %12703 = vmatprep.mubr.f32.mxu0 %v14510_v60  ;;  %v404_v16 = vsub.f32 %v14472_v43, %v14490_v51  ;;  %v14537_v17 = vand.u32 4294901760, %v4916_v12  ;;  %v414_v23 = vsub.f32 %v14493_v52, %v14510_v60  ;;  %v14548_v25 = vand.u32 4294901760, %v4919_v18 }
  0x26   : > { %17235 = vst [vmem:[#allocation21_spill] sm:$0xff] %v14526_v11  ;;  %17236 = vst [vmem:[#allocation22_spill] sm:$0xff] %v14533_v15  ;;  %12020 = vmatpush3.msra.mxu1 %v516_v26  ;;  %11998 = vmatprep.mubr.f32.mxu1 %v14507_v59  ;;  %v14542_v19 = vsub.f32 %v4913_v2, %v14526_v11  ;;  %v424_v24 = vsub.f32 %v14496_v53, %v14522_v4  ;;  %v14553_v36 = vand.u32 4294901760, %v14533_v15  ;;  %v10999_v2 = vld [vmem:[%s14410_s28 + $0xc1] sm:$0xff] }
  0x27   : > { %17237 = vst [vmem:[#allocation23_spill] sm:$0xff] %v14537_v17  ;;  %17239 = vst [vmem:[#allocation25_spill] sm:$0xff] %v14548_v25  ;;  %v14556_v26 = vsub.f32 %v4916_v12, %v14537_v17  ;;  %v4922_v37 = vsel %vm232_vm1, %v10995_v13, 0  ;;  %v4925_v46 = vsel %vm232_vm1, %v10996_v14, 0  ;;  %12045 = vmatprep.subr.mxu1 %v14401_v7  ;;  %v14566_v48 = vsub.f32 %v4919_v18, %v14548_v25 }
  0x28   : > { %17238 = vst [vmem:[#allocation24_spill] sm:$0xff] %v14542_v19  ;;  %12704 = vmatmul.mubr.f32.gmra.mrb[4].mxu0 %v14522_v4  ;;  %v14563_v47 = vand.u32 4294901760, %v14542_v19  ;;  %v14568_v50 = vand.u32 4294901760, %v4922_v37  ;;  %v14570_v54 = vand.u32 4294901760, %v4925_v46  ;;  %v14574_v55 = vand.u32 4294901760, %v404_v16 }
  0x29   : > { %17240 = vst [vmem:[#allocation26_spill] sm:$0xff] %v14556_v26  ;;  %17241 = vst [vmem:[#allocation27_spill] sm:$0xff] %v14566_v48  ;;  %11999 = vmatmul.mubr.f32.gmra.mrb[2].mxu1 %v14515_v63  ;;  %12706 = vmatprep.mubr.f32.mxu0 %v14553_v36  ;;  %v14577_v56 = vand.u32 4294901760, %v14556_v26  ;;  %v4928_v57 = vsel %vm232_vm1, %v10997_v28, 0  ;;  %v4931_v58 = vsel %vm232_vm1, %v10998_v29, 0  ;;  %v14582_v61 = vand.u32 4294901760, %v414_v23 }
  0x2a   : > { %17242 = vst [vmem:[#allocation28_spill] sm:$0xff] %v14568_v50  ;;  %17243 = vst [vmem:[#allocation29_spill] sm:$0xff] %v14570_v54  ;;  %12001 = vmatprep.mubr.f32.mxu1 %v14524_v10  ;;  %v434_v62 = vsub.f32 %v14533_v15, %v14553_v36  ;;  %v14587_v0 = vsub.f32 %v4922_v37, %v14568_v50  ;;  %v14590_v12 = vand.u32 4294901760, %v4928_v57  ;;  %v14593_v13 = vand.u32 4294901760, %v424_v24  ;;  %v11000_v23 = vld [vmem:[%s14410_s28 + $0xc9] sm:$0xff] }
  0x2b   : > { %17244 = vst [vmem:[#allocation30_spill] sm:$0xff] %v14574_v55  ;;  %17245 = vst [vmem:[#allocation31_spill] sm:$0xff] %v14582_v61  ;;  %v14596_v14 = vand.u32 4294901760, %v14566_v48  ;;  %v14599_v16 = vsub.f32 %v4925_v46, %v14570_v54  ;;  %v14601_v18 = vand.u32 4294901760, %v4931_v58  ;;  %v444_v24 = vsub.f32 %v14542_v19, %v14563_v47 }
  0x2c   : > { %17246 = vst [vmem:[#allocation32_spill] sm:$0xff] %v14587_v0  ;;  %17247 = vst [vmem:[#allocation33_spill] sm:$0xff] %v14590_v12  ;;  %12707 = vmatmul.mubr.f32.gmra.mrb[6].mxu0 %v14563_v47  ;;  %v14607_v28 = vand.u32 4294901760, %v14587_v0  ;;  %v14612_v29 = vsub.f32 %v4928_v57, %v14590_v12  ;;  %v4934_v37 = vsel %vm232_vm1, %v10999_v2, 0  ;;  %v14616_v46 = vand.u32 4294901760, %v434_v62 }
  0x2d   : > { %17248 = vst [vmem:[#allocation34_spill] sm:$0xff] %v14593_v13  ;;  %17249 = vst [vmem:[#allocation35_spill] sm:$0xff] %v14599_v16  ;;  %12002 = vmatmul.mubr.f32.gmra.mrb[4].mxu1 %v14574_v55  ;;  %12709 = vmatprep.mubr.f32.mxu0 %v14577_v56  ;;  %v454_v49 = vsub.f32 %v14556_v26, %v14577_v56  ;;  %v14620_v40 = vand.u32 4294901760, %v4934_v37  ;;  %v4937_v55 = vsel %vm232_vm1, %v11000_v23, 0  ;;  %v14625_v10 = vand.u32 4294901760, %v14599_v16 }
  0x2e   : > { %17250 = vst [vmem:[#allocation36_spill] sm:$0xff] %v14601_v18  ;;  %17251 = vst [vmem:[#allocation37_spill] sm:$0xff] %v14612_v29  ;;  %12004 = vmatprep.mubr.f32.mxu1 %v14582_v61  ;;  %v14628_v57 = vsub.f32 %v4931_v58, %v14601_v18  ;;  %v14630_v2 = vand.u32 4294901760, %v4937_v55  ;;  %v14634_v62 = vand.u32 4294901760, %v444_v24  ;;  %v14637_v61 = vand.u32 4294901760, %v14612_v29 }
  0x2f   : > { %17252 = vst [vmem:[#allocation38_spill] sm:$0xff] %v14616_v46  ;;  %17253 = vst [vmem:[#allocation39_spill] sm:$0xff] %v14620_v40  ;;  %v464_v23 = vsub.f32 %v14566_v48, %v14596_v14  ;;  %v14642_v63 = vsub.f32 %v4934_v37, %v14620_v40  ;;  %v14645_v58 = vand.u32 4294901760, %v454_v49 }
  0x30   : > { %12710 = vmatmul.mubr.f32.gmra.mrb[8].mxu0 %v14596_v14  ;;  %17254 = vst [vmem:[#allocation40_spill] sm:$0xff] %v14628_v57  ;;  %17255 = vst [vmem:[#allocation41_spill] sm:$0xff] %v14630_v2  ;;  %v14651_v24 = vand.u32 4294901760, %v14628_v57  ;;  %v14654_v59 = vsub.f32 %v4937_v55, %v14630_v2  ;;  %v494_v8 = vsub.f32 %v14612_v29, %v14637_v61 }
  0x31   : > { %12005 = vmatmul.mubr.f32.gmra.mrb[6].mxu1 %v14593_v13  ;;  %12712 = vmatprep.mubr.f32.mxu0 %v14607_v28  ;;  %17256 = vst [vmem:[#allocation42_spill] sm:$0xff] %v14634_v62  ;;  %17257 = vst [vmem:[#allocation43_spill] sm:$0xff] %v14642_v63  ;;  %v474_v13 = vsub.f32 %v14587_v0, %v14607_v28  ;;  %v14658_v37 = vand.u32 4294901760, %v464_v23  ;;  %v16961_v49 = vand.u32 4294901760, %v14642_v63 }
  0x32   : > { %12007 = vmatprep.mubr.f32.mxu1 %v14616_v46  ;;  %17258 = vst [vmem:[#allocation44_spill] sm:$0xff] %v14645_v58  ;;  %17259 = vst [vmem:[#allocation45_spill] sm:$0xff] %v14654_v59  ;;  %v484_v46 = vsub.f32 %v14599_v16, %v14625_v10  ;;  %v16962_v55 = vand.u32 4294901760, %v14654_v59 }
  0x33   : > { %17260 = vst [vmem:[#allocation46_spill] sm:$0xff] %v14658_v37  ;;  %v14664_v6 = vand.u32 4294901760, %v474_v13  ;;  %v11018_v13 = vld [vmem:[%s16943_s1 + $0x14] sm:$0xf] }
  0x34   : > { %12713 = vmatmul.mubr.f32.gmra.mrb[10].mxu0 %v14625_v10  ;;  %v14673_v23 = vand.u32 4294901760, %v484_v46 }
  0x35   : > { %12008 = vmatmul.mubr.f32.gmra.mrb[8].mxu1 %v14634_v62  ;;  %12715 = vmatprep.mubr.f32.mxu0 %v14637_v61  ;;  %17261 = vst [vmem:[#allocation47_spill] sm:$0xff] %v14664_v6  ;;  %v504_v62 = vsub.f32 %v14628_v57, %v14651_v24 }
  0x36   : > { %12010 = vmatprep.mubr.f32.mxu1 %v14645_v58  ;;  %17262 = vst [vmem:[#allocation48_spill] sm:$0xff] %v14673_v23  ;;  %v14681_v58 = vand.u32 4294901760, %v494_v8 }
  0x37   : > { %v14688_v46 = vand.u32 4294901760, %v504_v62 }
  0x38   : > { %12716 = vmatmul.mubr.f32.gmra.mrb[12].mxu0 %v14651_v24  ;;  %17263 = vst [vmem:[#allocation49_spill] sm:$0xff] %v14681_v58 }
  0x39   : > { %12011 = vmatmul.mubr.f32.gmra.mrb[10].mxu1 %v14658_v37  ;;  %12718 = vmatprep.mubr.f32.mxu0 %v16961_v49  ;;  %v6116_v37 = vsel %vm281_vm0, %v11018_v13, 0  ;;  %17264 = vst [vmem:[#allocation50_spill] sm:$0xff] %v14688_v46  ;;  %v11002_v13 = vld [vmem:[%s14410_s28 + $0x1a] sm:$0xff] }
  0x3a   : > { %12013 = vmatprep.mubr.f32.mxu1 %v14664_v6  ;;  %v14691_v49 = vand.u32 4294901760, %v6116_v37 }
  0x3c   : > { %12719 = vmatmul.mubr.f32.gmra.mrb[14].mxu0 %v16962_v55  ;;  %v11003_v55 = vld [vmem:[%s14410_s28 + $0x22] sm:$0xff] }
  0x3d   : > { %12014 = vmatmul.mubr.f32.gmra.mrb[12].mxu1 %v14673_v23  ;;  %12723 = vmatprep.mubr.f32.mxu0 %v14427_v20  ;;  %v6071_v59 = vsel %vm232_vm1, %v11003_v55, 0  ;;  %v11006_v23 = vld [vmem:[%s14410_s28 + $0x4a] sm:$0xff] }
  0x3e   : > { %12016 = vmatprep.mubr.f32.mxu1 %v14681_v58  ;;  %v14766_v63 = vand.u32 4294901760, %v6071_v59 }
  0x40   : > { %12724 = vmatmul.mubr.f32.vlgmr.msra.gmra.mrb[0].mxu0 %v14429_v21 }
  0x41   : > { %12017 = vmatmul.mubr.f32.gmra.mrb[14].mxu1 %v14688_v46  ;;  %12726 = vmatprep.mubr.f32.mxu0 %v14436_v27  ;;  %v11004_v46 = vld [vmem:[%s14410_s28 + $0x32] sm:$0xff] }
  0x42   : > { %12021 = vmatprep.mubr.f32.mxu1 %v14431_v22  ;;  %12748 = vmatpush3.msra.mxu0 %v14385_v3  ;;  %v6080_v3 = vsel %vm232_vm1, %v11006_v23, 0 }
  0x43   : > { %12773 = vmatprep.subr.mxu0 %v14691_v49  ;;  %v14794_v23 = vand.u32 4294901760, %v6080_v3 }
  0x44   : > { %12727 = vmatmul.mubr.f32.gmra.mrb[2].mxu0 %v14454_v35 }
  0x45   : > { %12022 = vmatmul.mubr.f32.vlgmr.msra.gmra.mrb[0].mxu1 %v14449_v33  ;;  %12729 = vmatprep.mubr.f32.mxu0 %v14474_v44 }
  0x46   : > { %12046 = vmatpush3.msra.mxu1 %v14401_v7  ;;  %12024 = vmatprep.mubr.f32.mxu1 %v14427_v20  ;;  %v14718_v7 = vsub.f32 %v6116_v37, %v14691_v49 }
  0x47   : > { %12071 = vmatprep.subr.mxu1 %v14391_v5 }
  0x48   : > { %12730 = vmatmul.mubr.f32.gmra.mrb[4].mxu0 %v14476_v45  ;;  %v14725_v8 = vand.u32 4294901760, %v14718_v7 }
  0x49   : > { %12025 = vmatmul.mubr.f32.gmra.mrb[2].mxu1 %v14429_v21  ;;  %12732 = vmatprep.mubr.f32.mxu0 %v14517_v1 }
  0x4a   : > { %12027 = vmatprep.mubr.f32.mxu1 %v14436_v27  ;;  %17265 = vst [vmem:[#allocation51_spill] sm:$0xff] %v14725_v8  ;;  %v6348_v62 = vsub.f32 %v14718_v7, %v14725_v8 }
  0x4c   : > { %12733 = vmatmul.mubr.f32.gmra.mrb[6].mxu0 %v14526_v11  ;;  %v14737_v37 = vand.u32 4294901760, %v6348_v62  ;;  %v6068_v62 = vsel %vm232_vm1, %v11002_v13, 0  ;;  %v6074_v13 = vsel %vm232_vm1, %v11004_v46, 0  ;;  %v11008_v46 = vld [vmem:[%s14410_s28 + $0x62] sm:$0xff] }
  0x4d   : > { %12028 = vmatmul.mubr.f32.gmra.mrb[4].mxu1 %v14454_v35  ;;  %12735 = vmatprep.mubr.f32.mxu0 %v14537_v17  ;;  %v14758_v58 = vand.u32 4294901760, %v6068_v62  ;;  %v14773_v6 = vand.u32 4294901760, %v6074_v13 }
  0x4e   : > { %12030 = vmatprep.mubr.f32.mxu1 %v14474_v44 }
  0x50   : > { %12736 = vmatmul.mubr.f32.gmra.mrb[8].mxu0 %v14548_v25 }
  0x51   : > { %12031 = vmatmul.mubr.f32.gmra.mrb[6].mxu1 %v14476_v45  ;;  %12738 = vmatprep.mubr.f32.mxu0 %v14568_v50 }
  0x52   : > { %12033 = vmatprep.mubr.f32.mxu1 %v14517_v1 }
  0x54   : > { %12739 = vmatmul.mubr.f32.gmra.mrb[10].mxu0 %v14570_v54 }
  0x55   : > { %12034 = vmatmul.mubr.f32.gmra.mrb[8].mxu1 %v14526_v11  ;;  %12741 = vmatprep.mubr.f32.mxu0 %v14590_v12 }
  0x56   : > { %12036 = vmatprep.mubr.f32.mxu1 %v14537_v17 }
  0x58   : > { %12742 = vmatmul.mubr.f32.gmra.mrb[12].mxu0 %v14601_v18 }
  0x59   : > { %12037 = vmatmul.mubr.f32.gmra.mrb[10].mxu1 %v14548_v25  ;;  %12744 = vmatprep.mubr.f32.mxu0 %v14620_v40 }
  0x5a   : > { %12039 = vmatprep.mubr.f32.mxu1 %v14568_v50 }
  0x5c   : > { %12745 = vmatmul.mubr.f32.gmra.mrb[14].mxu0 %v14630_v2 }
  0x5d   : > { %12040 = vmatmul.mubr.f32.gmra.mrb[12].mxu1 %v14570_v54  ;;  %12749 = vmatprep.mubr.f32.mxu0 %v14427_v20 }
  0x5e   : > { %12042 = vmatprep.mubr.f32.mxu1 %v14590_v12 }
  0x60   : > { %12750 = vmatmul.mubr.f32.vlgmr.msra.gmra.mrb[0].mxu0 %v14429_v21 }
  0x61   : > { %12043 = vmatmul.mubr.f32.gmra.mrb[14].mxu1 %v14601_v18  ;;  %12752 = vmatprep.mubr.f32.mxu0 %v14436_v27 }
  0x62   : > { %12047 = vmatprep.mubr.f32.mxu1 %v14447_v32  ;;  %12774 = vmatpush3.msra.mxu0 %v14691_v49 }
  0x63   : > { %12799 = vmatprep.subr.mxu0 %v14737_v37 }
  0x64   : > { %12753 = vmatmul.mubr.f32.gmra.mrb[2].mxu0 %v14454_v35 }
  0x65   : > { %12048 = vmatmul.mubr.f32.vlgmr.msra.gmra.mrb[0].mxu1 %v14466_v41  ;;  %12755 = vmatprep.mubr.f32.mxu0 %v14474_v44 }
  0x66   : > { %12072 = vmatpush3.msra.mxu1 %v14391_v5  ;;  %12050 = vmatprep.mubr.f32.mxu1 %v14441_v30  ;;  %v11005_v30 = vld [vmem:[%s14410_s28 + $0x3a] sm:$0xff] }
  0x67   : > { %12097 = vmatprep.subr.mxu1 %v14413_v9  ;;  %v6077_v55 = vsel %vm232_vm1, %v11005_v30, 0 }
  0x68   : > { %12756 = vmatmul.mubr.f32.gmra.mrb[4].mxu0 %v14476_v45  ;;  %v14784_v8 = vand.u32 4294901760, %v6077_v55 }
  0x69   : > { %12051 = vmatmul.mubr.f32.gmra.mrb[2].mxu1 %v14444_v31  ;;  %12758 = vmatprep.mubr.f32.mxu0 %v14517_v1  ;;  %v14771_v31 = vsub.f32 %v6068_v62, %v14758_v58  ;;  %v14816_v1 = vsub.f32 %v6080_v3, %v14794_v23 }
  0x6a   : > { %12053 = vmatprep.mubr.f32.mxu1 %v14452_v34  ;;  %v11007_v34 = vld [vmem:[%s14410_s28 + $0x52] sm:$0xff]  ;;  %v14806_v30 = vsub.f32 %v6077_v55, %v14784_v8  ;;  %v11011_v55 = vld [vmem:[%s14410_s28 + $0x82] sm:$0xff] }
  0x6b   : > { %17266 = vst [vmem:[#allocation52_spill] sm:$0xff] %v14771_v31  ;;  %v6083_v62 = vsel %vm232_vm1, %v11007_v34, 0  ;;  %17271 = vst [vmem:[#allocation56_spill] sm:$0xff] %v14816_v1 }
  0x6c   : > { %12759 = vmatmul.mubr.f32.gmra.mrb[6].mxu0 %v14526_v11  ;;  %v14799_v11 = vand.u32 4294901760, %v6083_v62  ;;  %17269 = vst [vmem:[#allocation55_spill] sm:$0xff] %v14806_v30 }
  0x6d   : > { %12054 = vmatmul.mubr.f32.gmra.mrb[4].mxu1 %v14472_v43  ;;  %12761 = vmatprep.mubr.f32.mxu0 %v14537_v17  ;;  %v14782_v43 = vsub.f32 %v6071_v59, %v14766_v63  ;;  %v6086_v17 = vsel %vm232_vm1, %v11008_v46, 0  ;;  %v11010_v59 = vld [vmem:[%s14410_s28 + $0x7a] sm:$0xff] }
  0x6e   : > { %12056 = vmatprep.mubr.f32.mxu1 %v14493_v52  ;;  %v14792_v52 = vsub.f32 %v6074_v13, %v14773_v6  ;;  %v14801_v34 = vand.u32 4294901760, %v6086_v17  ;;  %v6092_v46 = vsel %vm232_vm1, %v11010_v59, 0 }
  0x6f   : > { %17267 = vst [vmem:[#allocation53_spill] sm:$0xff] %v14782_v43  ;;  %v17274_v3 = vand.u32 4294901760, %v14782_v43 }
  0x70   : > { %12762 = vmatmul.mubr.f32.gmra.mrb[8].mxu0 %v14548_v25  ;;  %17268 = vst [vmem:[#allocation54_spill] sm:$0xff] %v14792_v52  ;;  %v11009_v25 = vld [vmem:[%s14410_s28 + $0x6a] sm:$0xff] }
  0x71   : > { %12057 = vmatmul.mubr.f32.gmra.mrb[6].mxu1 %v14496_v53  ;;  %12764 = vmatprep.mubr.f32.mxu0 %v14568_v50  ;;  %v6089_v13 = vsel %vm232_vm1, %v11009_v25, 0  ;;  %v14822_v25 = vsub.f32 %v6083_v62, %v14799_v11  ;;  %v6197_v59 = vsub.f32 %v14782_v43, %v17274_v3  ;;  %v17275_v62 = vand.u32 4294901760, %v14792_v52  ;;  %v11013_v50 = vld [vmem:[%s14410_s28 + $0x9a] sm:$0xff] }
  0x72   : > { %12059 = vmatprep.mubr.f32.mxu1 %v14533_v15  ;;  %v17270_v15 = vand.u32 4294901760, %v14771_v31 }
  0x73   : > { %17272 = vst [vmem:[#allocation57_spill] sm:$0xff] %v14822_v25 }
  0x74   : > { %12765 = vmatmul.mubr.f32.gmra.mrb[10].mxu0 %v14570_v54  ;;  %v6187_v53 = vsub.f32 %v14771_v31, %v17270_v15  ;;  %v11012_v15 = vld [vmem:[%s14410_s28 + $0x92] sm:$0xff]  ;;  %v6207_v31 = vsub.f32 %v14792_v52, %v17275_v62  ;;  %v6095_v54 = vsel %vm232_vm1, %v11011_v55, 0  ;;  %v6198_v62 = vand.u32 4294901760, %v6197_v59 }
  0x75   : > { %12060 = vmatmul.mubr.f32.gmra.mrb[8].mxu1 %v14542_v19  ;;  %12767 = vmatprep.mubr.f32.mxu0 %v14590_v12  ;;  %v14825_v19 = vsub.f32 %v6086_v17, %v14801_v34  ;;  %v14827_v12 = vand.u32 4294901760, %v6089_v13  ;;  %v6098_v3 = vsel %vm232_vm1, %v11012_v15, 0  ;;  %v6101_v59 = vsel %vm232_vm1, %v11013_v50, 0 }
  0x76   : > { %12062 = vmatprep.mubr.f32.mxu1 %v14556_v26  ;;  %v14835_v26 = vand.u32 4294901760, %v6092_v46  ;;  %v6188_v17 = vand.u32 4294901760, %v6187_v53 }
  0x77   : > { %17273 = vst [vmem:[#allocation58_spill] sm:$0xff] %v14825_v19  ;;  %v14850_v53 = vsub.f32 %v6089_v13, %v14827_v12  ;;  %v17277_v13 = vand.u32 4294901760, %v14816_v1 }
  0x78   : > { %12768 = vmatmul.mubr.f32.gmra.mrb[12].mxu0 %v14601_v18  ;;  %v17276_v18 = vand.u32 4294901760, %v14806_v30  ;;  %v14858_v15 = vsub.f32 %v6092_v46, %v14835_v26  ;;  %v11015_v46 = vld [vmem:[%s14410_s28 + $0xb2] sm:$0xff] }
  0x79   : > { %12063 = vmatmul.mubr.f32.gmra.mrb[10].mxu1 %v14566_v48  ;;  %12770 = vmatprep.mubr.f32.mxu0 %v14620_v40  ;;  %v11014_v40 = vld [vmem:[%s14410_s28 + $0xaa] sm:$0xff]  ;;  %v6208_v48 = vand.u32 4294901760, %v6207_v31  ;;  %v6227_v43 = vsub.f32 %v14816_v1, %v17277_v13  ;;  %v11016_v13 = vld [vmem:[%s14410_s28 + $0xc2] sm:$0xff] }
  0x7a   : > { %12065 = vmatprep.mubr.f32.mxu1 %v14587_v0  ;;  %v6217_v55 = vsub.f32 %v14806_v30, %v17276_v18  ;;  %v14860_v0 = vand.u32 4294901760, %v6095_v54  ;;  %v6104_v18 = vsel %vm232_vm1, %v11014_v40, 0  ;;  %v17278_v30 = vand.u32 4294901760, %v14822_v25 }
  0x7b   : > { %v14884_v40 = vand.u32 4294901760, %v6101_v59 }
  0x7c   : > { %12771 = vmatmul.mubr.f32.gmra.mrb[14].mxu0 %v14630_v2  ;;  %v14866_v2 = vand.u32 4294901760, %v6098_v3  ;;  %v6237_v52 = vsub.f32 %v14822_v25, %v17278_v30  ;;  %v6218_v1 = vand.u32 4294901760, %v6217_v55  ;;  %v6228_v30 = vand.u32 4294901760, %v6227_v43  ;;  %v11017_v55 = vld [vmem:[%s14410_s28 + $0xca] sm:$0xff] }
  0x7d   : > { %12066 = vmatmul.mubr.f32.gmra.mrb[12].mxu1 %v14599_v16  ;;  %12775 = vmatprep.mubr.f32.mxu0 %v6188_v17  ;;  %v17279_v17 = vand.u32 4294901760, %v14825_v19  ;;  %v6107_v16 = vsel %vm232_vm1, %v11015_v46, 0 }
  0x7e   : > { %12068 = vmatprep.mubr.f32.mxu1 %v14612_v29  ;;  %v14882_v29 = vsub.f32 %v6095_v54, %v14860_v0  ;;  %v14888_v25 = vsub.f32 %v6098_v3, %v14866_v2  ;;  %v6110_v54 = vsel %vm232_vm1, %v11016_v13, 0  ;;  %v6238_v50 = vand.u32 4294901760, %v6237_v52 }
  0x7f   : > { %v6247_v31 = vsub.f32 %v14825_v19, %v17279_v17  ;;  %v14890_v17 = vand.u32 4294901760, %v6104_v18  ;;  %v17283_v3 = vand.u32 4294901760, %v14858_v15  ;;  %v14909_v13 = vand.u32 4294901760, %v6107_v16 }
  0x80   : > { %12776 = vmatmul.mubr.f32.vlgmr.msra.gmra.mrb[0].mxu0 %v6198_v62  ;;  %v17281_v62 = vand.u32 4294901760, %v14447_v32  ;;  %v17026_v32 = vand.u32 4294901760, %v14882_v29  ;;  %v17285_v52 = vand.u32 4294901760, %v14466_v41 }
  0x81   : > { %12069 = vmatmul.mubr.f32.gmra.mrb[14].mxu1 %v14628_v57  ;;  %12778 = vmatprep.mubr.f32.mxu0 %v6208_v48  ;;  %17280 = vst [vmem:[#allocation59_spill] sm:$0xff] %v14890_v17  ;;  %v6248_v19 = vand.u32 4294901760, %v6247_v31  ;;  %v17282_v48 = vand.u32 4294901760, %v14850_v53  ;;  %v6267_v46 = vsub.f32 %v14858_v15, %v17283_v3  ;;  %17284 = vst [vmem:[#allocation60_spill] sm:$0xff] %v14909_v13  ;;  %v17025_v31 = vand.u32 4294901760, %v14888_v25  ;;  %v203_v57 = vld [vmem:[%s14410_s28 + $0x48] sm:$0xff] }
  0x82   : > { %12073 = vmatprep.mubr.f32.mxu1 %v17281_v62  ;;  %12800 = vmatpush3.msra.mxu0 %v14737_v37  ;;  %v14907_v37 = vsub.f32 %v6101_v59, %v14884_v40  ;;  %v14915_v62 = vsub.f32 %v6104_v18, %v14890_v17  ;;  %v6277_v41 = vsub.f32 %v14882_v29, %v17026_v32 }
  0x83   : > { %v6257_v43 = vsub.f32 %v14850_v53, %v17282_v48  ;;  %12825 = vmatprep.subr.mxu0 %v14718_v7  ;;  %v6113_v48 = vsel %vm232_vm1, %v11017_v55, 0  ;;  %v14928_v18 = vsub.f32 %v6107_v16, %v14909_v13 }
  0x84   : > { %12779 = vmatmul.mubr.f32.gmra.mrb[2].mxu0 %v6218_v1  ;;  %v14917_v1 = vand.u32 4294901760, %v6110_v54  ;;  %v14930_v3 = vand.u32 4294901760, %v6113_v48  ;;  %v6278_v16 = vand.u32 4294901760, %v6277_v41 }
  0x85   : > { %12074 = vmatmul.mubr.f32.vlgmr.msra.gmra.mrb[0].mxu1 %v17285_v52  ;;  %12781 = vmatprep.mubr.f32.mxu0 %v6228_v30  ;;  %v6258_v59 = vand.u32 4294901760, %v6257_v43  ;;  %v17024_v30 = vand.u32 4294901760, %v14907_v37 }
  0x86   : > { %17286 = vst [vmem:[#allocation61_spill] sm:$0xff] %v14917_v1  ;;  %12098 = vmatpush3.msra.mxu1 %v14413_v9  ;;  %12076 = vmatprep.mubr.f32.mxu1 %v14459_v38  ;;  %17287 = vst [vmem:[#allocation62_spill] sm:$0xff] %v14930_v3  ;;  %v6268_v9 = vand.u32 4294901760, %v6267_v46  ;;  %v6287_v38 = vsub.f32 %v14888_v25, %v17025_v31  ;;  %v14938_v55 = vsub.f32 %v6110_v54, %v14917_v1 }
  0x87   : > { %12123 = vmatprep.subr.mxu1 %v14391_v5  ;;  %v6297_v43 = vsub.f32 %v14907_v37, %v17024_v30 }
  0x88   : > { %12782 = vmatmul.mubr.f32.gmra.mrb[4].mxu0 %v6238_v50  ;;  %v17023_v50 = vand.u32 4294901760, %v14915_v62  ;;  %v6288_v46 = vand.u32 4294901760, %v6287_v38 }
  0x89   : > { %12077 = vmatmul.mubr.f32.gmra.mrb[2].mxu1 %v14462_v39  ;;  %12784 = vmatprep.mubr.f32.mxu0 %v6248_v19  ;;  %v17022_v39 = vand.u32 4294901760, %v14928_v18  ;;  %v14946_v19 = vsub.f32 %v6113_v48, %v14930_v3  ;;  %v6298_v52 = vand.u32 4294901760, %v6297_v43  ;;  %v17295_v43 = vld [vmem:[#allocation52_spill] sm:$0xff] }
  0x8a   : > { %12079 = vmatprep.mubr.f32.mxu1 %v14469_v42  ;;  %v6307_v54 = vsub.f32 %v14915_v62, %v17023_v50  ;;  %v17021_v42 = vand.u32 4294901760, %v14938_v55  ;;  %v200_v50 = vld [vmem:[%s14410_s28 + $0x20] sm:$0xff] }
  0x8b   : > { %v17020_v48 = vand.u32 4294901760, %v14946_v19 }
  0x8c   : > { %12785 = vmatmul.mubr.f32.gmra.mrb[6].mxu0 %v6258_v59  ;;  %v6317_v59 = vsub.f32 %v14928_v18, %v17022_v39  ;;  %v6327_v41 = vsub.f32 %v14938_v55, %v17021_v42 }
  0x8d   : > { %12080 = vmatmul.mubr.f32.gmra.mrb[4].mxu1 %v14490_v51  ;;  %12787 = vmatprep.mubr.f32.mxu0 %v6268_v9  ;;  %v6308_v51 = vand.u32 4294901760, %v6307_v54  ;;  %v6337_v9 = vsub.f32 %v14946_v19, %v17020_v48 }
  0x8e   : > { %12082 = vmatprep.mubr.f32.mxu1 %v14510_v60  ;;  %v6318_v60 = vand.u32 4294901760, %v6317_v59  ;;  %v6328_v38 = vand.u32 4294901760, %v6327_v41  ;;  %v17298_v59 = vld [vmem:[#allocation36_spill] sm:$0xff] }
  0x90   : > { %12788 = vmatmul.mubr.f32.gmra.mrb[8].mxu0 %v6278_v16  ;;  %v17294_v16 = vld [vmem:[#allocation29_spill] sm:$0xff] }
  0x91   : > { %12083 = vmatmul.mubr.f32.gmra.mrb[6].mxu1 %v14522_v4  ;;  %12790 = vmatprep.mubr.f32.mxu0 %v6288_v46  ;;  %v6338_v4 = vand.u32 4294901760, %v6337_v9  ;;  %v17296_v46 = vld [vmem:[#allocation33_spill] sm:$0xff]  ;;  %v17301_v9 = vld [vmem:[#allocation55_spill] sm:$0xff] }
  0x92   : > { %12085 = vmatprep.mubr.f32.mxu1 %v14553_v36  ;;  %v213_v36 = vld [vmem:[%s16943_s1] sm:$0xf] }
  0x94   : > { %12791 = vmatmul.mubr.f32.gmra.mrb[10].mxu0 %v6298_v52  ;;  %v17297_v52 = vld [vmem:[#allocation53_spill] sm:$0xff] }
  0x95   : > { %12086 = vmatmul.mubr.f32.gmra.mrb[8].mxu1 %v14563_v47  ;;  %12793 = vmatprep.mubr.f32.mxu0 %v6308_v51  ;;  %v1425_v47 = vsel %vm281_vm0, %v213_v36, 0  ;;  %v17299_v51 = vld [vmem:[#allocation54_spill] sm:$0xff] }
  0x96   : > { %12088 = vmatprep.mubr.f32.mxu1 %v14577_v56  ;;  %v17289_v56 = vld [vmem:[#allocation21_spill] sm:$0xff]  ;;  %v17304_v36 = vld [vmem:[#allocation58_spill] sm:$0xff] }
  0x98   : > { %12794 = vmatmul.mubr.f32.gmra.mrb[12].mxu0 %v6318_v60  ;;  %v17300_v60 = vld [vmem:[#allocation51_spill] sm:$0xff] }
  0x99   : > { %12089 = vmatmul.mubr.f32.gmra.mrb[10].mxu1 %v14596_v14  ;;  %12796 = vmatprep.mubr.f32.mxu0 %v6328_v38  ;;  %v17302_v38 = vld [vmem:[#allocation56_spill] sm:$0xff] }
  0x9a   : > { %12091 = vmatprep.mubr.f32.mxu1 %v14607_v28  ;;  %v17291_v28 = vld [vmem:[#allocation25_spill] sm:$0xff] }
  0x9c   : > { %12797 = vmatmul.mubr.f32.gmra.mrb[14].mxu0 %v6338_v4  ;;  %v197_v4 = vld [vmem:[%s14410_s28] sm:$0xff] }
  0x9d   : > { %12092 = vmatmul.mubr.f32.gmra.mrb[12].mxu1 %v14625_v10  ;;  %12801 = vmatprep.mubr.f32.mxu0 %v14758_v58  ;;  %v14982_v10 = vand.u32 4294901760, %v1425_v47 }
  0x9e   : > { %12094 = vmatprep.mubr.f32.mxu1 %v14637_v61  ;;  %v17290_v61 = vld [vmem:[#allocation23_spill] sm:$0xff] }
  0x9f   : > { %v15008_v14 = vsub.f32 %v1425_v47, %v14982_v10  ;;  %v198_v47 = vld [vmem:[%s14410_s28 + $0x8] sm:$0xff] }
  0xa0   : > { %12802 = vmatmul.mubr.f32.vlgmr.msra.gmra.mrb[0].mxu0 %v14766_v63  ;;  %v1380_v42 = vsel %vm232_vm1, %v198_v47, 0  ;;  %v1386_v47 = vsel %vm232_vm1, %v200_v50, 0  ;;  %v1395_v50 = vsel %vm232_vm1, %v203_v57, 0 }
  0xa1   : > { %12095 = vmatmul.mubr.f32.gmra.mrb[14].mxu1 %v14651_v24  ;;  %12804 = vmatprep.mubr.f32.mxu0 %v14773_v6  ;;  %v17292_v24 = vld [vmem:[#allocation28_spill] sm:$0xff]  ;;  %v15058_v30 = vand.u32 4294901760, %v1380_v42 }
  0xa2   : > { %12099 = vmatprep.mubr.f32.mxu1 %v14431_v22  ;;  %12826 = vmatpush3.msra.mxu0 %v14718_v7  ;;  %v15015_v7 = vand.u32 4294901760, %v15008_v14 }
  0xa3   : > { %12851 = vmatprep.subr.mxu0 %v14691_v49 }
  0xa4   : > { %12805 = vmatmul.mubr.f32.gmra.mrb[2].mxu0 %v14784_v8  ;;  %17293 = vst [vmem:[#allocation63_spill] sm:$0xff] %v15015_v7  ;;  %v1657_v54 = vsub.f32 %v15008_v14, %v15015_v7 }
  0xa5   : > { %12100 = vmatmul.mubr.f32.vlgmr.msra.gmra.mrb[0].mxu1 %v14449_v33  ;;  %12807 = vmatprep.mubr.f32.mxu0 %v14794_v23 }
  0xa6   : > { %12124 = vmatpush3.msra.mxu1 %v14391_v5  ;;  %12102 = vmatprep.mubr.f32.mxu1 %v14427_v20  ;;  %v17288_v5 = vld [vmem:[#allocation19_spill] sm:$0xff]  ;;  %v15028_v41 = vand.u32 4294901760, %v1657_v54  ;;  %v199_v54 = vld [vmem:[%s14410_s28 + $0x18] sm:$0xff] }
  0xa7   : > { %12149 = vmatprep.subr.mxu1 %v14982_v10  ;;  %v1383_v39 = vsel %vm232_vm1, %v199_v54, 0  ;;  %v202_v54 = vld [vmem:[%s14410_s28 + $0x38] sm:$0xff] }
  0xa8   : > { %12808 = vmatmul.mubr.f32.gmra.mrb[4].mxu0 %v14799_v11  ;;  %v15064_v32 = vand.u32 4294901760, %v1383_v39 }
  0xa9   : > { %12103 = vmatmul.mubr.f32.gmra.mrb[2].mxu1 %v14429_v21  ;;  %12810 = vmatprep.mubr.f32.mxu0 %v14801_v34 }
  0xaa   : > { %12105 = vmatprep.mubr.f32.mxu1 %v14436_v27 }
  0xac   : > { %12811 = vmatmul.mubr.f32.gmra.mrb[6].mxu0 %v14827_v12 }
  0xad   : > { %12106 = vmatmul.mubr.f32.gmra.mrb[4].mxu1 %v14454_v35  ;;  %12813 = vmatprep.mubr.f32.mxu0 %v14835_v26 }
  0xae   : > { %12108 = vmatprep.mubr.f32.mxu1 %v14474_v44 }
  0xb0   : > { %12814 = vmatmul.mubr.f32.gmra.mrb[8].mxu0 %v14860_v0 }
  0xb1   : > { %12109 = vmatmul.mubr.f32.gmra.mrb[6].mxu1 %v14476_v45  ;;  %12816 = vmatprep.mubr.f32.mxu0 %v14866_v2 }
  0xb2   : > { %12111 = vmatprep.mubr.f32.mxu1 %v17288_v5 }
  0xb4   : > { %12817 = vmatmul.mubr.f32.gmra.mrb[10].mxu0 %v14884_v40 }
  0xb5   : > { %12112 = vmatmul.mubr.f32.gmra.mrb[8].mxu1 %v17289_v56  ;;  %12819 = vmatprep.mubr.f32.mxu0 %v14890_v17  ;;  %v208_v17 = vld [vmem:[%s14410_s28 + $0x80] sm:$0xff] }
  0xb6   : > { %12114 = vmatprep.mubr.f32.mxu1 %v17290_v61 }
  0xb8   : > { %12820 = vmatmul.mubr.f32.gmra.mrb[12].mxu0 %v14909_v13 }
  0xb9   : > { %12115 = vmatmul.mubr.f32.gmra.mrb[10].mxu1 %v17291_v28  ;;  %12822 = vmatprep.mubr.f32.mxu0 %v14917_v1  ;;  %v206_v1 = vld [vmem:[%s14410_s28 + $0x68] sm:$0xff] }
  0xba   : > { %12117 = vmatprep.mubr.f32.mxu1 %v17292_v24 }
  0xbc   : > { %12823 = vmatmul.mubr.f32.gmra.mrb[14].mxu0 %v14930_v3 }
  0xbd   : > { %12118 = vmatmul.mubr.f32.gmra.mrb[12].mxu1 %v17294_v16  ;;  %12827 = vmatprep.mubr.f32.mxu0 %v17295_v43 }
  0xbe   : > { %12120 = vmatprep.mubr.f32.mxu1 %v17296_v46 }
  0xc0   : > { %12828 = vmatmul.mubr.f32.vlgmr.msra.gmra.mrb[0].mxu0 %v17297_v52 }
  0xc1   : > { %12121 = vmatmul.mubr.f32.gmra.mrb[14].mxu1 %v17298_v59  ;;  %12830 = vmatprep.mubr.f32.mxu0 %v17299_v51 }
  0xc2   : > { %12125 = vmatprep.mubr.f32.mxu1 %v14431_v22  ;;  %12852 = vmatpush3.msra.mxu0 %v14691_v49  ;;  %v17303_v22 = vld [vmem:[#allocation57_spill] sm:$0xff] }
  0xc3   : > { %12877 = vmatprep.subr.mxu0 %v17300_v60 }
  0xc4   : > { %12831 = vmatmul.mubr.f32.gmra.mrb[2].mxu0 %v17301_v9 }
  0xc5   : > { %12126 = vmatmul.mubr.f32.vlgmr.msra.gmra.mrb[0].mxu1 %v14449_v33  ;;  %12833 = vmatprep.mubr.f32.mxu0 %v17302_v38  ;;  %v1377_v33 = vsel %vm232_vm1, %v197_v4, 0  ;;  %v201_v4 = vld [vmem:[%s14410_s28 + $0x30] sm:$0xff] }
  0xc6   : > { %12150 = vmatpush3.msra.mxu1 %v14982_v10  ;;  %12128 = vmatprep.mubr.f32.mxu1 %v14427_v20  ;;  %v15049_v48 = vand.u32 4294901760, %v1377_v33  ;;  %v15092_v20 = vand.u32 4294901760, %v1395_v50 }
  0xc7   : > { %12175 = vmatprep.subr.mxu1 %v15028_v41 }
  0xc8   : > { %12834 = vmatmul.mubr.f32.gmra.mrb[4].mxu0 %v17303_v22  ;;  %v15062_v31 = vsub.f32 %v1377_v33, %v15049_v48  ;;  %v15076_v33 = vand.u32 4294901760, %v1386_v47 }
  0xc9   : > { %12129 = vmatmul.mubr.f32.gmra.mrb[2].mxu1 %v14429_v21  ;;  %12836 = vmatprep.mubr.f32.mxu0 %v17304_v36  ;;  %v205_v21 = vld [vmem:[%s14410_s28 + $0x60] sm:$0xff] }
  0xca   : > { %12131 = vmatprep.mubr.f32.mxu1 %v14436_v27  ;;  %17305 = vst [vmem:[#allocation52_spill] sm:$0xff] %v15062_v31 }
  0xcc   : > { %12837 = vmatmul.mubr.f32.gmra.mrb[6].mxu0 %v14850_v53 }
  0xcd   : > { %12132 = vmatmul.mubr.f32.gmra.mrb[4].mxu1 %v14454_v35  ;;  %12839 = vmatprep.mubr.f32.mxu0 %v14858_v15  ;;  %v17044_v35 = vand.u32 4294901760, %v15062_v31 }
  0xce   : > { %12134 = vmatprep.mubr.f32.mxu1 %v14474_v44  ;;  %v1389_v44 = vsel %vm232_vm1, %v201_v4, 0  ;;  %v15083_v4 = vsub.f32 %v1383_v39, %v15064_v32  ;;  %v15098_v39 = vsub.f32 %v1386_v47, %v15076_v33 }
  0xcf   : > { %v15085_v27 = vand.u32 4294901760, %v1389_v44 }
  0xd0   : > { %12840 = vmatmul.mubr.f32.gmra.mrb[8].mxu0 %v14882_v29  ;;  %17307 = vst [vmem:[#allocation54_spill] sm:$0xff] %v15083_v4 }
  0xd1   : > { %12135 = vmatmul.mubr.f32.gmra.mrb[6].mxu1 %v14476_v45  ;;  %12842 = vmatprep.mubr.f32.mxu0 %v14888_v25  ;;  %v1392_v45 = vsel %vm232_vm1, %v202_v54, 0  ;;  %v15107_v3 = vsub.f32 %v1389_v44, %v15085_v27  ;;  %v17310_v44 = vand.u32 4294901760, %v17295_v43  ;;  %v1404_v43 = vsel %vm232_vm1, %v206_v1, 0 }
  0xd2   : > { %12137 = vmatprep.mubr.f32.mxu1 %v17288_v5  ;;  %v15074_v5 = vsub.f32 %v1380_v42, %v15058_v30  ;;  %v15090_v42 = vand.u32 4294901760, %v1392_v45  ;;  %v17317_v1 = vand.u32 4294901760, %v17299_v51 }
  0xd3   : > { %17308 = vst [vmem:[#allocation51_spill] sm:$0xff] %v15107_v3 }
  0xd4   : > { %12843 = vmatmul.mubr.f32.gmra.mrb[10].mxu0 %v14907_v37  ;;  %17306 = vst [vmem:[#allocation53_spill] sm:$0xff] %v15074_v5  ;;  %v15113_v47 = vsub.f32 %v1392_v45, %v15090_v42 }
  0xd5   : > { %12138 = vmatmul.mubr.f32.gmra.mrb[8].mxu1 %v17289_v56  ;;  %12845 = vmatprep.mubr.f32.mxu0 %v14915_v62  ;;  %v204_v56 = vld [vmem:[%s14410_s28 + $0x50] sm:$0xff] }
  0xd6   : > { %12140 = vmatprep.mubr.f32.mxu1 %v17290_v61  ;;  %v1398_v54 = vsel %vm232_vm1, %v204_v56, 0  ;;  %v1496_v61 = vsub.f32 %v15062_v31, %v17044_v35  ;;  %v15116_v56 = vsub.f32 %v1395_v50, %v15092_v20  ;;  %v207_v35 = vld [vmem:[%s14410_s28 + $0x78] sm:$0xff]  ;;  %v17312_v31 = vand.u32 4294901760, %v15083_v4 }
  0xd7   : > { %v15118_v57 = vand.u32 4294901760, %v1398_v54 }
  0xd8   : > { %12846 = vmatmul.mubr.f32.gmra.mrb[12].mxu0 %v14928_v18  ;;  %17309 = vst [vmem:[#allocation55_spill] sm:$0xff] %v15116_v56  ;;  %v1497_v50 = vand.u32 4294901760, %v1496_v61  ;;  %v1516_v13 = vsub.f32 %v15083_v4, %v17312_v31  ;;  %v15146_v61 = vand.u32 4294901760, %v15116_v56 }
  0xd9   : > { %12141 = vmatmul.mubr.f32.gmra.mrb[10].mxu1 %v17291_v28  ;;  %12848 = vmatprep.mubr.f32.mxu0 %v14938_v55  ;;  %v1401_v28 = vsel %vm232_vm1, %v205_v21, 0  ;;  %v17311_v21 = vand.u32 4294901760, %v15074_v5  ;;  %v15149_v31 = vsub.f32 %v1398_v54, %v15118_v57 }
  0xda   : > { %12143 = vmatprep.mubr.f32.mxu1 %v17292_v24  ;;  %v15128_v45 = vand.u32 4294901760, %v1401_v28  ;;  %v15143_v24 = vand.u32 4294901760, %v15113_v47  ;;  %17316 = vst [vmem:[#allocation58_spill] sm:$0xff] %v15146_v61  ;;  %v1517_v54 = vand.u32 4294901760, %v1516_v13  ;;  %v1556_v13 = vsub.f32 %v15116_v56, %v15146_v61 }
  0xdb   : > { %v1506_v7 = vsub.f32 %v15074_v5, %v17311_v21  ;;  %v17314_v21 = vand.u32 4294901760, %v17297_v52  ;;  %v17318_v52 = vand.u32 4294901760, %v15098_v39  ;;  %v15161_v5 = vand.u32 4294901760, %v1404_v43 }
  0xdc   : > { %12849 = vmatmul.mubr.f32.gmra.mrb[14].mxu0 %v14946_v19  ;;  %17315 = vst [vmem:[#allocation57_spill] sm:$0xff] %v15143_v24  ;;  %v15159_v4 = vsub.f32 %v1401_v28, %v15128_v45  ;;  %v17319_v28 = vand.u32 4294901760, %v17301_v9 }
  0xdd   : > { %12144 = vmatmul.mubr.f32.gmra.mrb[12].mxu1 %v17294_v16  ;;  %12853 = vmatprep.mubr.f32.mxu0 %v17310_v44  ;;  %v15135_v16 = vand.u32 4294901760, %v15107_v3  ;;  %v1407_v44 = vsel %vm232_vm1, %v207_v35, 0  ;;  %v1507_v35 = vand.u32 4294901760, %v1506_v7  ;;  %v1410_v7 = vsel %vm232_vm1, %v208_v17, 0 }
  0xde   : > { %12146 = vmatprep.mubr.f32.mxu1 %v17296_v46  ;;  %v209_v46 = vld [vmem:[%s14410_s28 + $0x90] sm:$0xff]  ;;  %v15166_v51 = vand.u32 4294901760, %v1407_v44  ;;  %v17321_v17 = vand.u32 4294901760, %v17302_v38  ;;  %v15188_v9 = vsub.f32 %v1404_v43, %v15161_v5  ;;  %v17323_v43 = vand.u32 4294901760, %v17303_v22 }
  0xdf   : > { %17313 = vst [vmem:[#allocation56_spill] sm:$0xff] %v15135_v16 }
  0xe0   : > { %12854 = vmatmul.mubr.f32.vlgmr.msra.gmra.mrb[0].mxu0 %v17314_v21  ;;  %v1526_v21 = vsub.f32 %v15098_v39, %v17318_v52  ;;  %v210_v52 = vld [vmem:[%s14410_s28 + $0x98] sm:$0xff] }
  0xe1   : > { %12147 = vmatmul.mubr.f32.gmra.mrb[14].mxu1 %v17298_v59  ;;  %12856 = vmatprep.mubr.f32.mxu0 %v17317_v1  ;;  %v1536_v59 = vsub.f32 %v15107_v3, %v15135_v16  ;;  %v1413_v1 = vsel %vm232_vm1, %v209_v46, 0  ;;  %v211_v16 = vld [vmem:[%s14410_s28 + $0xa8] sm:$0xff]  ;;  %v15185_v3 = vand.u32 4294901760, %v15159_v4  ;;  %v1416_v38 = vsel %vm232_vm1, %v210_v52, 0 }
  0xe2   : > { %12151 = vmatprep.mubr.f32.mxu1 %v1497_v50  ;;  %12878 = vmatpush3.msra.mxu0 %v17300_v60  ;;  %v1546_v50 = vsub.f32 %v15113_v47, %v15143_v24  ;;  %v15179_v60 = vand.u32 4294901760, %v15149_v31  ;;  %v1527_v46 = vand.u32 4294901760, %v1526_v21  ;;  %v15196_v24 = vsub.f32 %v1407_v44, %v15166_v51 }
  0xe3   : > { %12903 = vmatprep.subr.mxu0 %v14691_v49  ;;  %17322 = vst [vmem:[#allocation65_spill] sm:$0xff] %v15185_v3  ;;  %v15193_v61 = vand.u32 4294901760, %v1536_v59  ;;  %v1419_v21 = vsel %vm232_vm1, %v211_v16, 0  ;;  %v17325_v44 = vand.u32 4294901760, %v17304_v36  ;;  %v1576_v16 = vsub.f32 %v15159_v4, %v15185_v3 }
  0xe4   : > { %12857 = vmatmul.mubr.f32.gmra.mrb[2].mxu0 %v17319_v28  ;;  %17320 = vst [vmem:[#allocation64_spill] sm:$0xff] %v15179_v60  ;;  %v15190_v28 = vand.u32 4294901760, %v1410_v7  ;;  %v15206_v56 = vand.u32 4294901760, %v1546_v50  ;;  %v1566_v59 = vsub.f32 %v15149_v31, %v15179_v60  ;;  %v15222_v52 = vand.u32 4294901760, %v1416_v38 }
  0xe5   : > { %12152 = vmatmul.mubr.f32.vlgmr.msra.gmra.mrb[0].mxu1 %v1507_v35  ;;  %12859 = vmatprep.mubr.f32.mxu0 %v17321_v17  ;;  %v15198_v35 = vand.u32 4294901760, %v1413_v1  ;;  %v212_v17 = vld [vmem:[%s14410_s28 + $0xb0] sm:$0xff]  ;;  %v15226_v50 = vand.u32 4294901760, %v15196_v24  ;;  %v15231_v36 = vand.u32 4294901760, %v1419_v21 }
  0xe6   : > { %12176 = vmatpush3.msra.mxu1 %v15028_v41  ;;  %12154 = vmatprep.mubr.f32.mxu1 %v1517_v54  ;;  %v15208_v41 = vand.u32 4294901760, %v1556_v13  ;;  %v15217_v54 = vand.u32 4294901760, %v15188_v9  ;;  %v15220_v22 = vsub.f32 %v1410_v7, %v15190_v28  ;;  %v17329_v7 = vand.u32 4294901760, %v14858_v15 }
  0xe7   : > { %12201 = vmatprep.subr.mxu1 %v15008_v14  ;;  %17327 = vst [vmem:[#allocation68_spill] sm:$0xff] %v15226_v50  ;;  %v15229_v13 = vsub.f32 %v1413_v1, %v15198_v35  ;;  %v15247_v60 = vsub.f32 %v1416_v38, %v15222_v52  ;;  %v17332_v38 = vand.u32 4294901760, %v14888_v25 }
  0xe8   : > { %12860 = vmatmul.mubr.f32.gmra.mrb[4].mxu0 %v17323_v43  ;;  %17324 = vst [vmem:[#allocation66_spill] sm:$0xff] %v15208_v41  ;;  %17326 = vst [vmem:[#allocation67_spill] sm:$0xff] %v15217_v54  ;;  %v17328_v43 = vand.u32 4294901760, %v14850_v53  ;;  %v1586_v3 = vsub.f32 %v15188_v9, %v15217_v54  ;;  %v15244_v1 = vand.u32 4294901760, %v15220_v22  ;;  %v15252_v53 = vand.u32 4294901760, %v1576_v16 }
  0xe9   : > { %12155 = vmatmul.mubr.f32.gmra.mrb[2].mxu1 %v1527_v46  ;;  %12862 = vmatprep.mubr.f32.mxu0 %v17325_v44  ;;  %v1422_v46 = vsel %vm232_vm1, %v212_v17, 0  ;;  %v15236_v44 = vand.u32 4294901760, %v1566_v59  ;;  %v1596_v59 = vsub.f32 %v15196_v24, %v15226_v50  ;;  %v15257_v15 = vand.u32 4294901760, %v15229_v13 }
  0xea   : > { %12157 = vmatprep.mubr.f32.mxu1 %v15193_v61  ;;  %v15249_v17 = vand.u32 4294901760, %v1422_v46  ;;  %v15267_v54 = vand.u32 4294901760, %v1586_v3  ;;  %v1606_v16 = vsub.f32 %v15220_v22, %v15244_v1  ;;  %v15272_v50 = vand.u32 4294901760, %v15247_v60 }
  0xeb   : > { %17330 = vst [vmem:[#allocation69_spill] sm:$0xff] %v15257_v15  ;;  %v17334_v3 = vand.u32 4294901760, %v14907_v37 }
  0xec   : > { %12863 = vmatmul.mubr.f32.gmra.mrb[6].mxu0 %v17328_v43  ;;  %v15260_v43 = vsub.f32 %v1419_v21, %v15231_v36  ;;  %v1616_v21 = vsub.f32 %v15229_v13, %v15257_v15 }
  0xed   : > { %12158 = vmatmul.mubr.f32.gmra.mrb[4].mxu1 %v15206_v56  ;;  %12865 = vmatprep.mubr.f32.mxu0 %v17329_v7  ;;  %v17331_v7 = vand.u32 4294901760, %v14882_v29  ;;  %v15278_v29 = vand.u32 4294901760, %v1596_v59  ;;  %v1626_v59 = vsub.f32 %v15247_v60, %v15272_v50 }
  0xee   : > { %12160 = vmatprep.mubr.f32.mxu1 %v15208_v41  ;;  %v15275_v41 = vsub.f32 %v1422_v46, %v15249_v17  ;;  %v15283_v25 = vand.u32 4294901760, %v15260_v43  ;;  %v15290_v46 = vand.u32 4294901760, %v1606_v16  ;;  %v15298_v15 = vand.u32 4294901760, %v1616_v21  ;;  %v11037_v21 = vld [vmem:[%s16943_s1 + $0x18] sm:$0xf] }
  0xef   : > { %v15307_v16 = vand.u32 4294901760, %v1626_v59 }
  0xf0   : > { %12866 = vmatmul.mubr.f32.gmra.mrb[8].mxu0 %v17331_v7  ;;  %17333 = vst [vmem:[#allocation70_spill] sm:$0xff] %v15283_v25  ;;  %v17335_v7 = vand.u32 4294901760, %v14915_v62  ;;  %v1636_v37 = vsub.f32 %v15260_v43, %v15283_v25  ;;  %v17337_v62 = vand.u32 4294901760, %v14938_v55 }
  0xf1   : > { %12161 = vmatmul.mubr.f32.gmra.mrb[6].mxu1 %v15236_v44  ;;  %12868 = vmatprep.mubr.f32.mxu0 %v17332_v38  ;;  %v15295_v38 = vand.u32 4294901760, %v15275_v41 }
  0xf2   : > { %12163 = vmatprep.mubr.f32.mxu1 %v15252_v53  ;;  %v15315_v25 = vand.u32 4294901760, %v1636_v37  ;;  %v17341_v37 = vld [vmem:[#allocation60_spill] sm:$0xff] }
  0xf4   : > { %12869 = vmatmul.mubr.f32.gmra.mrb[10].mxu0 %v17334_v3  ;;  %v17336_v3 = vand.u32 4294901760, %v14928_v18  ;;  %v17338_v18 = vand.u32 4294901760, %v14946_v19  ;;  %v17339_v19 = vld [vmem:[#allocation59_spill] sm:$0xff] }
  0xf5   : > { %12164 = vmatmul.mubr.f32.gmra.mrb[8].mxu1 %v15267_v54  ;;  %12871 = vmatprep.mubr.f32.mxu0 %v17335_v7  ;;  %v1646_v7 = vsub.f32 %v15275_v41, %v15295_v38 }
  0xf6   : > { %12166 = vmatprep.mubr.f32.mxu1 %v15278_v29 }
  0xf7   : > { %v15322_v55 = vand.u32 4294901760, %v1646_v7 }
  0xf8   : > { %12872 = vmatmul.mubr.f32.gmra.mrb[12].mxu0 %v17336_v3  ;;  %v7295_v3 = vsel %vm281_vm0, %v11037_v21, 0  ;;  %v17343_v21 = vld [vmem:[#allocation62_spill] sm:$0xff] }
  0xf9   : > { %12167 = vmatmul.mubr.f32.gmra.mrb[10].mxu1 %v15290_v46  ;;  %12874 = vmatprep.mubr.f32.mxu0 %v17337_v62  ;;  %v15325_v59 = vand.u32 4294901760, %v7295_v3  ;;  %v17342_v62 = vld [vmem:[#allocation61_spill] sm:$0xff] }
  0xfa   : > { %12169 = vmatprep.mubr.f32.mxu1 %v15298_v15 }
  0xfc   : > { %12875 = vmatmul.mubr.f32.gmra.mrb[14].mxu0 %v17338_v18 }
  0xfd   : > { %12170 = vmatmul.mubr.f32.gmra.mrb[12].mxu1 %v15307_v16  ;;  %12879 = vmatprep.mubr.f32.mxu0 %v14758_v58 }
  0xfe   : > { %12172 = vmatprep.mubr.f32.mxu1 %v15315_v25 }
 0x100   : > { %12880 = vmatmul.mubr.f32.vlgmr.msra.gmra.mrb[0].mxu0 %v14766_v63 }
 0x101   : > { %12173 = vmatmul.mubr.f32.gmra.mrb[14].mxu1 %v15322_v55  ;;  %12882 = vmatprep.mubr.f32.mxu0 %v14773_v6 }
 0x102   : > { %12177 = vmatprep.mubr.f32.mxu1 %v15049_v48  ;;  %12904 = vmatpush3.msra.mxu0 %v14691_v49  ;;  %v15352_v49 = vsub.f32 %v7295_v3, %v15325_v59  ;;  %v17344_v3 = vld [vmem:[#allocation52_spill] sm:$0xff] }
 0x103   : > { %12929 = vmatprep.subr.mxu0 %v15325_v59 }
 0x104   : > { %12883 = vmatmul.mubr.f32.gmra.mrb[2].mxu0 %v14784_v8 }
 0x105   : > { %12178 = vmatmul.mubr.f32.vlgmr.msra.gmra.mrb[0].mxu1 %v15058_v30  ;;  %12885 = vmatprep.mubr.f32.mxu0 %v14794_v23 }
 0x106   : > { %12202 = vmatpush3.msra.mxu1 %v15008_v14  ;;  %12180 = vmatprep.mubr.f32.mxu1 %v15064_v32  ;;  %v15359_v14 = vand.u32 4294901760, %v15352_v49 }
 0x107   : > { %12227 = vmatprep.subr.mxu1 %v14982_v10 }
 0x108   : > { %12886 = vmatmul.mubr.f32.gmra.mrb[4].mxu0 %v14799_v11  ;;  %17340 = vst [vmem:[#allocation59_spill] sm:$0xff] %v15359_v14  ;;  %v7527_v7 = vsub.f32 %v15352_v49, %v15359_v14  ;;  %v17345_v14 = vld [vmem:[#allocation53_spill] sm:$0xff] }
 0x109   : > { %12181 = vmatmul.mubr.f32.gmra.mrb[2].mxu1 %v15076_v33  ;;  %12888 = vmatprep.mubr.f32.mxu0 %v14801_v34 }
 0x10a   : > { %12183 = vmatprep.mubr.f32.mxu1 %v15085_v27  ;;  %v7528_v18 = vand.u32 4294901760, %v7527_v7 }
 0x10c   : > { %12889 = vmatmul.mubr.f32.gmra.mrb[6].mxu0 %v14827_v12 }
 0x10d   : > { %12184 = vmatmul.mubr.f32.gmra.mrb[4].mxu1 %v15090_v42  ;;  %12891 = vmatprep.mubr.f32.mxu0 %v14835_v26 }
 0x10e   : > { %12186 = vmatprep.mubr.f32.mxu1 %v15092_v20 }
 0x110   : > { %12892 = vmatmul.mubr.f32.gmra.mrb[8].mxu0 %v14860_v0 }
 0x111   : > { %12187 = vmatmul.mubr.f32.gmra.mrb[6].mxu1 %v15118_v57  ;;  %12894 = vmatprep.mubr.f32.mxu0 %v14866_v2 }
 0x112   : > { %12189 = vmatprep.mubr.f32.mxu1 %v15128_v45 }
 0x114   : > { %12895 = vmatmul.mubr.f32.gmra.mrb[10].mxu0 %v14884_v40 }
 0x115   : > { %12190 = vmatmul.mubr.f32.gmra.mrb[8].mxu1 %v15161_v5  ;;  %12897 = vmatprep.mubr.f32.mxu0 %v17339_v19 }
 0x116   : > { %12192 = vmatprep.mubr.f32.mxu1 %v15166_v51 }
 0x118   : > { %12898 = vmatmul.mubr.f32.gmra.mrb[12].mxu0 %v17341_v37 }
 0x119   : > { %12193 = vmatmul.mubr.f32.gmra.mrb[10].mxu1 %v15190_v28  ;;  %12900 = vmatprep.mubr.f32.mxu0 %v17342_v62 }
 0x11a   : > { %12195 = vmatprep.mubr.f32.mxu1 %v15198_v35 }
 0x11c   : > { %12901 = vmatmul.mubr.f32.gmra.mrb[14].mxu0 %v17343_v21 }
 0x11d   : > { %12196 = vmatmul.mubr.f32.gmra.mrb[12].mxu1 %v15222_v52  ;;  %12905 = vmatprep.mubr.f32.mxu0 %v14758_v58  ;;  %v17346_v58 = vld [vmem:[#allocation54_spill] sm:$0xff] }
 0x11e   : > { %12198 = vmatprep.mubr.f32.mxu1 %v15231_v36 }
 0x120   : > { %12906 = vmatmul.mubr.f32.vlgmr.msra.gmra.mrb[0].mxu0 %v14766_v63  ;;  %v17347_v63 = vld [vmem:[#allocation63_spill] sm:$0xff] }
 0x121   : > { %12199 = vmatmul.mubr.f32.gmra.mrb[14].mxu1 %v15249_v17  ;;  %12908 = vmatprep.mubr.f32.mxu0 %v14773_v6  ;;  %v17348_v6 = vld [vmem:[#allocation51_spill] sm:$0xff] }
 0x122   : > { %12203 = vmatprep.mubr.f32.mxu1 %v17344_v3  ;;  %12930 = vmatpush3.msra.mxu0 %v15325_v59 }
 0x123   : > { %12955 = vmatprep.subr.mxu0 %v7528_v18 }
 0x124   : > { %12909 = vmatmul.mubr.f32.gmra.mrb[2].mxu0 %v14784_v8  ;;  %v17349_v8 = vld [vmem:[#allocation55_spill] sm:$0xff] }
 0x125   : > { %12204 = vmatmul.mubr.f32.vlgmr.msra.gmra.mrb[0].mxu1 %v17345_v14  ;;  %12911 = vmatprep.mubr.f32.mxu0 %v14794_v23 }
 0x126   : > { %12228 = vmatpush3.msra.mxu1 %v14982_v10  ;;  %12206 = vmatprep.mubr.f32.mxu1 %v17346_v58 }
 0x127   : > { %12253 = vmatprep.subr.mxu1 %v17347_v63 }
 0x128   : > { %12912 = vmatmul.mubr.f32.gmra.mrb[4].mxu0 %v14799_v11  ;;  %v11033_v11 = vld [vmem:[%s14410_s28 + $0xc0] sm:$0xff] }
 0x129   : > { %12207 = vmatmul.mubr.f32.gmra.mrb[2].mxu1 %v15098_v39  ;;  %12914 = vmatprep.mubr.f32.mxu0 %v14801_v34 }
 0x12a   : > { %12209 = vmatprep.mubr.f32.mxu1 %v17348_v6 }
 0x12c   : > { %12915 = vmatmul.mubr.f32.gmra.mrb[6].mxu0 %v14827_v12  ;;  %v11035_v12 = vld [vmem:[%s14410_s28 + $0xd8] sm:$0xff] }
 0x12d   : > { %12210 = vmatmul.mubr.f32.gmra.mrb[4].mxu1 %v15113_v47  ;;  %12917 = vmatprep.mubr.f32.mxu0 %v14835_v26  ;;  %v7283_v26 = vsel %vm232_vm1, %v11033_v11, 0 }
 0x12e   : > { %12212 = vmatprep.mubr.f32.mxu1 %v17349_v8  ;;  %v15413_v23 = vand.u32 4294901760, %v7283_v26 }
 0x130   : > { %12918 = vmatmul.mubr.f32.gmra.mrb[8].mxu0 %v14860_v0  ;;  %v11034_v0 = vld [vmem:[%s14410_s28 + $0xc8] sm:$0xff] }
 0x131   : > { %12213 = vmatmul.mubr.f32.gmra.mrb[6].mxu1 %v15149_v31  ;;  %12920 = vmatprep.mubr.f32.mxu0 %v14866_v2  ;;  %v17350_v2 = vld [vmem:[#allocation66_spill] sm:$0xff]  ;;  %v7286_v34 = vsel %vm232_vm1, %v11034_v0, 0 }
 0x132   : > { %12215 = vmatprep.mubr.f32.mxu1 %v15159_v4  ;;  %v17359_v0 = vld [vmem:[#allocation58_spill] sm:$0xff] }
 0x134   : > { %12921 = vmatmul.mubr.f32.gmra.mrb[10].mxu0 %v14884_v40  ;;  %v17351_v40 = vand.u32 4294901760, %v17344_v3 }
 0x135   : > { %12216 = vmatmul.mubr.f32.gmra.mrb[8].mxu1 %v15188_v9  ;;  %12923 = vmatprep.mubr.f32.mxu0 %v17339_v19  ;;  %v11036_v19 = vld [vmem:[%s14410_s28 + $0xe0] sm:$0xff] }
 0x136   : > { %12218 = vmatprep.mubr.f32.mxu1 %v15196_v24 }
 0x138   : > { %12924 = vmatmul.mubr.f32.gmra.mrb[12].mxu0 %v17341_v37  ;;  %v17352_v37 = vand.u32 4294901760, %v17345_v14  ;;  %v17356_v14 = vand.u32 4294901760, %v15098_v39 }
 0x139   : > { %12219 = vmatmul.mubr.f32.gmra.mrb[10].mxu1 %v15220_v22  ;;  %12926 = vmatprep.mubr.f32.mxu0 %v17342_v62  ;;  %v15428_v62 = vsub.f32 %v7283_v26, %v15413_v23  ;;  %v17358_v26 = vld [vmem:[#allocation57_spill] sm:$0xff] }
 0x13a   : > { %12221 = vmatprep.mubr.f32.mxu1 %v15229_v13 }
 0x13b   : > { %v17087_v3 = vand.u32 4294901760, %v15428_v62 }
 0x13c   : > { %12927 = vmatmul.mubr.f32.gmra.mrb[14].mxu0 %v17343_v21  ;;  %v7292_v21 = vsel %vm232_vm1, %v11036_v19, 0  ;;  %v17362_v19 = vld [vmem:[#allocation67_spill] sm:$0xff] }
 0x13d   : > { %12222 = vmatmul.mubr.f32.gmra.mrb[12].mxu1 %v15247_v60  ;;  %12931 = vmatprep.mubr.f32.mxu0 %v15193_v61  ;;  %v7289_v61 = vsel %vm232_vm1, %v11035_v12, 0  ;;  %v7486_v39 = vsub.f32 %v15428_v62, %v17087_v3 }
 0x13e   : > { %12224 = vmatprep.mubr.f32.mxu1 %v15260_v43  ;;  %v15430_v7 = vand.u32 4294901760, %v7289_v61 }
 0x140   : > { %12932 = vmatmul.mubr.f32.vlgmr.msra.gmra.mrb[0].mxu0 %v15206_v56  ;;  %v15422_v56 = vand.u32 4294901760, %v7286_v34  ;;  %17353 = vst [vmem:[#allocation60_spill] sm:$0xff] %v15430_v7 }
 0x141   : > { %12225 = vmatmul.mubr.f32.gmra.mrb[14].mxu1 %v15275_v41  ;;  %12934 = vmatprep.mubr.f32.mxu0 %v17350_v2  ;;  %v17360_v2 = vld [vmem:[#allocation64_spill] sm:$0xff] }
 0x142   : > { %12229 = vmatprep.mubr.f32.mxu1 %v17351_v40  ;;  %12956 = vmatpush3.msra.mxu0 %v7528_v18  ;;  %v17354_v18 = vand.u32 4294901760, %v17346_v58  ;;  %v17357_v58 = vld [vmem:[#allocation56_spill] sm:$0xff]  ;;  %v17361_v40 = vld [vmem:[#allocation65_spill] sm:$0xff] }
 0x143   : > { %12981 = vmatprep.subr.mxu0 %v15352_v49 }
 0x144   : > { %12935 = vmatmul.mubr.f32.gmra.mrb[2].mxu0 %v15236_v44  ;;  %v15439_v44 = vsub.f32 %v7286_v34, %v15422_v56 }
 0x145   : > { %12230 = vmatmul.mubr.f32.vlgmr.msra.gmra.mrb[0].mxu1 %v17352_v37  ;;  %12937 = vmatprep.mubr.f32.mxu0 %v15252_v53  ;;  %v15441_v53 = vand.u32 4294901760, %v7292_v21 }
 0x146   : > { %12254 = vmatpush3.msra.mxu1 %v17347_v63  ;;  %12232 = vmatprep.mubr.f32.mxu1 %v17354_v18  ;;  %v15448_v63 = vsub.f32 %v7289_v61, %v15430_v7  ;;  %v17364_v18 = vld [vmem:[#allocation69_spill] sm:$0xff] }
 0x147   : > { %12279 = vmatprep.subr.mxu1 %v14982_v10  ;;  %17355 = vst [vmem:[#allocation61_spill] sm:$0xff] %v15441_v53  ;;  %v15454_v11 = vsub.f32 %v7292_v21, %v15441_v53  ;;  %v17363_v21 = vld [vmem:[#allocation68_spill] sm:$0xff] }
 0x148   : > { %12938 = vmatmul.mubr.f32.gmra.mrb[4].mxu0 %v15267_v54  ;;  %v17086_v54 = vand.u32 4294901760, %v15439_v44 }
 0x149   : > { %12233 = vmatmul.mubr.f32.gmra.mrb[2].mxu1 %v17356_v14  ;;  %12940 = vmatprep.mubr.f32.mxu0 %v15278_v29  ;;  %v17085_v29 = vand.u32 4294901760, %v15448_v63  ;;  %v17084_v12 = vand.u32 4294901760, %v15454_v11  ;;  %v17365_v14 = vld [vmem:[#allocation70_spill] sm:$0xff] }
 0x14a   : > { %12235 = vmatprep.mubr.f32.mxu1 %v17357_v58 }
 0x14b   : > { %v7506_v34 = vsub.f32 %v15448_v63, %v17085_v29  ;;  %v7516_v61 = vsub.f32 %v15454_v11, %v17084_v12 }
 0x14c   : > { %12941 = vmatmul.mubr.f32.gmra.mrb[6].mxu0 %v15290_v46  ;;  %v7496_v46 = vsub.f32 %v15439_v44, %v17086_v54  ;;  %v2527_v54 = vld [vmem:[%s14410_s28 + $0x6a] sm:$0xff] }
 0x14d   : > { %12236 = vmatmul.mubr.f32.gmra.mrb[4].mxu1 %v17358_v26  ;;  %12943 = vmatprep.mubr.f32.mxu0 %v15298_v15  ;;  %v7487_v15 = vand.u32 4294901760, %v7486_v39  ;;  %v7507_v37 = vand.u32 4294901760, %v7506_v34 }
 0x14e   : > { %12238 = vmatprep.mubr.f32.mxu1 %v17359_v0 }
 0x150   : > { %12944 = vmatmul.mubr.f32.gmra.mrb[8].mxu0 %v15307_v16  ;;  %v7497_v16 = vand.u32 4294901760, %v7496_v46 }
 0x151   : > { %12239 = vmatmul.mubr.f32.gmra.mrb[6].mxu1 %v17360_v2  ;;  %12946 = vmatprep.mubr.f32.mxu0 %v15315_v25  ;;  %v7517_v25 = vand.u32 4294901760, %v7516_v61  ;;  %v2523_v61 = vld [vmem:[%s14410_s28 + $0x3a] sm:$0xff] }
 0x152   : > { %12241 = vmatprep.mubr.f32.mxu1 %v17361_v40 }
 0x154   : > { %12947 = vmatmul.mubr.f32.gmra.mrb[10].mxu0 %v15322_v55  ;;  %v10965_v55 = vld [vmem:[%s16943_s1 + $0x8] sm:$0xf] }
 0x155   : > { %12242 = vmatmul.mubr.f32.gmra.mrb[8].mxu1 %v17362_v19  ;;  %12949 = vmatprep.mubr.f32.mxu0 %v7487_v15  ;;  %v2585_v39 = vsel %vm281_vm0, %v10965_v55, 0  ;;  %v2552_v55 = vsel %vm232_vm1, %v2523_v61, 0 }
 0x156   : > { %12244 = vmatprep.mubr.f32.mxu1 %v17363_v21  ;;  %v15494_v46 = vand.u32 4294901760, %v2585_v39 }
 0x158   : > { %12950 = vmatmul.mubr.f32.gmra.mrb[12].mxu0 %v7497_v16 }
 0x159   : > { %12245 = vmatmul.mubr.f32.gmra.mrb[10].mxu1 %v15244_v1  ;;  %12952 = vmatprep.mubr.f32.mxu0 %v7507_v37 }
 0x15a   : > { %12247 = vmatprep.mubr.f32.mxu1 %v17364_v18 }
 0x15c   : > { %12953 = vmatmul.mubr.f32.gmra.mrb[14].mxu0 %v7517_v25 }
 0x15d   : > { %12248 = vmatmul.mubr.f32.gmra.mrb[12].mxu1 %v15272_v50  ;;  %12957 = vmatprep.mubr.f32.mxu0 %v15085_v27 }
 0x15e   : > { %12250 = vmatprep.mubr.f32.mxu1 %v17365_v14 }
 0x160   : > { %12958 = vmatmul.mubr.f32.vlgmr.msra.gmra.mrb[0].mxu0 %v15090_v42 }
 0x161   : > { %12251 = vmatmul.mubr.f32.gmra.mrb[14].mxu1 %v15295_v38  ;;  %12960 = vmatprep.mubr.f32.mxu0 %v15092_v20 }
 0x162   : > { %12255 = vmatprep.mubr.f32.mxu1 %v15049_v48  ;;  %12982 = vmatpush3.msra.mxu0 %v15352_v49 }
 0x163   : > { %13007 = vmatprep.subr.mxu0 %v15325_v59 }
 0x164   : > { %12961 = vmatmul.mubr.f32.gmra.mrb[2].mxu0 %v15118_v57 }
 0x165   : > { %12256 = vmatmul.mubr.f32.vlgmr.msra.gmra.mrb[0].mxu1 %v15058_v30  ;;  %12963 = vmatprep.mubr.f32.mxu0 %v15128_v45 }
 0x166   : > { %12280 = vmatpush3.msra.mxu1 %v14982_v10  ;;  %12258 = vmatprep.mubr.f32.mxu1 %v15064_v32  ;;  %v15520_v10 = vsub.f32 %v2585_v39, %v15494_v46 }
 0x167   : > { %12305 = vmatprep.subr.mxu1 %v15494_v46 }
 0x168   : > { %12964 = vmatmul.mubr.f32.gmra.mrb[4].mxu0 %v15161_v5  ;;  %v15527_v49 = vand.u32 4294901760, %v15520_v10 }
 0x169   : > { %12259 = vmatmul.mubr.f32.gmra.mrb[2].mxu1 %v15076_v33  ;;  %12966 = vmatprep.mubr.f32.mxu0 %v15166_v51 }
 0x16a   : > { %12261 = vmatprep.mubr.f32.mxu1 %v15085_v27  ;;  %17366 = vst [vmem:[#allocation62_spill] sm:$0xff] %v15527_v49  ;;  %v2817_v15 = vsub.f32 %v15520_v10, %v15527_v49 }
 0x16c   : > { %12967 = vmatmul.mubr.f32.gmra.mrb[6].mxu0 %v15190_v28  ;;  %v15540_v34 = vand.u32 4294901760, %v2817_v15 }
 0x16d   : > { %12262 = vmatmul.mubr.f32.gmra.mrb[4].mxu1 %v15090_v42  ;;  %12969 = vmatprep.mubr.f32.mxu0 %v15198_v35 }
 0x16e   : > { %12264 = vmatprep.mubr.f32.mxu1 %v15092_v20 }
 0x170   : > { %12970 = vmatmul.mubr.f32.gmra.mrb[8].mxu0 %v15222_v52 }
 0x171   : > { %12265 = vmatmul.mubr.f32.gmra.mrb[6].mxu1 %v15118_v57  ;;  %12972 = vmatprep.mubr.f32.mxu0 %v15231_v36 }
 0x172   : > { %12267 = vmatprep.mubr.f32.mxu1 %v15128_v45 }
 0x174   : > { %12973 = vmatmul.mubr.f32.gmra.mrb[10].mxu0 %v15249_v17 }
 0x175   : > { %12268 = vmatmul.mubr.f32.gmra.mrb[8].mxu1 %v15161_v5  ;;  %12975 = vmatprep.mubr.f32.mxu0 %v15413_v23 }
 0x176   : > { %12270 = vmatprep.mubr.f32.mxu1 %v15166_v51 }
 0x178   : > { %12976 = vmatmul.mubr.f32.gmra.mrb[12].mxu0 %v15422_v56 }
 0x179   : > { %12271 = vmatmul.mubr.f32.gmra.mrb[10].mxu1 %v15190_v28  ;;  %12978 = vmatprep.mubr.f32.mxu0 %v15430_v7  ;;  %v2529_v7 = vld [vmem:[%s14410_s28 + $0x82] sm:$0xff] }
 0x17a   : > { %12273 = vmatprep.mubr.f32.mxu1 %v15198_v35 }
 0x17c   : > { %12979 = vmatmul.mubr.f32.gmra.mrb[14].mxu0 %v15441_v53  ;;  %v2564_v53 = vsel %vm232_vm1, %v2527_v54, 0 }
 0x17d   : > { %12274 = vmatmul.mubr.f32.gmra.mrb[12].mxu1 %v15222_v52  ;;  %12983 = vmatprep.mubr.f32.mxu0 %v17348_v6  ;;  %v17367_v6 = vld [vmem:[#allocation59_spill] sm:$0xff] }
 0x17e   : > { %12276 = vmatprep.mubr.f32.mxu1 %v15231_v36 }
 0x180   : > { %12984 = vmatmul.mubr.f32.vlgmr.msra.gmra.mrb[0].mxu0 %v15113_v47  ;;  %v2520_v47 = vld [vmem:[%s14410_s28 + $0x1a] sm:$0xff] }
 0x181   : > { %12277 = vmatmul.mubr.f32.gmra.mrb[14].mxu1 %v15249_v17  ;;  %12986 = vmatprep.mubr.f32.mxu0 %v17349_v8 }
 0x182   : > { %12281 = vmatprep.mubr.f32.mxu1 %v15049_v48  ;;  %13008 = vmatpush3.msra.mxu0 %v15325_v59  ;;  %v2518_v48 = vld [vmem:[%s14410_s28 + $0x2] sm:$0xff] }
 0x183   : > { %13033 = vmatprep.subr.mxu0 %v17367_v6 }
 0x184   : > { %12987 = vmatmul.mubr.f32.gmra.mrb[2].mxu0 %v15149_v31  ;;  %v2521_v31 = vld [vmem:[%s14410_s28 + $0x22] sm:$0xff] }
 0x185   : > { %12282 = vmatmul.mubr.f32.vlgmr.msra.gmra.mrb[0].mxu1 %v15058_v30  ;;  %12989 = vmatprep.mubr.f32.mxu0 %v15159_v4  ;;  %v2537_v30 = vsel %vm232_vm1, %v2518_v48, 0  ;;  %v2519_v4 = vld [vmem:[%s14410_s28 + $0xa] sm:$0xff]  ;;  %v2546_v16 = vsel %vm232_vm1, %v2521_v31, 0 }
 0x186   : > { %12306 = vmatpush3.msra.mxu1 %v15494_v46  ;;  %12284 = vmatprep.mubr.f32.mxu1 %v15064_v32  ;;  %v15561_v32 = vand.u32 4294901760, %v2537_v30  ;;  %v15588_v25 = vand.u32 4294901760, %v2546_v16 }
 0x187   : > { %12331 = vmatprep.subr.mxu1 %v15540_v34 }
 0x188   : > { %12990 = vmatmul.mubr.f32.gmra.mrb[4].mxu0 %v15188_v9  ;;  %v2522_v9 = vld [vmem:[%s14410_s28 + $0x32] sm:$0xff] }
 0x189   : > { %12285 = vmatmul.mubr.f32.gmra.mrb[2].mxu1 %v15076_v33  ;;  %12992 = vmatprep.mubr.f32.mxu0 %v15196_v24  ;;  %v2540_v24 = vsel %vm232_vm1, %v2519_v4, 0  ;;  %v2543_v33 = vsel %vm232_vm1, %v2520_v47, 0  ;;  %v2549_v37 = vsel %vm232_vm1, %v2522_v9, 0  ;;  %v2526_v4 = vld [vmem:[%s14410_s28 + $0x62] sm:$0xff]  ;;  %v15602_v47 = vand.u32 4294901760, %v2552_v55 }
 0x18a   : > { %12287 = vmatprep.mubr.f32.mxu1 %v15085_v27  ;;  %v15576_v8 = vand.u32 4294901760, %v2543_v33  ;;  %v2561_v29 = vsel %vm232_vm1, %v2526_v4, 0 }
 0x18c   : > { %12993 = vmatmul.mubr.f32.gmra.mrb[6].mxu0 %v15220_v22  ;;  %v15570_v22 = vand.u32 4294901760, %v2540_v24  ;;  %v15595_v48 = vsub.f32 %v2543_v33, %v15576_v8  ;;  %v15610_v33 = vsub.f32 %v2546_v16, %v15588_v25  ;;  %v15625_v16 = vsub.f32 %v2552_v55, %v15602_v47 }
 0x18d   : > { %12288 = vmatmul.mubr.f32.gmra.mrb[4].mxu1 %v15090_v42  ;;  %12995 = vmatprep.mubr.f32.mxu0 %v15229_v13  ;;  %v15574_v13 = vsub.f32 %v2537_v30, %v15561_v32  ;;  %v2525_v30 = vld [vmem:[%s14410_s28 + $0x52] sm:$0xff] }
 0x18e   : > { %12290 = vmatprep.mubr.f32.mxu1 %v15092_v20  ;;  %17370 = vst [vmem:[#allocation54_spill] sm:$0xff] %v15595_v48  ;;  %17371 = vst [vmem:[#allocation63_spill] sm:$0xff] %v15610_v33  ;;  %v2558_v9 = vsel %vm232_vm1, %v2525_v30, 0  ;;  %v17375_v54 = vand.u32 4294901760, %v15610_v33 }
 0x18f   : > { %17368 = vst [vmem:[#allocation52_spill] sm:$0xff] %v15574_v13  ;;  %v17088_v15 = vand.u32 4294901760, %v15574_v13  ;;  %v15630_v3 = vand.u32 4294901760, %v2558_v9 }
 0x190   : > { %12996 = vmatmul.mubr.f32.gmra.mrb[8].mxu0 %v15247_v60  ;;  %v2524_v60 = vld [vmem:[%s14410_s28 + $0x4a] sm:$0xff] }
 0x191   : > { %12291 = vmatmul.mubr.f32.gmra.mrb[6].mxu1 %v15118_v57  ;;  %12998 = vmatprep.mubr.f32.mxu0 %v15260_v43  ;;  %v15586_v43 = vsub.f32 %v2540_v24, %v15570_v22  ;;  %v2555_v39 = vsel %vm232_vm1, %v2524_v60, 0  ;;  %v2656_v61 = vsub.f32 %v15574_v13, %v17088_v15  ;;  %v2528_v15 = vld [vmem:[%s14410_s28 + $0x7a] sm:$0xff]  ;;  %v15639_v60 = vand.u32 4294901760, %v2561_v29 }
 0x192   : > { %12293 = vmatprep.mubr.f32.mxu1 %v15128_v45  ;;  %v15604_v24 = vand.u32 4294901760, %v2555_v39 }
 0x193   : > { %17369 = vst [vmem:[#allocation53_spill] sm:$0xff] %v15586_v43  ;;  %v17097_v31 = vand.u32 4294901760, %v15586_v43  ;;  %v2657_v55 = vand.u32 4294901760, %v2656_v61  ;;  %v15653_v61 = vsub.f32 %v2558_v9, %v15630_v3 }
 0x194   : > { %12999 = vmatmul.mubr.f32.gmra.mrb[10].mxu0 %v15275_v41  ;;  %v15597_v41 = vand.u32 4294901760, %v2549_v37  ;;  %v15628_v30 = vsub.f32 %v2555_v39, %v15604_v24  ;;  %v17374_v39 = vand.u32 4294901760, %v15595_v48 }
 0x195   : > { %12294 = vmatmul.mubr.f32.gmra.mrb[8].mxu1 %v15161_v5  ;;  %13001 = vmatprep.mubr.f32.mxu0 %v15428_v62 }
 0x196   : > { %12296 = vmatprep.mubr.f32.mxu1 %v15166_v51  ;;  %v15619_v12 = vsub.f32 %v2549_v37, %v15597_v41  ;;  %17373 = vst [vmem:[#allocation55_spill] sm:$0xff] %v15628_v30  ;;  %v2666_v37 = vsub.f32 %v15586_v43, %v17097_v31  ;;  %v2676_v49 = vsub.f32 %v15595_v48, %v17374_v39  ;;  %v2530_v43 = vld [vmem:[%s14410_s28 + $0x92] sm:$0xff]  ;;  %v15664_v31 = vand.u32 4294901760, %v2564_v53 }
 0x198   : > { %13002 = vmatmul.mubr.f32.gmra.mrb[12].mxu0 %v15439_v44  ;;  %17372 = vst [vmem:[#allocation51_spill] sm:$0xff] %v15619_v12  ;;  %v17102_v13 = vand.u32 4294901760, %v15619_v12  ;;  %v2667_v39 = vand.u32 4294901760, %v2666_v37  ;;  %17376 = vst [vmem:[#allocation66_spill] sm:$0xff] %v15664_v31  ;;  %v2677_v9 = vand.u32 4294901760, %v2676_v49  ;;  %v2570_v37 = vsel %vm232_vm1, %v2529_v7, 0 }
 0x199   : > { %12297 = vmatmul.mubr.f32.gmra.mrb[10].mxu1 %v15190_v28  ;;  %13004 = vmatprep.mubr.f32.mxu0 %v15448_v63  ;;  %v17379_v49 = vand.u32 4294901760, %v15628_v30  ;;  %v15690_v48 = vand.u32 4294901760, %v2570_v37 }
 0x19a   : > { %12299 = vmatprep.mubr.f32.mxu1 %v15198_v35  ;;  %v2696_v4 = vsub.f32 %v15619_v12, %v17102_v13  ;;  %v2532_v12 = vld [vmem:[%s14410_s28 + $0xaa] sm:$0xff] }
 0x19b   : > { %17380 = vst [vmem:[#allocation57_spill] sm:$0xff] %v15690_v48 }
 0x19c   : > { %13005 = vmatmul.mubr.f32.gmra.mrb[14].mxu0 %v15454_v11 }
 0x19d   : > { %12300 = vmatmul.mubr.f32.gmra.mrb[12].mxu1 %v15222_v52  ;;  %13009 = vmatprep.mubr.f32.mxu0 %v17357_v58  ;;  %v2567_v58 = vsel %vm232_vm1, %v2528_v15, 0  ;;  %v2686_v15 = vsub.f32 %v15610_v33, %v17375_v54  ;;  %v2573_v54 = vsel %vm232_vm1, %v2530_v43, 0  ;;  %v2531_v33 = vld [vmem:[%s14410_s28 + $0x9a] sm:$0xff] }
 0x19e   : > { %12302 = vmatprep.mubr.f32.mxu1 %v15231_v36  ;;  %v15696_v13 = vand.u32 4294901760, %v2573_v54 }
 0x19f   : > { %v2687_v7 = vand.u32 4294901760, %v2686_v15  ;;  %v2533_v15 = vld [vmem:[%s14410_s28 + $0xb2] sm:$0xff] }
 0x1a0   : > { %13010 = vmatmul.mubr.f32.vlgmr.msra.gmra.mrb[0].mxu0 %v17358_v26  ;;  %v15662_v26 = vsub.f32 %v2561_v29, %v15639_v60  ;;  %v17378_v29 = vand.u32 4294901760, %v15625_v16  ;;  %17381 = vst [vmem:[#allocation58_spill] sm:$0xff] %v15696_v13 }
 0x1a1   : > { %12303 = vmatmul.mubr.f32.gmra.mrb[14].mxu1 %v15249_v17  ;;  %13012 = vmatprep.mubr.f32.mxu0 %v17359_v0  ;;  %v15670_v0 = vand.u32 4294901760, %v2567_v58 }
 0x1a2   : > { %12307 = vmatprep.mubr.f32.mxu1 %v2657_v55  ;;  %13034 = vmatpush3.msra.mxu0 %v17367_v6  ;;  %v2706_v6 = vsub.f32 %v15625_v16, %v17378_v29  ;;  %v2716_v55 = vsub.f32 %v15628_v30, %v17379_v49  ;;  %v2697_v29 = vand.u32 4294901760, %v2696_v4 }
 0x1a3   : > { %17377 = vst [vmem:[#allocation56_spill] sm:$0xff] %v15670_v0  ;;  %13059 = vmatprep.subr.mxu0 %v15325_v59  ;;  %v15694_v49 = vsub.f32 %v2567_v58, %v15670_v0  ;;  %v17383_v58 = vand.u32 4294901760, %v15662_v26 }
 0x1a4   : > { %13013 = vmatmul.mubr.f32.gmra.mrb[2].mxu0 %v17360_v2  ;;  %v15688_v2 = vsub.f32 %v2564_v53, %v15664_v31  ;;  %v2707_v53 = vand.u32 4294901760, %v2706_v6  ;;  %v2717_v43 = vand.u32 4294901760, %v2716_v55  ;;  %v15718_v6 = vsub.f32 %v2573_v54, %v15696_v13 }
 0x1a5   : > { %12308 = vmatmul.mubr.f32.vlgmr.msra.gmra.mrb[0].mxu1 %v2667_v39  ;;  %13015 = vmatprep.mubr.f32.mxu0 %v17361_v40  ;;  %v2576_v39 = vsel %vm232_vm1, %v2531_v33, 0  ;;  %v2579_v40 = vsel %vm232_vm1, %v2532_v12, 0  ;;  %v2736_v33 = vsub.f32 %v15662_v26, %v17383_v58 }
 0x1a6   : > { %12332 = vmatpush3.msra.mxu1 %v15540_v34  ;;  %12310 = vmatprep.mubr.f32.mxu1 %v2677_v9  ;;  %v17382_v34 = vand.u32 4294901760, %v15653_v61  ;;  %v17115_v12 = vand.u32 4294901760, %v15688_v2  ;;  %v15712_v9 = vsub.f32 %v2570_v37, %v15690_v48  ;;  %v15714_v30 = vand.u32 4294901760, %v2576_v39 }
 0x1a7   : > { %12357 = vmatprep.subr.mxu1 %v15520_v10  ;;  %v15720_v55 = vand.u32 4294901760, %v2579_v40  ;;  %v2737_v58 = vand.u32 4294901760, %v2736_v33 }
 0x1a8   : > { %13016 = vmatmul.mubr.f32.gmra.mrb[4].mxu0 %v17362_v19  ;;  %v2726_v4 = vsub.f32 %v15653_v61, %v17382_v34  ;;  %17384 = vst [vmem:[#allocation64_spill] sm:$0xff] %v15714_v30  ;;  %v17114_v19 = vand.u32 4294901760, %v15694_v49  ;;  %v2746_v37 = vsub.f32 %v15688_v2, %v17115_v12  ;;  %v15730_v34 = vsub.f32 %v2576_v39, %v15714_v30 }
 0x1a9   : > { %12311 = vmatmul.mubr.f32.gmra.mrb[2].mxu1 %v2687_v7  ;;  %13018 = vmatprep.mubr.f32.mxu0 %v17363_v21  ;;  %17385 = vst [vmem:[#allocation65_spill] sm:$0xff] %v15720_v55  ;;  %v2582_v21 = vsel %vm232_vm1, %v2533_v15, 0  ;;  %v17109_v15 = vand.u32 4294901760, %v15718_v6 }
 0x1aa   : > { %12313 = vmatprep.mubr.f32.mxu1 %v2697_v29  ;;  %v2727_v7 = vand.u32 4294901760, %v2726_v4  ;;  %v17113_v29 = vand.u32 4294901760, %v15712_v9  ;;  %v15732_v54 = vand.u32 4294901760, %v2582_v21  ;;  %v2747_v39 = vand.u32 4294901760, %v2746_v37 }
 0x1ac   : > { %13019 = vmatmul.mubr.f32.gmra.mrb[6].mxu0 %v15244_v1  ;;  %17386 = vst [vmem:[#allocation67_spill] sm:$0xff] %v15732_v54  ;;  %v2756_v1 = vsub.f32 %v15694_v49, %v17114_v19  ;;  %v15748_v4 = vsub.f32 %v2582_v21, %v15732_v54 }
 0x1ad   : > { %12314 = vmatmul.mubr.f32.gmra.mrb[4].mxu1 %v2707_v53  ;;  %13021 = vmatprep.mubr.f32.mxu0 %v17364_v18  ;;  %v15739_v18 = vsub.f32 %v2579_v40, %v15720_v55  ;;  %v17112_v53 = vand.u32 4294901760, %v15730_v34  ;;  %v2776_v40 = vsub.f32 %v15718_v6, %v17109_v15  ;;  %v17388_v15 = vand.u32 4294901760, %v15439_v44 }
 0x1ae   : > { %12316 = vmatprep.mubr.f32.mxu1 %v2717_v43  ;;  %v2766_v43 = vsub.f32 %v15712_v9, %v17113_v29  ;;  %v2757_v33 = vand.u32 4294901760, %v2756_v1  ;;  %v17110_v37 = vand.u32 4294901760, %v15748_v4 }
 0x1af   : > { %v2786_v21 = vsub.f32 %v15730_v34, %v17112_v53 }
 0x1b0   : > { %13022 = vmatmul.mubr.f32.gmra.mrb[8].mxu0 %v15272_v50  ;;  %v17111_v50 = vand.u32 4294901760, %v15739_v18 }
 0x1b1   : > { %12317 = vmatmul.mubr.f32.gmra.mrb[6].mxu1 %v2727_v7  ;;  %13024 = vmatprep.mubr.f32.mxu0 %v17365_v14  ;;  %v17387_v14 = vand.u32 4294901760, %v15428_v62  ;;  %v2767_v7 = vand.u32 4294901760, %v2766_v43  ;;  %v2787_v62 = vand.u32 4294901760, %v2786_v21  ;;  %v11054_v43 = vld [vmem:[%s16943_s1 + $0x1c] sm:$0xf] }
 0x1b2   : > { %12319 = vmatprep.mubr.f32.mxu1 %v2737_v58  ;;  %v2777_v58 = vand.u32 4294901760, %v2776_v40  ;;  %v2796_v1 = vsub.f32 %v15739_v18, %v17111_v50  ;;  %v17390_v40 = vand.u32 4294901760, %v15454_v11  ;;  %v8471_v44 = vsel %vm281_vm0, %v11054_v43, 0  ;;  %v17398_v43 = vld [vmem:[#allocation63_spill] sm:$0xff] }
 0x1b4   : > { %13025 = vmatmul.mubr.f32.gmra.mrb[10].mxu0 %v15295_v38  ;;  %v17389_v38 = vand.u32 4294901760, %v15448_v63 }
 0x1b5   : > { %12320 = vmatmul.mubr.f32.gmra.mrb[8].mxu1 %v2747_v39  ;;  %13027 = vmatprep.mubr.f32.mxu0 %v17387_v14  ;;  %v2806_v39 = vsub.f32 %v15748_v4, %v17110_v37  ;;  %v17401_v37 = vld [vmem:[#allocation55_spill] sm:$0xff] }
 0x1b6   : > { %12322 = vmatprep.mubr.f32.mxu1 %v2757_v33  ;;  %v2797_v33 = vand.u32 4294901760, %v2796_v1  ;;  %v11038_v1 = vld [vmem:[%s14410_s28 + $0x31] sm:$0xff] }
 0x1b7   : > { %v2807_v63 = vand.u32 4294901760, %v2806_v39  ;;  %v11040_v39 = vld [vmem:[%s14410_s28 + $0x49] sm:$0xff] }
 0x1b8   : > { %13028 = vmatmul.mubr.f32.gmra.mrb[12].mxu0 %v17388_v15  ;;  %v15778_v15 = vand.u32 4294901760, %v8471_v44 }
 0x1b9   : > { %12323 = vmatmul.mubr.f32.gmra.mrb[10].mxu1 %v2767_v7  ;;  %13030 = vmatprep.mubr.f32.mxu0 %v17389_v38  ;;  %v17393_v7 = vld [vmem:[#allocation61_spill] sm:$0xff] }
 0x1ba   : > { %12325 = vmatprep.mubr.f32.mxu1 %v2777_v58  ;;  %v17394_v58 = vld [vmem:[#allocation52_spill] sm:$0xff]  ;;  %v11039_v38 = vld [vmem:[%s14410_s28 + $0x39] sm:$0xff] }
 0x1bc   : > { %13031 = vmatmul.mubr.f32.gmra.mrb[14].mxu0 %v17390_v40  ;;  %v8429_v40 = vsel %vm232_vm1, %v11040_v39, 0  ;;  %v11044_v39 = vld [vmem:[%s14410_s28 + $0x79] sm:$0xff] }
 0x1bd   : > { %12326 = vmatmul.mubr.f32.gmra.mrb[12].mxu1 %v2787_v62  ;;  %13035 = vmatprep.mubr.f32.mxu0 %v15085_v27  ;;  %v17397_v62 = vld [vmem:[#allocation62_spill] sm:$0xff]  ;;  %v8441_v53 = vsel %vm232_vm1, %v11044_v39, 0 }
 0x1be   : > { %12328 = vmatprep.mubr.f32.mxu1 %v2797_v33  ;;  %v17399_v33 = vld [vmem:[#allocation51_spill] sm:$0xff] }
 0x1c0   : > { %13036 = vmatmul.mubr.f32.vlgmr.msra.gmra.mrb[0].mxu0 %v15090_v42 }
 0x1c1   : > { %12329 = vmatmul.mubr.f32.gmra.mrb[14].mxu1 %v2807_v63  ;;  %13038 = vmatprep.mubr.f32.mxu0 %v15092_v20  ;;  %v11042_v63 = vld [vmem:[%s14410_s28 + $0x61] sm:$0xff] }
 0x1c2   : > { %12333 = vmatprep.mubr.f32.mxu1 %v15561_v32  ;;  %13060 = vmatpush3.msra.mxu0 %v15325_v59  ;;  %v15804_v59 = vsub.f32 %v8471_v44, %v15778_v15  ;;  %v11041_v44 = vld [vmem:[%s14410_s28 + $0x51] sm:$0xff] }
 0x1c3   : > { %13085 = vmatprep.subr.mxu0 %v15778_v15 }
 0x1c4   : > { %13039 = vmatmul.mubr.f32.gmra.mrb[2].mxu0 %v15118_v57  ;;  %v15811_v11 = vand.u32 4294901760, %v15804_v59 }
 0x1c5   : > { %12334 = vmatmul.mubr.f32.vlgmr.msra.gmra.mrb[0].mxu1 %v15570_v22  ;;  %13041 = vmatprep.mubr.f32.mxu0 %v15128_v45 }
 0x1c6   : > { %12358 = vmatpush3.msra.mxu1 %v15520_v10  ;;  %12336 = vmatprep.mubr.f32.mxu1 %v15576_v8  ;;  %17391 = vst [vmem:[#allocation68_spill] sm:$0xff] %v15811_v11  ;;  %v17392_v10 = vld [vmem:[#allocation60_spill] sm:$0xff]  ;;  %v8703_v14 = vsub.f32 %v15804_v59, %v15811_v11 }
 0x1c7   : > { %12383 = vmatprep.subr.mxu1 %v15494_v46  ;;  %v11049_v11 = vld [vmem:[%s14410_s28 + $0xb1] sm:$0xff] }
 0x1c8   : > { %13042 = vmatmul.mubr.f32.gmra.mrb[4].mxu0 %v15161_v5  ;;  %v15823_v21 = vand.u32 4294901760, %v8703_v14 }
 0x1c9   : > { %12337 = vmatmul.mubr.f32.gmra.mrb[2].mxu1 %v15588_v25  ;;  %13044 = vmatprep.mubr.f32.mxu0 %v15166_v51 }
 0x1ca   : > { %12339 = vmatprep.mubr.f32.mxu1 %v15597_v41 }
 0x1cc   : > { %13045 = vmatmul.mubr.f32.gmra.mrb[6].mxu0 %v15190_v28 }
 0x1cd   : > { %12340 = vmatmul.mubr.f32.gmra.mrb[4].mxu1 %v15602_v47  ;;  %13047 = vmatprep.mubr.f32.mxu0 %v15198_v35 }
 0x1ce   : > { %12342 = vmatprep.mubr.f32.mxu1 %v15604_v24 }
 0x1d0   : > { %13048 = vmatmul.mubr.f32.gmra.mrb[8].mxu0 %v15222_v52 }
 0x1d1   : > { %12343 = vmatmul.mubr.f32.gmra.mrb[6].mxu1 %v15630_v3  ;;  %13050 = vmatprep.mubr.f32.mxu0 %v15231_v36 }
 0x1d2   : > { %12345 = vmatprep.mubr.f32.mxu1 %v15639_v60 }
 0x1d4   : > { %13051 = vmatmul.mubr.f32.gmra.mrb[10].mxu0 %v15249_v17 }
 0x1d5   : > { %12346 = vmatmul.mubr.f32.gmra.mrb[8].mxu1 %v15664_v31  ;;  %13053 = vmatprep.mubr.f32.mxu0 %v15413_v23 }
 0x1d6   : > { %12348 = vmatprep.mubr.f32.mxu1 %v15670_v0 }
 0x1d8   : > { %13054 = vmatmul.mubr.f32.gmra.mrb[12].mxu0 %v15422_v56 }
 0x1d9   : > { %12349 = vmatmul.mubr.f32.gmra.mrb[10].mxu1 %v15690_v48  ;;  %13056 = vmatprep.mubr.f32.mxu0 %v17392_v10 }
 0x1da   : > { %12351 = vmatprep.mubr.f32.mxu1 %v15696_v13 }
 0x1dc   : > { %13057 = vmatmul.mubr.f32.gmra.mrb[14].mxu0 %v17393_v7 }
 0x1dd   : > { %12352 = vmatmul.mubr.f32.gmra.mrb[12].mxu1 %v15714_v30  ;;  %13061 = vmatprep.mubr.f32.mxu0 %v15085_v27  ;;  %v17395_v27 = vld [vmem:[#allocation53_spill] sm:$0xff] }
 0x1de   : > { %12354 = vmatprep.mubr.f32.mxu1 %v15720_v55 }
 0x1e0   : > { %13062 = vmatmul.mubr.f32.vlgmr.msra.gmra.mrb[0].mxu0 %v15090_v42  ;;  %v17396_v42 = vld [vmem:[#allocation54_spill] sm:$0xff] }
 0x1e1   : > { %12355 = vmatmul.mubr.f32.gmra.mrb[14].mxu1 %v15732_v54  ;;  %13064 = vmatprep.mubr.f32.mxu0 %v15092_v20  ;;  %v8423_v20 = vsel %vm232_vm1, %v11038_v1, 0  ;;  %v8432_v1 = vsel %vm232_vm1, %v11041_v44, 0 }
 0x1e2   : > { %12359 = vmatprep.mubr.f32.mxu1 %v17394_v58  ;;  %13086 = vmatpush3.msra.mxu0 %v15778_v15 }
 0x1e3   : > { %13111 = vmatprep.subr.mxu0 %v15823_v21 }
 0x1e4   : > { %13065 = vmatmul.mubr.f32.gmra.mrb[2].mxu0 %v15118_v57  ;;  %v15844_v57 = vand.u32 4294901760, %v8423_v20 }
 0x1e5   : > { %12360 = vmatmul.mubr.f32.vlgmr.msra.gmra.mrb[0].mxu1 %v17395_v27  ;;  %13067 = vmatprep.mubr.f32.mxu0 %v15128_v45  ;;  %v8426_v45 = vsel %vm232_vm1, %v11039_v38, 0  ;;  %v11043_v38 = vld [vmem:[%s14410_s28 + $0x69] sm:$0xff] }
 0x1e6   : > { %12384 = vmatpush3.msra.mxu1 %v15494_v46  ;;  %12362 = vmatprep.mubr.f32.mxu1 %v17396_v42  ;;  %v15852_v14 = vand.u32 4294901760, %v8426_v45 }
 0x1e7   : > { %12409 = vmatprep.subr.mxu1 %v17397_v62 }
 0x1e8   : > { %13068 = vmatmul.mubr.f32.gmra.mrb[4].mxu0 %v15161_v5  ;;  %v15857_v5 = vsub.f32 %v8423_v20, %v15844_v57  ;;  %v15868_v50 = vsub.f32 %v8426_v45, %v15852_v14  ;;  %v8438_v20 = vsel %vm232_vm1, %v11043_v38, 0  ;;  %v11046_v45 = vld [vmem:[%s14410_s28 + $0x91] sm:$0xff]  ;;  %v15887_v38 = vand.u32 4294901760, %v8441_v53 }
 0x1e9   : > { %12363 = vmatmul.mubr.f32.gmra.mrb[2].mxu1 %v17398_v43  ;;  %13070 = vmatprep.mubr.f32.mxu0 %v15166_v51  ;;  %v15859_v51 = vand.u32 4294901760, %v8429_v40  ;;  %v15885_v19 = vand.u32 4294901760, %v8438_v20 }
 0x1ea   : > { %12365 = vmatprep.mubr.f32.mxu1 %v17399_v33  ;;  %17400 = vst [vmem:[#allocation69_spill] sm:$0xff] %v15857_v5  ;;  %17402 = vst [vmem:[#allocation70_spill] sm:$0xff] %v15868_v50  ;;  %v17120_v44 = vand.u32 4294901760, %v15857_v5 }
 0x1eb   : > { %v15878_v29 = vsub.f32 %v8429_v40, %v15859_v51 }
 0x1ec   : > { %13071 = vmatmul.mubr.f32.gmra.mrb[6].mxu0 %v15190_v28  ;;  %v8435_v28 = vsel %vm232_vm1, %v11042_v63, 0  ;;  %v8542_v12 = vsub.f32 %v15857_v5, %v17120_v44  ;;  %v11048_v44 = vld [vmem:[%s14410_s28 + $0xa9] sm:$0xff] }
 0x1ed   : > { %12366 = vmatmul.mubr.f32.gmra.mrb[4].mxu1 %v15625_v16  ;;  %13073 = vmatprep.mubr.f32.mxu0 %v15198_v35  ;;  %v15870_v35 = vand.u32 4294901760, %v8432_v1  ;;  %17403 = vst [vmem:[#allocation59_spill] sm:$0xff] %v15878_v29  ;;  %v15880_v63 = vand.u32 4294901760, %v8435_v28 }
 0x1ee   : > { %12368 = vmatprep.mubr.f32.mxu1 %v17401_v37 }
 0x1ef   : > { %v15892_v39 = vsub.f32 %v8432_v1, %v15870_v35  ;;  %v15902_v54 = vsub.f32 %v8435_v28, %v15880_v63  ;;  %v11047_v1 = vld [vmem:[%s14410_s28 + $0x99] sm:$0xff]  ;;  %v17408_v28 = vand.u32 4294901760, %v15868_v50 }
 0x1f0   : > { %13074 = vmatmul.mubr.f32.gmra.mrb[8].mxu0 %v15222_v52  ;;  %v11045_v52 = vld [vmem:[%s14410_s28 + $0x81] sm:$0xff]  ;;  %v8450_v30 = vsel %vm232_vm1, %v11047_v1, 0 }
 0x1f1   : > { %12369 = vmatmul.mubr.f32.gmra.mrb[6].mxu1 %v15653_v61  ;;  %13076 = vmatprep.mubr.f32.mxu0 %v15231_v36  ;;  %17404 = vst [vmem:[#allocation60_spill] sm:$0xff] %v15892_v39  ;;  %v8444_v40 = vsel %vm232_vm1, %v11045_v52, 0  ;;  %17405 = vst [vmem:[#allocation61_spill] sm:$0xff] %v15902_v54  ;;  %v15908_v52 = vsub.f32 %v8438_v20, %v15885_v19  ;;  %v17409_v20 = vand.u32 4294901760, %v15878_v29 }
 0x1f2   : > { %12371 = vmatprep.mubr.f32.mxu1 %v15662_v26  ;;  %v15913_v36 = vand.u32 4294901760, %v8444_v40 }
 0x1f3   : > { %17406 = vst [vmem:[#allocation52_spill] sm:$0xff] %v15908_v52  ;;  %v8562_v5 = vsub.f32 %v15878_v29, %v17409_v20  ;;  %v15946_v29 = vand.u32 4294901760, %v8450_v30 }
 0x1f4   : > { %13077 = vmatmul.mubr.f32.gmra.mrb[10].mxu0 %v15249_v17  ;;  %v8447_v17 = vsel %vm232_vm1, %v11046_v45, 0  ;;  %v8552_v45 = vsub.f32 %v15868_v50, %v17408_v28  ;;  %v8453_v28 = vsel %vm232_vm1, %v11048_v44, 0 }
 0x1f5   : > { %12372 = vmatmul.mubr.f32.gmra.mrb[8].mxu1 %v15688_v2  ;;  %13079 = vmatprep.mubr.f32.mxu0 %v15413_v23  ;;  %v15911_v23 = vsub.f32 %v8441_v53, %v15887_v38  ;;  %v15921_v55 = vand.u32 4294901760, %v8447_v17  ;;  %v8543_v53 = vand.u32 4294901760, %v8542_v12  ;;  %v15936_v12 = vsub.f32 %v8444_v40, %v15913_v36 }
 0x1f6   : > { %12374 = vmatprep.mubr.f32.mxu1 %v15694_v49  ;;  %v8553_v20 = vand.u32 4294901760, %v8552_v45  ;;  %v8563_v13 = vand.u32 4294901760, %v8562_v5  ;;  %v17411_v40 = vand.u32 4294901760, %v15902_v54  ;;  %v8456_v45 = vsel %vm232_vm1, %v11049_v11, 0 }
 0x1f7   : > { %17407 = vst [vmem:[#allocation53_spill] sm:$0xff] %v15911_v23  ;;  %v15944_v44 = vsub.f32 %v8447_v17, %v15921_v55  ;;  %v11051_v17 = vld [vmem:[%s14410_s28 + $0xc9] sm:$0xff]  ;;  %v15968_v31 = vsub.f32 %v8450_v30, %v15946_v29 }
 0x1f8   : > { %13080 = vmatmul.mubr.f32.gmra.mrb[12].mxu0 %v15422_v56  ;;  %v17410_v56 = vand.u32 4294901760, %v15892_v39  ;;  %v8582_v50 = vsub.f32 %v15902_v54, %v17411_v40  ;;  %v11052_v40 = vld [vmem:[%s14410_s28 + $0xd9] sm:$0xff]  ;;  %v8462_v0 = vsel %vm232_vm1, %v11051_v17, 0 }
 0x1f9   : > { %12375 = vmatmul.mubr.f32.gmra.mrb[10].mxu1 %v15712_v9  ;;  %13082 = vmatprep.mubr.f32.mxu0 %v17392_v10  ;;  %v11050_v10 = vld [vmem:[%s14410_s28 + $0xc1] sm:$0xff]  ;;  %v8465_v30 = vsel %vm232_vm1, %v11052_v40, 0  ;;  %v15995_v40 = vand.u32 4294901760, %v8462_v0 }
 0x1fa   : > { %12377 = vmatprep.mubr.f32.mxu1 %v15718_v6  ;;  %v8572_v1 = vsub.f32 %v15892_v39, %v17410_v56  ;;  %v8459_v56 = vsel %vm232_vm1, %v11050_v10, 0  ;;  %v17412_v39 = vand.u32 4294901760, %v15908_v52  ;;  %v15970_v10 = vand.u32 4294901760, %v8456_v45 }
 0x1fb   : > { %17418 = vst [vmem:[#allocation62_spill] sm:$0xff] %v15995_v40 }
 0x1fc   : > { %13083 = vmatmul.mubr.f32.gmra.mrb[14].mxu0 %v17393_v7  ;;  %v15952_v7 = vand.u32 4294901760, %v8453_v28  ;;  %v8592_v48 = vsub.f32 %v15908_v52, %v17412_v39  ;;  %v8573_v54 = vand.u32 4294901760, %v8572_v1  ;;  %v8583_v39 = vand.u32 4294901760, %v8582_v50  ;;  %v11053_v1 = vld [vmem:[%s14410_s28 + $0xe1] sm:$0xff] }
 0x1fd   : > { %12378 = vmatmul.mubr.f32.gmra.mrb[12].mxu1 %v15730_v34  ;;  %13087 = vmatprep.mubr.f32.mxu0 %v8543_v53  ;;  %v17413_v53 = vand.u32 4294901760, %v15911_v23 }
 0x1fe   : > { %12380 = vmatprep.mubr.f32.mxu1 %v15739_v18  ;;  %v15974_v52 = vsub.f32 %v8453_v28, %v15952_v7  ;;  %v8593_v11 = vand.u32 4294901760, %v8592_v48  ;;  %v17417_v28 = vand.u32 4294901760, %v15944_v44  ;;  %v17419_v48 = vand.u32 4294901760, %v17395_v27 }
 0x1ff   : > { %v8602_v5 = vsub.f32 %v15911_v23, %v17413_v53  ;;  %v15976_v53 = vand.u32 4294901760, %v8459_v56 }
 0x200   : > { %13088 = vmatmul.mubr.f32.vlgmr.msra.gmra.mrb[0].mxu0 %v8553_v20  ;;  %v17415_v20 = vand.u32 4294901760, %v17394_v58  ;;  %v8622_v17 = vsub.f32 %v15944_v44, %v17417_v28  ;;  %v17153_v58 = vand.u32 4294901760, %v15968_v31 }
 0x201   : > { %12381 = vmatmul.mubr.f32.gmra.mrb[14].mxu1 %v15748_v4  ;;  %13090 = vmatprep.mubr.f32.mxu0 %v8563_v13  ;;  %17414 = vst [vmem:[#allocation54_spill] sm:$0xff] %v15976_v53  ;;  %v8603_v23 = vand.u32 4294901760, %v8602_v5  ;;  %v17416_v13 = vand.u32 4294901760, %v15936_v12  ;;  %v17152_v5 = vand.u32 4294901760, %v15974_v52 }
 0x202   : > { %12385 = vmatprep.mubr.f32.mxu1 %v17415_v20  ;;  %13112 = vmatpush3.msra.mxu0 %v15823_v21  ;;  %v15993_v21 = vsub.f32 %v8456_v45, %v15970_v10  ;;  %v16001_v20 = vsub.f32 %v8459_v56, %v15976_v53  ;;  %v17421_v45 = vand.u32 4294901760, %v17396_v42  ;;  %v8632_v27 = vsub.f32 %v15968_v31, %v17153_v58 }
 0x203   : > { %v8612_v50 = vsub.f32 %v15936_v12, %v17416_v13  ;;  %13137 = vmatprep.subr.mxu0 %v15804_v59  ;;  %v8468_v13 = vsel %vm232_vm1, %v11053_v1, 0  ;;  %v8623_v42 = vand.u32 4294901760, %v8622_v17 }
 0x204   : > { %13091 = vmatmul.mubr.f32.gmra.mrb[2].mxu0 %v8573_v54  ;;  %v16003_v54 = vand.u32 4294901760, %v8465_v30  ;;  %v17151_v56 = vand.u32 4294901760, %v15993_v21  ;;  %v17150_v1 = vand.u32 4294901760, %v16001_v20 }
 0x205   : > { %12386 = vmatmul.mubr.f32.vlgmr.msra.gmra.mrb[0].mxu1 %v17419_v48  ;;  %13093 = vmatprep.mubr.f32.mxu0 %v8583_v39  ;;  %v8613_v28 = vand.u32 4294901760, %v8612_v50  ;;  %v16015_v39 = vsub.f32 %v8462_v0, %v15995_v40  ;;  %v16017_v48 = vand.u32 4294901760, %v8468_v13  ;;  %v8633_v0 = vand.u32 4294901760, %v8632_v27 }
 0x206   : > { %17420 = vst [vmem:[#allocation63_spill] sm:$0xff] %v16003_v54  ;;  %12410 = vmatpush3.msra.mxu1 %v17397_v62  ;;  %12388 = vmatprep.mubr.f32.mxu1 %v17421_v45  ;;  %v17423_v62 = vand.u32 4294901760, %v17398_v43  ;;  %v16026_v50 = vsub.f32 %v8465_v30, %v16003_v54  ;;  %v17424_v45 = vand.u32 4294901760, %v17399_v33  ;;  %v8652_v43 = vsub.f32 %v15993_v21, %v17151_v56 }
 0x207   : > { %12435 = vmatprep.subr.mxu1 %v15494_v46  ;;  %17422 = vst [vmem:[#allocation51_spill] sm:$0xff] %v16017_v48  ;;  %v16035_v17 = vsub.f32 %v8468_v13, %v16017_v48  ;;  %v8662_v33 = vsub.f32 %v16001_v20, %v17150_v1  ;;  %v17426_v27 = vand.u32 4294901760, %v17401_v37  ;;  %v17428_v37 = vand.u32 4294901760, %v15662_v26 }
 0x208   : > { %13094 = vmatmul.mubr.f32.gmra.mrb[4].mxu0 %v8593_v11  ;;  %v8642_v11 = vsub.f32 %v15974_v52, %v17152_v5  ;;  %v17432_v26 = vand.u32 4294901760, %v15718_v6  ;;  %v17435_v6 = vand.u32 4294901760, %v15748_v4  ;;  %v10976_v5 = vld [vmem:[%s14410_s28 + $0x78] sm:$0xff] }
 0x209   : > { %12389 = vmatmul.mubr.f32.gmra.mrb[2].mxu1 %v17423_v62  ;;  %13096 = vmatprep.mubr.f32.mxu0 %v8603_v23  ;;  %v17149_v23 = vand.u32 4294901760, %v16015_v39  ;;  %v17425_v62 = vand.u32 4294901760, %v15625_v16  ;;  %v17147_v16 = vand.u32 4294901760, %v16035_v17 }
 0x20a   : > { %12391 = vmatprep.mubr.f32.mxu1 %v17424_v45  ;;  %v8643_v30 = vand.u32 4294901760, %v8642_v11  ;;  %v8653_v45 = vand.u32 4294901760, %v8652_v43  ;;  %v8663_v11 = vand.u32 4294901760, %v8662_v33 }
 0x20b   : > { %v8672_v13 = vsub.f32 %v16015_v39, %v17149_v23  ;;  %v8692_v43 = vsub.f32 %v16035_v17, %v17147_v16 }
 0x20c   : > { %13097 = vmatmul.mubr.f32.gmra.mrb[6].mxu0 %v8613_v28  ;;  %v17148_v28 = vand.u32 4294901760, %v16026_v50 }
 0x20d   : > { %12392 = vmatmul.mubr.f32.gmra.mrb[4].mxu1 %v17425_v62  ;;  %13099 = vmatprep.mubr.f32.mxu0 %v8623_v42  ;;  %v17427_v42 = vand.u32 4294901760, %v15653_v61  ;;  %v8693_v33 = vand.u32 4294901760, %v8692_v43 }
 0x20e   : > { %12394 = vmatprep.mubr.f32.mxu1 %v17426_v27  ;;  %v8682_v62 = vsub.f32 %v16026_v50, %v17148_v28  ;;  %v17429_v27 = vand.u32 4294901760, %v15688_v2  ;;  %v10984_v2 = vld [vmem:[%s16943_s1 + $0xc] sm:$0xf]  ;;  %v10974_v28 = vld [vmem:[%s14410_s28 + $0x60] sm:$0xff] }
 0x210   : > { %13100 = vmatmul.mubr.f32.gmra.mrb[8].mxu0 %v8633_v0  ;;  %v8673_v0 = vand.u32 4294901760, %v8672_v13  ;;  %v8683_v61 = vand.u32 4294901760, %v8682_v62  ;;  %v17439_v13 = vld [vmem:[#allocation58_spill] sm:$0xff]  ;;  %v17441_v62 = vld [vmem:[#allocation64_spill] sm:$0xff] }
 0x211   : > { %12395 = vmatmul.mubr.f32.gmra.mrb[6].mxu1 %v17427_v42  ;;  %13102 = vmatprep.mubr.f32.mxu0 %v8643_v30  ;;  %v17430_v30 = vand.u32 4294901760, %v15694_v49  ;;  %v17431_v42 = vand.u32 4294901760, %v15712_v9  ;;  %v17434_v49 = vand.u32 4294901760, %v15739_v18  ;;  %v3764_v9 = vsel %vm281_vm0, %v10984_v2, 0  ;;  %v17437_v18 = vld [vmem:[#allocation56_spill] sm:$0xff]  ;;  %v10968_v2 = vld [vmem:[%s14410_s28 + $0x18] sm:$0xff] }
 0x212   : > { %12397 = vmatprep.mubr.f32.mxu1 %v17428_v37  ;;  %v17442_v37 = vld [vmem:[#allocation69_spill] sm:$0xff] }
 0x214   : > { %13103 = vmatmul.mubr.f32.gmra.mrb[10].mxu0 %v8653_v45  ;;  %v17433_v45 = vand.u32 4294901760, %v15730_v34  ;;  %v16082_v34 = vand.u32 4294901760, %v3764_v9 }
 0x215   : > { %12398 = vmatmul.mubr.f32.gmra.mrb[8].mxu1 %v17429_v27  ;;  %13105 = vmatprep.mubr.f32.mxu0 %v8663_v11  ;;  %v17444_v27 = vld [vmem:[#allocation70_spill] sm:$0xff] }
 0x216   : > { %12400 = vmatprep.mubr.f32.mxu1 %v17430_v30  ;;  %v16108_v4 = vsub.f32 %v3764_v9, %v16082_v34  ;;  %v17446_v30 = vld [vmem:[#allocation59_spill] sm:$0xff]  ;;  %v10969_v9 = vld [vmem:[%s14410_s28 + $0x20] sm:$0xff] }
 0x218   : > { %13106 = vmatmul.mubr.f32.gmra.mrb[12].mxu0 %v8673_v0  ;;  %v16115_v11 = vand.u32 4294901760, %v16108_v4  ;;  %v17443_v0 = vld [vmem:[#allocation65_spill] sm:$0xff] }
 0x219   : > { %12401 = vmatmul.mubr.f32.gmra.mrb[10].mxu1 %v17431_v42  ;;  %13108 = vmatprep.mubr.f32.mxu0 %v8683_v61  ;;  %v17445_v61 = vld [vmem:[#allocation67_spill] sm:$0xff]  ;;  %v17447_v42 = vld [vmem:[#allocation68_spill] sm:$0xff] }
 0x21a   : > { %12403 = vmatprep.mubr.f32.mxu1 %v17432_v26  ;;  %17440 = vst [vmem:[#allocation55_spill] sm:$0xff] %v16115_v11  ;;  %v3996_v43 = vsub.f32 %v16108_v4, %v16115_v11  ;;  %v17448_v26 = vld [vmem:[#allocation60_spill] sm:$0xff] }
 0x21c   : > { %13109 = vmatmul.mubr.f32.gmra.mrb[14].mxu0 %v8693_v33  ;;  %v16128_v33 = vand.u32 4294901760, %v3996_v43  ;;  %v10971_v43 = vld [vmem:[%s14410_s28 + $0x38] sm:$0xff] }
 0x21d   : > { %12404 = vmatmul.mubr.f32.gmra.mrb[12].mxu1 %v17433_v45  ;;  %13113 = vmatprep.mubr.f32.mxu0 %v15844_v57  ;;  %v17449_v45 = vld [vmem:[#allocation61_spill] sm:$0xff] }
 0x21e   : > { %12406 = vmatprep.mubr.f32.mxu1 %v17434_v49  ;;  %v17451_v49 = vld [vmem:[#allocation53_spill] sm:$0xff] }
 0x220   : > { %13114 = vmatmul.mubr.f32.vlgmr.msra.gmra.mrb[0].mxu0 %v15852_v14 }
 0x221   : > { %12407 = vmatmul.mubr.f32.gmra.mrb[14].mxu1 %v17435_v6  ;;  %13116 = vmatprep.mubr.f32.mxu0 %v15859_v51  ;;  %v10970_v6 = vld [vmem:[%s14410_s28 + $0x30] sm:$0xff] }
 0x222   : > { %12411 = vmatprep.mubr.f32.mxu1 %v15561_v32  ;;  %13138 = vmatpush3.msra.mxu0 %v15804_v59  ;;  %v17438_v59 = vld [vmem:[#allocation57_spill] sm:$0xff] }
 0x223   : > { %13163 = vmatprep.subr.mxu0 %v15778_v15 }
 0x224   : > { %13117 = vmatmul.mubr.f32.gmra.mrb[2].mxu0 %v15870_v35 }
 0x225   : > { %12412 = vmatmul.mubr.f32.vlgmr.msra.gmra.mrb[0].mxu1 %v15570_v22  ;;  %13119 = vmatprep.mubr.f32.mxu0 %v15880_v63 }
 0x226   : > { %12436 = vmatpush3.msra.mxu1 %v15494_v46  ;;  %12414 = vmatprep.mubr.f32.mxu1 %v15576_v8  ;;  %v17436_v46 = vld [vmem:[#allocation66_spill] sm:$0xff] }
 0x227   : > { %12461 = vmatprep.subr.mxu1 %v16082_v34 }
 0x228   : > { %13120 = vmatmul.mubr.f32.gmra.mrb[4].mxu0 %v15885_v19 }
 0x229   : > { %12415 = vmatmul.mubr.f32.gmra.mrb[2].mxu1 %v15588_v25  ;;  %13122 = vmatprep.mubr.f32.mxu0 %v15887_v38 }
 0x22a   : > { %12417 = vmatprep.mubr.f32.mxu1 %v15597_v41 }
 0x22c   : > { %13123 = vmatmul.mubr.f32.gmra.mrb[6].mxu0 %v15913_v36 }
 0x22d   : > { %12418 = vmatmul.mubr.f32.gmra.mrb[4].mxu1 %v15602_v47  ;;  %13125 = vmatprep.mubr.f32.mxu0 %v15921_v55 }
 0x22e   : > { %12420 = vmatprep.mubr.f32.mxu1 %v15604_v24 }
 0x230   : > { %13126 = vmatmul.mubr.f32.gmra.mrb[8].mxu0 %v15946_v29 }
 0x231   : > { %12421 = vmatmul.mubr.f32.gmra.mrb[6].mxu1 %v15630_v3  ;;  %13128 = vmatprep.mubr.f32.mxu0 %v15952_v7 }
 0x232   : > { %12423 = vmatprep.mubr.f32.mxu1 %v15639_v60 }
 0x234   : > { %13129 = vmatmul.mubr.f32.gmra.mrb[10].mxu0 %v15970_v10 }
 0x235   : > { %12424 = vmatmul.mubr.f32.gmra.mrb[8].mxu1 %v17436_v46  ;;  %13131 = vmatprep.mubr.f32.mxu0 %v15976_v53  ;;  %v10979_v53 = vld [vmem:[%s14410_s28 + $0x98] sm:$0xff] }
 0x236   : > { %12426 = vmatprep.mubr.f32.mxu1 %v17437_v18 }
 0x238   : > { %13132 = vmatmul.mubr.f32.gmra.mrb[12].mxu0 %v15995_v40 }
 0x239   : > { %12427 = vmatmul.mubr.f32.gmra.mrb[10].mxu1 %v17438_v59  ;;  %13134 = vmatprep.mubr.f32.mxu0 %v16003_v54  ;;  %v10977_v54 = vld [vmem:[%s14410_s28 + $0x80] sm:$0xff] }
 0x23a   : > { %12429 = vmatprep.mubr.f32.mxu1 %v17439_v13 }
 0x23c   : > { %13135 = vmatmul.mubr.f32.gmra.mrb[14].mxu0 %v16017_v48 }
 0x23d   : > { %12430 = vmatmul.mubr.f32.gmra.mrb[12].mxu1 %v17441_v62  ;;  %13139 = vmatprep.mubr.f32.mxu0 %v17442_v37 }
 0x23e   : > { %12432 = vmatprep.mubr.f32.mxu1 %v17443_v0 }
 0x240   : > { %13140 = vmatmul.mubr.f32.vlgmr.msra.gmra.mrb[0].mxu0 %v17444_v27 }
 0x241   : > { %12433 = vmatmul.mubr.f32.gmra.mrb[14].mxu1 %v17445_v61  ;;  %13142 = vmatprep.mubr.f32.mxu0 %v17446_v30 }
 0x242   : > { %12437 = vmatprep.mubr.f32.mxu1 %v15561_v32  ;;  %13164 = vmatpush3.msra.mxu0 %v15778_v15  ;;  %v17450_v32 = vld [vmem:[#allocation52_spill] sm:$0xff] }
 0x243   : > { %13189 = vmatprep.subr.mxu0 %v17447_v42 }
 0x244   : > { %13143 = vmatmul.mubr.f32.gmra.mrb[2].mxu0 %v17448_v26 }
 0x245   : > { %12438 = vmatmul.mubr.f32.vlgmr.msra.gmra.mrb[0].mxu1 %v15570_v22  ;;  %13145 = vmatprep.mubr.f32.mxu0 %v17449_v45  ;;  %v3716_v22 = vsel %vm232_vm1, %v10968_v2, 0  ;;  %v10972_v2 = vld [vmem:[%s14410_s28 + $0x48] sm:$0xff] }
 0x246   : > { %12462 = vmatpush3.msra.mxu1 %v16082_v34  ;;  %12440 = vmatprep.mubr.f32.mxu1 %v15576_v8  ;;  %v16149_v8 = vand.u32 4294901760, %v3716_v22  ;;  %v3728_v23 = vsel %vm232_vm1, %v10972_v2, 0 }
 0x247   : > { %12487 = vmatprep.subr.mxu1 %v16128_v33  ;;  %v16185_v56 = vand.u32 4294901760, %v3728_v23 }
 0x248   : > { %13146 = vmatmul.mubr.f32.gmra.mrb[4].mxu0 %v17450_v32 }
 0x249   : > { %12441 = vmatmul.mubr.f32.gmra.mrb[2].mxu1 %v15588_v25  ;;  %13148 = vmatprep.mubr.f32.mxu0 %v17451_v49  ;;  %v3719_v25 = vsel %vm232_vm1, %v10969_v9, 0  ;;  %v3725_v9 = vsel %vm232_vm1, %v10971_v43, 0  ;;  %v3734_v43 = vsel %vm232_vm1, %v10974_v28, 0  ;;  %v16207_v48 = vsub.f32 %v3728_v23, %v16185_v56 }
 0x24a   : > { %12443 = vmatprep.mubr.f32.mxu1 %v15597_v41  ;;  %v3722_v41 = vsel %vm232_vm1, %v10970_v6, 0  ;;  %v10973_v6 = vld [vmem:[%s14410_s28 + $0x50] sm:$0xff]  ;;  %v16192_v58 = vand.u32 4294901760, %v3734_v43  ;;  %v17457_v23 = vand.u32 4294901760, %v17442_v37  ;;  %v3743_v37 = vsel %vm232_vm1, %v10977_v54, 0 }
 0x24b   : > { %v16164_v16 = vand.u32 4294901760, %v3722_v41  ;;  %17455 = vst [vmem:[#allocation58_spill] sm:$0xff] %v16207_v48 }
 0x24c   : > { %13149 = vmatmul.mubr.f32.gmra.mrb[6].mxu0 %v15936_v12 }
 0x24d   : > { %12444 = vmatmul.mubr.f32.gmra.mrb[4].mxu1 %v15602_v47  ;;  %13151 = vmatprep.mubr.f32.mxu0 %v15944_v44  ;;  %v16158_v47 = vand.u32 4294901760, %v3719_v25  ;;  %v16183_v2 = vsub.f32 %v3722_v41, %v16164_v16 }
 0x24e   : > { %12446 = vmatprep.mubr.f32.mxu1 %v15604_v24  ;;  %v16162_v24 = vsub.f32 %v3716_v22, %v16149_v8  ;;  %v3731_v22 = vsel %vm232_vm1, %v10973_v6, 0 }
 0x250   : > { %13152 = vmatmul.mubr.f32.gmra.mrb[8].mxu0 %v15968_v31  ;;  %17452 = vst [vmem:[#allocation66_spill] sm:$0xff] %v16162_v24  ;;  %v17160_v1 = vand.u32 4294901760, %v16162_v24 }
 0x251   : > { %12447 = vmatmul.mubr.f32.gmra.mrb[6].mxu1 %v15630_v3  ;;  %13154 = vmatprep.mubr.f32.mxu0 %v15974_v52  ;;  %v16174_v3 = vsub.f32 %v3719_v25, %v16158_v47  ;;  %v16190_v25 = vand.u32 4294901760, %v3731_v22 }
 0x252   : > { %12449 = vmatprep.mubr.f32.mxu1 %v15639_v60  ;;  %v16176_v60 = vand.u32 4294901760, %v3725_v9  ;;  %v3835_v6 = vsub.f32 %v16162_v24, %v17160_v1  ;;  %v10978_v1 = vld [vmem:[%s14410_s28 + $0x90] sm:$0xff]  ;;  %v17458_v24 = vand.u32 4294901760, %v16183_v2 }
 0x253   : > { %17453 = vst [vmem:[#allocation56_spill] sm:$0xff] %v16174_v3  ;;  %v17167_v28 = vand.u32 4294901760, %v16174_v3 }
 0x254   : > { %13155 = vmatmul.mubr.f32.gmra.mrb[10].mxu0 %v15993_v21  ;;  %v3855_v40 = vsub.f32 %v16183_v2, %v17458_v24  ;;  %v17460_v24 = vand.u32 4294901760, %v17446_v30 }
 0x255   : > { %12450 = vmatmul.mubr.f32.gmra.mrb[8].mxu1 %v17436_v46  ;;  %13157 = vmatprep.mubr.f32.mxu0 %v16001_v20  ;;  %v10975_v46 = vld [vmem:[%s14410_s28 + $0x68] sm:$0xff] }
 0x256   : > { %12452 = vmatprep.mubr.f32.mxu1 %v17437_v18  ;;  %v16198_v18 = vsub.f32 %v3725_v9, %v16176_v60  ;;  %v3737_v41 = vsel %vm232_vm1, %v10975_v46, 0  ;;  %v16213_v9 = vsub.f32 %v3731_v22, %v16190_v25 }
 0x257   : > { %v16218_v46 = vand.u32 4294901760, %v3737_v41 }
 0x258   : > { %13158 = vmatmul.mubr.f32.gmra.mrb[12].mxu0 %v16015_v39  ;;  %17454 = vst [vmem:[#allocation57_spill] sm:$0xff] %v16198_v18  ;;  %v17175_v11 = vand.u32 4294901760, %v16213_v9 }
 0x259   : > { %12453 = vmatmul.mubr.f32.gmra.mrb[10].mxu1 %v17438_v59  ;;  %13160 = vmatprep.mubr.f32.mxu0 %v16026_v50  ;;  %v3740_v59 = vsel %vm232_vm1, %v10976_v5, 0  ;;  %v3845_v5 = vsub.f32 %v16174_v3, %v17167_v28  ;;  %v17459_v28 = vand.u32 4294901760, %v17444_v27  ;;  %v16255_v3 = vand.u32 4294901760, %v3743_v37 }
 0x25a   : > { %12455 = vmatprep.mubr.f32.mxu1 %v17439_v13  ;;  %v16216_v13 = vsub.f32 %v3734_v43, %v16192_v58  ;;  %v16228_v22 = vand.u32 4294901760, %v3740_v59  ;;  %v3836_v43 = vand.u32 4294901760, %v3835_v6  ;;  %v10980_v6 = vld [vmem:[%s14410_s28 + $0xa8] sm:$0xff] }
 0x25b   : > { %v3846_v54 = vand.u32 4294901760, %v3845_v5  ;;  %17462 = vst [vmem:[#allocation69_spill] sm:$0xff] %v16255_v3  ;;  %v3749_v5 = vsel %vm232_vm1, %v10979_v53, 0  ;;  %v10982_v53 = vld [vmem:[%s14410_s28 + $0xc0] sm:$0xff] }
 0x25c   : > { %13161 = vmatmul.mubr.f32.gmra.mrb[14].mxu0 %v16035_v17  ;;  %17456 = vst [vmem:[#allocation64_spill] sm:$0xff] %v16216_v13 }
 0x25d   : > { %12456 = vmatmul.mubr.f32.gmra.mrb[12].mxu1 %v17441_v62  ;;  %13165 = vmatprep.mubr.f32.mxu0 %v17457_v23  ;;  %v17170_v62 = vand.u32 4294901760, %v16207_v48  ;;  %v3746_v23 = vsel %vm232_vm1, %v10978_v1, 0  ;;  %v17461_v1 = vand.u32 4294901760, %v16198_v18 }
 0x25e   : > { %12458 = vmatprep.mubr.f32.mxu1 %v17443_v0  ;;  %v16243_v0 = vsub.f32 %v3737_v41, %v16218_v46  ;;  %v3856_v41 = vand.u32 4294901760, %v3855_v40  ;;  %v16261_v30 = vand.u32 4294901760, %v3746_v23  ;;  %v3885_v40 = vsub.f32 %v16213_v9, %v17175_v11 }
 0x25f   : > { %v3865_v27 = vsub.f32 %v16198_v18, %v17461_v1  ;;  %v10981_v1 = vld [vmem:[%s14410_s28 + $0xb0] sm:$0xff]  ;;  %v16283_v18 = vand.u32 4294901760, %v3749_v5 }
 0x260   : > { %13166 = vmatmul.mubr.f32.vlgmr.msra.gmra.mrb[0].mxu0 %v17459_v28  ;;  %v16253_v28 = vsub.f32 %v3740_v59, %v16228_v22  ;;  %17463 = vst [vmem:[#allocation65_spill] sm:$0xff] %v16261_v30  ;;  %v17464_v59 = vand.u32 4294901760, %v17448_v26  ;;  %v16287_v11 = vsub.f32 %v3746_v23, %v16261_v30  ;;  %v17471_v23 = vand.u32 4294901760, %v17451_v49 }
 0x261   : > { %12459 = vmatmul.mubr.f32.gmra.mrb[14].mxu1 %v17445_v61  ;;  %13168 = vmatprep.mubr.f32.mxu0 %v17460_v24  ;;  %v3875_v61 = vsub.f32 %v16207_v48, %v17170_v62  ;;  %v3752_v24 = vsel %vm232_vm1, %v10980_v6, 0  ;;  %v17466_v6 = vand.u32 4294901760, %v17449_v45  ;;  %v3866_v48 = vand.u32 4294901760, %v3865_v27  ;;  %17467 = vst [vmem:[#allocation70_spill] sm:$0xff] %v16283_v18  ;;  %v10983_v27 = vld [vmem:[%s14410_s28 + $0xc8] sm:$0xff] }
 0x262   : > { %12463 = vmatprep.mubr.f32.mxu1 %v3836_v43  ;;  %13190 = vmatpush3.msra.mxu0 %v17447_v42  ;;  %v17465_v42 = vand.u32 4294901760, %v16216_v13  ;;  %v16289_v62 = vand.u32 4294901760, %v3752_v24  ;;  %v3755_v45 = vsel %vm232_vm1, %v10981_v1, 0  ;;  %v3761_v49 = vsel %vm232_vm1, %v10983_v27, 0 }
 0x263   : > { %13215 = vmatprep.subr.mxu0 %v15778_v15 }
 0x264   : > { %13169 = vmatmul.mubr.f32.gmra.mrb[2].mxu0 %v17464_v59  ;;  %v3895_v43 = vsub.f32 %v16216_v13, %v17465_v42  ;;  %v16281_v59 = vsub.f32 %v3743_v37, %v16255_v3  ;;  %v3876_v42 = vand.u32 4294901760, %v3875_v61  ;;  %17468 = vst [vmem:[#allocation67_spill] sm:$0xff] %v16289_v62  ;;  %v17469_v37 = vand.u32 4294901760, %v17450_v32 }
 0x265   : > { %12464 = vmatmul.mubr.f32.vlgmr.msra.gmra.mrb[0].mxu1 %v3846_v54  ;;  %13171 = vmatprep.mubr.f32.mxu0 %v17466_v6  ;;  %v3758_v54 = vsel %vm232_vm1, %v10982_v53, 0  ;;  %v3886_v6 = vand.u32 4294901760, %v3885_v40  ;;  %v17472_v61 = vand.u32 4294901760, %v16253_v28  ;;  %v16307_v13 = vsub.f32 %v3749_v5, %v16283_v18 }
 0x266   : > { %12488 = vmatpush3.msra.mxu1 %v16128_v33  ;;  %12466 = vmatprep.mubr.f32.mxu1 %v3856_v41  ;;  %v3896_v26 = vand.u32 4294901760, %v3895_v43  ;;  %v17470_v33 = vand.u32 4294901760, %v16243_v0  ;;  %v17184_v53 = vand.u32 4294901760, %v16281_v59  ;;  %v16309_v32 = vand.u32 4294901760, %v3755_v45 }
 0x267   : > { %12513 = vmatprep.subr.mxu1 %v16108_v4  ;;  %v3915_v1 = vsub.f32 %v16253_v28, %v17472_v61  ;;  %v17183_v40 = vand.u32 4294901760, %v16287_v11  ;;  %v16313_v43 = vsub.f32 %v3752_v24, %v16289_v62  ;;  %v17476_v5 = vand.u32 4294901760, %v15944_v44 }
 0x268   : > { %13172 = vmatmul.mubr.f32.gmra.mrb[4].mxu0 %v17469_v37  ;;  %v3905_v41 = vsub.f32 %v16243_v0, %v17470_v33  ;;  %17473 = vst [vmem:[#allocation59_spill] sm:$0xff] %v16309_v32  ;;  %v17475_v37 = vand.u32 4294901760, %v15936_v12  ;;  %v16327_v24 = vsub.f32 %v3755_v45, %v16309_v32  ;;  %v16329_v61 = vand.u32 4294901760, %v3761_v49 }
 0x269   : > { %12467 = vmatmul.mubr.f32.gmra.mrb[2].mxu1 %v3866_v48  ;;  %13174 = vmatprep.mubr.f32.mxu0 %v17471_v23  ;;  %v16315_v48 = vand.u32 4294901760, %v3758_v54  ;;  %v17182_v23 = vand.u32 4294901760, %v16307_v13  ;;  %v3916_v27 = vand.u32 4294901760, %v3915_v1  ;;  %v3935_v12 = vsub.f32 %v16287_v11, %v17183_v40 }
 0x26a   : > { %12469 = vmatprep.mubr.f32.mxu1 %v3876_v42  ;;  %v3906_v33 = vand.u32 4294901760, %v3905_v41  ;;  %v3925_v42 = vsub.f32 %v16281_v59, %v17184_v53  ;;  %17477 = vst [vmem:[#allocation60_spill] sm:$0xff] %v16329_v61  ;;  %v17181_v44 = vand.u32 4294901760, %v16313_v43  ;;  %v17478_v41 = vand.u32 4294901760, %v15968_v31 }
 0x26b   : > { %17474 = vst [vmem:[#allocation68_spill] sm:$0xff] %v16315_v48  ;;  %v17479_v45 = vand.u32 4294901760, %v15974_v52  ;;  %v17180_v1 = vand.u32 4294901760, %v16327_v24  ;;  %v17480_v52 = vand.u32 4294901760, %v15993_v21  ;;  %v17482_v21 = vand.u32 4294901760, %v16015_v39 }
 0x26c   : > { %13175 = vmatmul.mubr.f32.gmra.mrb[6].mxu0 %v17475_v37  ;;  %v3926_v37 = vand.u32 4294901760, %v3925_v42  ;;  %v3955_v31 = vsub.f32 %v16313_v43, %v17181_v44  ;;  %v17481_v42 = vand.u32 4294901760, %v16001_v20  ;;  %v17483_v20 = vand.u32 4294901760, %v16026_v50 }
 0x26d   : > { %12470 = vmatmul.mubr.f32.gmra.mrb[4].mxu1 %v3886_v6  ;;  %13177 = vmatprep.mubr.f32.mxu0 %v17476_v5  ;;  %v16336_v6 = vsub.f32 %v3758_v54, %v16315_v48  ;;  %v16347_v5 = vsub.f32 %v3761_v49, %v16329_v61  ;;  %v3936_v54 = vand.u32 4294901760, %v3935_v12  ;;  %v3965_v49 = vsub.f32 %v16327_v24, %v17180_v1 }
 0x26e   : > { %12472 = vmatprep.mubr.f32.mxu1 %v3896_v26  ;;  %v3945_v26 = vsub.f32 %v16307_v13, %v17182_v23  ;;  %v3956_v12 = vand.u32 4294901760, %v3955_v31 }
 0x270   : > { %13178 = vmatmul.mubr.f32.gmra.mrb[8].mxu0 %v17478_v41  ;;  %v3946_v41 = vand.u32 4294901760, %v3945_v26 }
 0x271   : > { %12473 = vmatmul.mubr.f32.gmra.mrb[6].mxu1 %v3906_v33  ;;  %13180 = vmatprep.mubr.f32.mxu0 %v17479_v45  ;;  %v17179_v33 = vand.u32 4294901760, %v16336_v6 }
 0x272   : > { %12475 = vmatprep.mubr.f32.mxu1 %v3916_v27  ;;  %v17178_v27 = vand.u32 4294901760, %v16347_v5 }
 0x273   : > { %v3975_v45 = vsub.f32 %v16336_v6, %v17179_v33  ;;  %v17496_v33 = vld [vmem:[#allocation64_spill] sm:$0xff] }
 0x274   : > { %13181 = vmatmul.mubr.f32.gmra.mrb[10].mxu0 %v17480_v52  ;;  %v3985_v26 = vsub.f32 %v16347_v5, %v17178_v27  ;;  %v17484_v52 = vand.u32 4294901760, %v16035_v17  ;;  %v17485_v17 = vld [vmem:[#allocation54_spill] sm:$0xff]  ;;  %v11060_v27 = vld [vmem:[%s14410_s28 + $0x6a] sm:$0xff] }
 0x275   : > { %12476 = vmatmul.mubr.f32.gmra.mrb[8].mxu1 %v3926_v37  ;;  %13183 = vmatprep.mubr.f32.mxu0 %v17481_v42  ;;  %v3966_v37 = vand.u32 4294901760, %v3965_v49  ;;  %v3976_v31 = vand.u32 4294901760, %v3975_v45  ;;  %v17488_v49 = vld [vmem:[#allocation63_spill] sm:$0xff] }
 0x276   : > { %12478 = vmatprep.mubr.f32.mxu1 %v3936_v54  ;;  %v11071_v54 = vld [vmem:[%s16943_s1 + $0x20] sm:$0xf]  ;;  %v3986_v50 = vand.u32 4294901760, %v3985_v26  ;;  %v17489_v45 = vld [vmem:[#allocation51_spill] sm:$0xff] }
 0x277   : > { %v9647_v39 = vsel %vm281_vm0, %v11071_v54, 0  ;;  %v17492_v26 = vld [vmem:[#allocation55_spill] sm:$0xff] }
 0x278   : > { %13184 = vmatmul.mubr.f32.gmra.mrb[12].mxu0 %v17482_v21  ;;  %v16378_v42 = vand.u32 4294901760, %v9647_v39  ;;  %v11057_v54 = vld [vmem:[%s14410_s28 + $0x4a] sm:$0xff] }
 0x279   : > { %12479 = vmatmul.mubr.f32.gmra.mrb[10].mxu1 %v3946_v41  ;;  %13186 = vmatprep.mubr.f32.mxu0 %v17483_v20  ;;  %v17487_v41 = vld [vmem:[#allocation62_spill] sm:$0xff] }
 0x27a   : > { %12481 = vmatprep.mubr.f32.mxu1 %v3956_v12  ;;  %v17490_v20 = vld [vmem:[#allocation66_spill] sm:$0xff] }
 0x27c   : > { %13187 = vmatmul.mubr.f32.gmra.mrb[14].mxu0 %v17484_v52  ;;  %v17494_v52 = vld [vmem:[#allocation58_spill] sm:$0xff] }
 0x27d   : > { %12482 = vmatmul.mubr.f32.gmra.mrb[12].mxu1 %v3966_v37  ;;  %13191 = vmatprep.mubr.f32.mxu0 %v15844_v57  ;;  %v11055_v37 = vld [vmem:[%s14410_s28 + $0x32] sm:$0xff] }
 0x27e   : > { %12484 = vmatprep.mubr.f32.mxu1 %v3976_v31  ;;  %v17493_v31 = vld [vmem:[#allocation57_spill] sm:$0xff] }
 0x280   : > { %13192 = vmatmul.mubr.f32.vlgmr.msra.gmra.mrb[0].mxu0 %v15852_v14 }
 0x281   : > { %12485 = vmatmul.mubr.f32.gmra.mrb[14].mxu1 %v3986_v50  ;;  %13194 = vmatprep.mubr.f32.mxu0 %v15859_v51  ;;  %v11058_v50 = vld [vmem:[%s14410_s28 + $0x52] sm:$0xff] }
 0x282   : > { %12489 = vmatprep.mubr.f32.mxu1 %v16149_v8  ;;  %13216 = vmatpush3.msra.mxu0 %v15778_v15  ;;  %v16404_v15 = vsub.f32 %v9647_v39, %v16378_v42  ;;  %v9605_v39 = vsel %vm232_vm1, %v11057_v54, 0  ;;  %v11061_v54 = vld [vmem:[%s14410_s28 + $0x7a] sm:$0xff] }
 0x283   : > { %13241 = vmatprep.subr.mxu0 %v16378_v42  ;;  %v9617_v44 = vsel %vm232_vm1, %v11061_v54, 0 }
 0x284   : > { %13195 = vmatmul.mubr.f32.gmra.mrb[2].mxu0 %v15870_v35 }
 0x285   : > { %12490 = vmatmul.mubr.f32.vlgmr.msra.gmra.mrb[0].mxu1 %v16158_v47  ;;  %13197 = vmatprep.mubr.f32.mxu0 %v15880_v63 }
 0x286   : > { %12514 = vmatpush3.msra.mxu1 %v16108_v4  ;;  %12492 = vmatprep.mubr.f32.mxu1 %v16164_v16  ;;  %v16411_v4 = vand.u32 4294901760, %v16404_v15 }
 0x287   : > { %12539 = vmatprep.subr.mxu1 %v16082_v34 }
 0x288   : > { %13198 = vmatmul.mubr.f32.gmra.mrb[4].mxu0 %v15885_v19  ;;  %17486 = vst [vmem:[#allocation61_spill] sm:$0xff] %v16411_v4  ;;  %v9879_v12 = vsub.f32 %v16404_v15, %v16411_v4  ;;  %v11066_v4 = vld [vmem:[%s14410_s28 + $0xb2] sm:$0xff] }
 0x289   : > { %12493 = vmatmul.mubr.f32.gmra.mrb[2].mxu1 %v16176_v60  ;;  %13200 = vmatprep.mubr.f32.mxu0 %v15887_v38 }
 0x28a   : > { %12495 = vmatprep.mubr.f32.mxu1 %v16185_v56  ;;  %v16423_v21 = vand.u32 4294901760, %v9879_v12  ;;  %v11059_v12 = vld [vmem:[%s14410_s28 + $0x62] sm:$0xff] }
 0x28c   : > { %13201 = vmatmul.mubr.f32.gmra.mrb[6].mxu0 %v15913_v36 }
 0x28d   : > { %12496 = vmatmul.mubr.f32.gmra.mrb[4].mxu1 %v16190_v25  ;;  %13203 = vmatprep.mubr.f32.mxu0 %v15921_v55 }
 0x28e   : > { %12498 = vmatprep.mubr.f32.mxu1 %v16192_v58 }
 0x290   : > { %13204 = vmatmul.mubr.f32.gmra.mrb[8].mxu0 %v15946_v29 }
 0x291   : > { %12499 = vmatmul.mubr.f32.gmra.mrb[6].mxu1 %v16218_v46  ;;  %13206 = vmatprep.mubr.f32.mxu0 %v15952_v7 }
 0x292   : > { %12501 = vmatprep.mubr.f32.mxu1 %v16228_v22 }
 0x294   : > { %13207 = vmatmul.mubr.f32.gmra.mrb[10].mxu0 %v15970_v10 }
 0x295   : > { %12502 = vmatmul.mubr.f32.gmra.mrb[8].mxu1 %v16255_v3  ;;  %13209 = vmatprep.mubr.f32.mxu0 %v17485_v17 }
 0x296   : > { %12504 = vmatprep.mubr.f32.mxu1 %v16261_v30 }
 0x298   : > { %13210 = vmatmul.mubr.f32.gmra.mrb[12].mxu0 %v17487_v41 }
 0x299   : > { %12505 = vmatmul.mubr.f32.gmra.mrb[10].mxu1 %v16283_v18  ;;  %13212 = vmatprep.mubr.f32.mxu0 %v17488_v49 }
 0x29a   : > { %12507 = vmatprep.mubr.f32.mxu1 %v16289_v62 }
 0x29c   : > { %13213 = vmatmul.mubr.f32.gmra.mrb[14].mxu0 %v17489_v45 }
 0x29d   : > { %12508 = vmatmul.mubr.f32.gmra.mrb[12].mxu1 %v16309_v32  ;;  %13217 = vmatprep.mubr.f32.mxu0 %v15844_v57  ;;  %v17491_v57 = vld [vmem:[#allocation56_spill] sm:$0xff] }
 0x29e   : > { %12510 = vmatprep.mubr.f32.mxu1 %v16315_v48 }
 0x2a0   : > { %13218 = vmatmul.mubr.f32.vlgmr.msra.gmra.mrb[0].mxu0 %v15852_v14  ;;  %v9599_v14 = vsel %vm232_vm1, %v11055_v37, 0 }
 0x2a1   : > { %12511 = vmatmul.mubr.f32.gmra.mrb[14].mxu1 %v16329_v61  ;;  %13220 = vmatprep.mubr.f32.mxu0 %v15859_v51  ;;  %v11056_v51 = vld [vmem:[%s14410_s28 + $0x3a] sm:$0xff] }
 0x2a2   : > { %12515 = vmatprep.mubr.f32.mxu1 %v17490_v20  ;;  %13242 = vmatpush3.msra.mxu0 %v16378_v42 }
 0x2a3   : > { %13267 = vmatprep.subr.mxu0 %v16423_v21 }
 0x2a4   : > { %13221 = vmatmul.mubr.f32.gmra.mrb[2].mxu0 %v15870_v35  ;;  %v16444_v35 = vand.u32 4294901760, %v9599_v14 }
 0x2a5   : > { %12516 = vmatmul.mubr.f32.vlgmr.msra.gmra.mrb[0].mxu1 %v17491_v57  ;;  %13223 = vmatprep.mubr.f32.mxu0 %v15880_v63  ;;  %v9602_v63 = vsel %vm232_vm1, %v11056_v51, 0  ;;  %v9608_v51 = vsel %vm232_vm1, %v11058_v50, 0 }
 0x2a6   : > { %12540 = vmatpush3.msra.mxu1 %v16082_v34  ;;  %12518 = vmatprep.mubr.f32.mxu1 %v16183_v2  ;;  %v16452_v37 = vand.u32 4294901760, %v9602_v63 }
 0x2a7   : > { %12565 = vmatprep.subr.mxu1 %v17492_v26 }
 0x2a8   : > { %13224 = vmatmul.mubr.f32.gmra.mrb[4].mxu0 %v15885_v19  ;;  %v16457_v19 = vsub.f32 %v9599_v14, %v16444_v35  ;;  %v16468_v1 = vsub.f32 %v9602_v63, %v16452_v37  ;;  %v9614_v14 = vsel %vm232_vm1, %v11060_v27, 0  ;;  %v11063_v63 = vld [vmem:[%s14410_s28 + $0x92] sm:$0xff]  ;;  %v16487_v27 = vand.u32 4294901760, %v9617_v44 }
 0x2a9   : > { %12519 = vmatmul.mubr.f32.gmra.mrb[2].mxu1 %v17493_v31  ;;  %13226 = vmatprep.mubr.f32.mxu0 %v15887_v38  ;;  %v16459_v38 = vand.u32 4294901760, %v9605_v39  ;;  %v16485_v40 = vand.u32 4294901760, %v9614_v14 }
 0x2aa   : > { %12521 = vmatprep.mubr.f32.mxu1 %v17494_v52  ;;  %17495 = vst [vmem:[#allocation52_spill] sm:$0xff] %v16457_v19  ;;  %17497 = vst [vmem:[#allocation53_spill] sm:$0xff] %v16468_v1  ;;  %v17189_v50 = vand.u32 4294901760, %v16457_v19 }
 0x2ab   : > { %v16478_v23 = vsub.f32 %v9605_v39, %v16459_v38 }
 0x2ac   : > { %13227 = vmatmul.mubr.f32.gmra.mrb[6].mxu0 %v15913_v36  ;;  %v9611_v36 = vsel %vm232_vm1, %v11059_v12, 0  ;;  %v9718_v53 = vsub.f32 %v16457_v19, %v17189_v50  ;;  %v11065_v50 = vld [vmem:[%s14410_s28 + $0xaa] sm:$0xff] }
 0x2ad   : > { %12522 = vmatmul.mubr.f32.gmra.mrb[4].mxu1 %v16213_v9  ;;  %13229 = vmatprep.mubr.f32.mxu0 %v15921_v55  ;;  %v16470_v55 = vand.u32 4294901760, %v9608_v51  ;;  %17498 = vst [vmem:[#allocation54_spill] sm:$0xff] %v16478_v23  ;;  %v16480_v12 = vand.u32 4294901760, %v9611_v36 }
 0x2ae   : > { %12524 = vmatprep.mubr.f32.mxu1 %v17496_v33 }
 0x2af   : > { %v16492_v54 = vsub.f32 %v9608_v51, %v16470_v55  ;;  %v16502_v61 = vsub.f32 %v9611_v36, %v16480_v12  ;;  %v11064_v51 = vld [vmem:[%s14410_s28 + $0x9a] sm:$0xff]  ;;  %v17503_v36 = vand.u32 4294901760, %v16468_v1 }
 0x2b0   : > { %13230 = vmatmul.mubr.f32.gmra.mrb[8].mxu0 %v15946_v29  ;;  %v11062_v29 = vld [vmem:[%s14410_s28 + $0x82] sm:$0xff]  ;;  %v9626_v32 = vsel %vm232_vm1, %v11064_v51, 0 }
 0x2b1   : > { %12525 = vmatmul.mubr.f32.gmra.mrb[6].mxu1 %v16243_v0  ;;  %13232 = vmatprep.mubr.f32.mxu0 %v15952_v7  ;;  %17499 = vst [vmem:[#allocation62_spill] sm:$0xff] %v16492_v54  ;;  %v9620_v39 = vsel %vm232_vm1, %v11062_v29, 0  ;;  %17500 = vst [vmem:[#allocation63_spill] sm:$0xff] %v16502_v61  ;;  %v16508_v29 = vsub.f32 %v9614_v14, %v16485_v40  ;;  %v17504_v14 = vand.u32 4294901760, %v16478_v23 }
 0x2b2   : > { %12527 = vmatprep.mubr.f32.mxu1 %v16253_v28  ;;  %v16513_v7 = vand.u32 4294901760, %v9620_v39 }
 0x2b3   : > { %17501 = vst [vmem:[#allocation51_spill] sm:$0xff] %v16508_v29  ;;  %v9738_v19 = vsub.f32 %v16478_v23, %v17504_v14  ;;  %v16546_v23 = vand.u32 4294901760, %v9626_v32 }
 0x2b4   : > { %13233 = vmatmul.mubr.f32.gmra.mrb[10].mxu0 %v15970_v10  ;;  %v9623_v10 = vsel %vm232_vm1, %v11063_v63, 0  ;;  %v9728_v63 = vsub.f32 %v16468_v1, %v17503_v36  ;;  %v9629_v36 = vsel %vm232_vm1, %v11065_v50, 0 }
 0x2b5   : > { %12528 = vmatmul.mubr.f32.gmra.mrb[8].mxu1 %v16281_v59  ;;  %13235 = vmatprep.mubr.f32.mxu0 %v17485_v17  ;;  %v16511_v17 = vsub.f32 %v9617_v44, %v16487_v27  ;;  %v16521_v48 = vand.u32 4294901760, %v9623_v10  ;;  %v9719_v44 = vand.u32 4294901760, %v9718_v53  ;;  %v16536_v53 = vsub.f32 %v9620_v39, %v16513_v7 }
 0x2b6   : > { %12530 = vmatprep.mubr.f32.mxu1 %v16287_v11  ;;  %v9729_v14 = vand.u32 4294901760, %v9728_v63  ;;  %v9739_v62 = vand.u32 4294901760, %v9738_v19  ;;  %v17506_v39 = vand.u32 4294901760, %v16502_v61  ;;  %v9632_v63 = vsel %vm232_vm1, %v11066_v4, 0 }
 0x2b7   : > { %17502 = vst [vmem:[#allocation66_spill] sm:$0xff] %v16511_v17  ;;  %v16544_v50 = vsub.f32 %v9623_v10, %v16521_v48  ;;  %v11068_v10 = vld [vmem:[%s14410_s28 + $0xca] sm:$0xff]  ;;  %v16568_v3 = vsub.f32 %v9626_v32, %v16546_v23 }
 0x2b8   : > { %13236 = vmatmul.mubr.f32.gmra.mrb[12].mxu0 %v17487_v41  ;;  %v17505_v41 = vand.u32 4294901760, %v16492_v54  ;;  %v9758_v1 = vsub.f32 %v16502_v61, %v17506_v39  ;;  %v11069_v39 = vld [vmem:[%s14410_s28 + $0xda] sm:$0xff]  ;;  %v9638_v30 = vsel %vm232_vm1, %v11068_v10, 0 }
 0x2b9   : > { %12531 = vmatmul.mubr.f32.gmra.mrb[10].mxu1 %v16307_v13  ;;  %13238 = vmatprep.mubr.f32.mxu0 %v17488_v49  ;;  %v11067_v49 = vld [vmem:[%s14410_s28 + $0xc2] sm:$0xff]  ;;  %v9641_v32 = vsel %vm232_vm1, %v11069_v39, 0  ;;  %v16595_v39 = vand.u32 4294901760, %v9638_v30 }
 0x2ba   : > { %12533 = vmatprep.mubr.f32.mxu1 %v16313_v43  ;;  %v9748_v51 = vsub.f32 %v16492_v54, %v17505_v41  ;;  %v9635_v41 = vsel %vm232_vm1, %v11067_v49, 0  ;;  %v17507_v54 = vand.u32 4294901760, %v16508_v29  ;;  %v16570_v49 = vand.u32 4294901760, %v9632_v63 }
 0x2bc   : > { %13239 = vmatmul.mubr.f32.gmra.mrb[14].mxu0 %v17489_v45  ;;  %v16552_v45 = vand.u32 4294901760, %v9629_v36  ;;  %v9768_v18 = vsub.f32 %v16508_v29, %v17507_v54  ;;  %v9749_v61 = vand.u32 4294901760, %v9748_v51  ;;  %v9759_v54 = vand.u32 4294901760, %v9758_v1  ;;  %v11070_v51 = vld [vmem:[%s14410_s28 + $0xe2] sm:$0xff] }
 0x2bd   : > { %12534 = vmatmul.mubr.f32.gmra.mrb[12].mxu1 %v16327_v24  ;;  %13243 = vmatprep.mubr.f32.mxu0 %v9719_v44  ;;  %v17508_v44 = vand.u32 4294901760, %v16511_v17 }
 0x2be   : > { %12536 = vmatprep.mubr.f32.mxu1 %v16336_v6  ;;  %v16574_v29 = vsub.f32 %v9629_v36, %v16552_v45  ;;  %v9769_v4 = vand.u32 4294901760, %v9768_v18  ;;  %v17511_v36 = vand.u32 4294901760, %v16544_v50  ;;  %v17512_v18 = vand.u32 4294901760, %v17491_v57 }
 0x2bf   : > { %v9778_v19 = vsub.f32 %v16511_v17, %v17508_v44  ;;  %v16576_v44 = vand.u32 4294901760, %v9635_v41 }
 0x2c0   : > { %13244 = vmatmul.mubr.f32.vlgmr.msra.gmra.mrb[0].mxu0 %v9729_v14  ;;  %v17509_v14 = vand.u32 4294901760, %v17490_v20  ;;  %v9798_v10 = vsub.f32 %v16544_v50, %v17511_v36  ;;  %v9807_v20 = vand.u32 4294901760, %v16568_v3 }
 0x2c1   : > { %12537 = vmatmul.mubr.f32.gmra.mrb[14].mxu1 %v16347_v5  ;;  %13246 = vmatprep.mubr.f32.mxu0 %v9739_v62  ;;  %v9779_v17 = vand.u32 4294901760, %v9778_v19  ;;  %v17510_v62 = vand.u32 4294901760, %v16536_v53  ;;  %v9817_v19 = vand.u32 4294901760, %v16574_v29 }
 0x2c2   : > { %12541 = vmatprep.mubr.f32.mxu1 %v17509_v14  ;;  %13268 = vmatpush3.msra.mxu0 %v16423_v21  ;;  %v16593_v21 = vsub.f32 %v9632_v63, %v16570_v49  ;;  %v16601_v14 = vsub.f32 %v9635_v41, %v16576_v44  ;;  %v17513_v63 = vand.u32 4294901760, %v16183_v2  ;;  %v9808_v57 = vsub.f32 %v16568_v3, %v9807_v20 }
 0x2c3   : > { %v9788_v1 = vsub.f32 %v16536_v53, %v17510_v62  ;;  %13293 = vmatprep.subr.mxu0 %v16404_v15  ;;  %v9644_v62 = vsel %vm232_vm1, %v11070_v51, 0  ;;  %v9799_v2 = vand.u32 4294901760, %v9798_v10 }
 0x2c4   : > { %13247 = vmatmul.mubr.f32.gmra.mrb[2].mxu0 %v9749_v61  ;;  %v16603_v61 = vand.u32 4294901760, %v9641_v32  ;;  %v9827_v41 = vand.u32 4294901760, %v16593_v21  ;;  %v9837_v51 = vand.u32 4294901760, %v16601_v14 }
 0x2c5   : > { %12542 = vmatmul.mubr.f32.vlgmr.msra.gmra.mrb[0].mxu1 %v17512_v18  ;;  %13249 = vmatprep.mubr.f32.mxu0 %v9759_v54  ;;  %v9789_v36 = vand.u32 4294901760, %v9788_v1  ;;  %v16615_v54 = vsub.f32 %v9638_v30, %v16595_v39  ;;  %v16617_v18 = vand.u32 4294901760, %v9644_v62  ;;  %v9809_v30 = vand.u32 4294901760, %v9808_v57 }
 0x2c6   : > { %12566 = vmatpush3.msra.mxu1 %v17492_v26  ;;  %12544 = vmatprep.mubr.f32.mxu1 %v17513_v63  ;;  %v17514_v26 = vand.u32 4294901760, %v17493_v31  ;;  %v16626_v1 = vsub.f32 %v9641_v32, %v16603_v61  ;;  %v17515_v63 = vand.u32 4294901760, %v17494_v52  ;;  %v9828_v31 = vsub.f32 %v16593_v21, %v9827_v41 }
 0x2c7   : > { %12591 = vmatprep.subr.mxu1 %v16082_v34  ;;  %v16635_v10 = vsub.f32 %v9644_v62, %v16617_v18  ;;  %v9838_v52 = vsub.f32 %v16601_v14, %v9837_v51  ;;  %v17517_v57 = vand.u32 4294901760, %v17496_v33  ;;  %v17519_v33 = vand.u32 4294901760, %v16253_v28 }
 0x2c8   : > { %13250 = vmatmul.mubr.f32.gmra.mrb[4].mxu0 %v9769_v4  ;;  %v9818_v4 = vsub.f32 %v16574_v29, %v9817_v19  ;;  %v17523_v28 = vand.u32 4294901760, %v16313_v43  ;;  %v17529_v43 = vld [vmem:[#allocation65_spill] sm:$0xff] }
 0x2c9   : > { %12545 = vmatmul.mubr.f32.gmra.mrb[2].mxu1 %v17514_v26  ;;  %13252 = vmatprep.mubr.f32.mxu0 %v9779_v17  ;;  %v9847_v17 = vand.u32 4294901760, %v16615_v54  ;;  %v17516_v26 = vand.u32 4294901760, %v16213_v9  ;;  %v9867_v9 = vand.u32 4294901760, %v16635_v10 }
 0x2ca   : > { %12547 = vmatprep.mubr.f32.mxu1 %v17515_v63  ;;  %v9819_v32 = vand.u32 4294901760, %v9818_v4  ;;  %v9829_v63 = vand.u32 4294901760, %v9828_v31  ;;  %v9839_v4 = vand.u32 4294901760, %v9838_v52 }
 0x2cb   : > { %v9848_v62 = vsub.f32 %v16615_v54, %v9847_v17  ;;  %v9868_v31 = vsub.f32 %v16635_v10, %v9867_v9 }
 0x2cc   : > { %13253 = vmatmul.mubr.f32.gmra.mrb[6].mxu0 %v9789_v36  ;;  %v9857_v36 = vand.u32 4294901760, %v16626_v1 }
 0x2cd   : > { %12548 = vmatmul.mubr.f32.gmra.mrb[4].mxu1 %v17516_v26  ;;  %13255 = vmatprep.mubr.f32.mxu0 %v9799_v2  ;;  %v17518_v2 = vand.u32 4294901760, %v16243_v0  ;;  %v9869_v52 = vand.u32 4294901760, %v9868_v31  ;;  %v17538_v31 = vld [vmem:[#allocation60_spill] sm:$0xff] }
 0x2ce   : > { %12550 = vmatprep.mubr.f32.mxu1 %v17517_v57  ;;  %v9858_v26 = vsub.f32 %v16626_v1, %v9857_v36  ;;  %v17520_v57 = vand.u32 4294901760, %v16281_v59  ;;  %v17525_v59 = vand.u32 4294901760, %v16336_v6  ;;  %v17531_v6 = vld [vmem:[#allocation67_spill] sm:$0xff] }
 0x2d0   : > { %13256 = vmatmul.mubr.f32.gmra.mrb[8].mxu0 %v9809_v30  ;;  %v9849_v30 = vand.u32 4294901760, %v9848_v62  ;;  %v9859_v0 = vand.u32 4294901760, %v9858_v26  ;;  %v17534_v62 = vld [vmem:[#allocation68_spill] sm:$0xff]  ;;  %v17536_v26 = vld [vmem:[#allocation3_spill] sm:$0xff] }
 0x2d1   : > { %12551 = vmatmul.mubr.f32.gmra.mrb[6].mxu1 %v17518_v2  ;;  %13258 = vmatprep.mubr.f32.mxu0 %v9819_v32  ;;  %v17521_v32 = vand.u32 4294901760, %v16287_v11  ;;  %v17522_v2 = vand.u32 4294901760, %v16307_v13  ;;  %v17526_v11 = vand.u32 4294901760, %v16347_v5  ;;  %v17527_v13 = vld [vmem:[#allocation2_spill] sm:$0xff]  ;;  %v17532_v5 = vld [vmem:[#allocation59_spill] sm:$0xff] }
 0x2d2   : > { %12553 = vmatprep.mubr.f32.mxu1 %v17519_v33 }
 0x2d4   : > { %13259 = vmatmul.mubr.f32.gmra.mrb[10].mxu0 %v9829_v63  ;;  %v17524_v63 = vand.u32 4294901760, %v16327_v24  ;;  %v17530_v24 = vld [vmem:[#allocation70_spill] sm:$0xff] }
 0x2d5   : > { %12554 = vmatmul.mubr.f32.gmra.mrb[8].mxu1 %v17520_v57  ;;  %13261 = vmatprep.mubr.f32.mxu0 %v9839_v4  ;;  %v17535_v4 = vld [vmem:[#allocation4_spill] sm:$0xff]  ;;  %v17539_v57 = vld [vmem:[#allocation54_spill] sm:$0xff] }
 0x2d6   : > { %12556 = vmatprep.mubr.f32.mxu1 %v17521_v32  ;;  %v5172_v33 = vsub.f32 %v17536_v26, %v17535_v4  ;;  %v17540_v32 = vld [vmem:[#allocation61_spill] sm:$0xff]  ;;  %v17571_v4 = vld [vmem:[#allocation50_spill] sm:$0xff] }
 0x2d8   : > { %13262 = vmatmul.mubr.f32.gmra.mrb[12].mxu0 %v9849_v30  ;;  %v17537_v30 = vld [vmem:[#allocation53_spill] sm:$0xff] }
 0x2d9   : > { %12557 = vmatmul.mubr.f32.gmra.mrb[10].mxu1 %v17522_v2  ;;  %13264 = vmatprep.mubr.f32.mxu0 %v9859_v0  ;;  %v5173_v0 = vand.u32 4294901760, %v5172_v33  ;;  %v17542_v2 = vld [vmem:[#allocation63_spill] sm:$0xff] }
 0x2da   : > { %12559 = vmatprep.mubr.f32.mxu1 %v17523_v28  ;;  %v17543_v28 = vld [vmem:[#allocation51_spill] sm:$0xff] }
 0x2db   : > { %v17578_v33 = vld [vmem:[#allocation19_spill] sm:$0xff] }
 0x2dc   : > { %13265 = vmatmul.mubr.f32.gmra.mrb[14].mxu0 %v9869_v52  ;;  %v17541_v52 = vld [vmem:[#allocation62_spill] sm:$0xff] }
 0x2dd   : > { %12560 = vmatmul.mubr.f32.gmra.mrb[12].mxu1 %v17524_v63  ;;  %13269 = vmatprep.mubr.f32.mxu0 %v16444_v35  ;;  %v17553_v63 = vand.u32 4294901760, %v17543_v28 }
 0x2de   : > { %12562 = vmatprep.mubr.f32.mxu1 %v17525_v59  ;;  %v17554_v59 = vld [vmem:[#allocation30_spill] sm:$0xff] }
 0x2e0   : > { %13270 = vmatmul.mubr.f32.vlgmr.msra.gmra.mrb[0].mxu0 %v16452_v37 }
 0x2e1   : > { %12563 = vmatmul.mubr.f32.gmra.mrb[14].mxu1 %v17526_v11  ;;  %13272 = vmatprep.mubr.f32.mxu0 %v16459_v38 }
 0x2e2   : > { %12567 = vmatprep.mubr.f32.mxu1 %v16149_v8  ;;  %13294 = vmatpush3.msra.mxu0 %v16404_v15  ;;  %v17533_v15 = vld [vmem:[#allocation52_spill] sm:$0xff] }
 0x2e3   : > { %13319 = vmatprep.subr.mxu0 %v16378_v42 }
 0x2e4   : > { %13273 = vmatmul.mubr.f32.gmra.mrb[2].mxu0 %v16470_v55 }
 0x2e5   : > { %12568 = vmatmul.mubr.f32.vlgmr.msra.gmra.mrb[0].mxu1 %v16158_v47  ;;  %13275 = vmatprep.mubr.f32.mxu0 %v16480_v12 }
 0x2e6   : > { %12592 = vmatpush3.msra.mxu1 %v16082_v34  ;;  %12570 = vmatprep.mubr.f32.mxu1 %v16164_v16  ;;  %v17528_v34 = vld [vmem:[#allocation69_spill] sm:$0xff] }
 0x2e7   : > { %12617 = vmatprep.subr.mxu1 %v17527_v13 }
 0x2e8   : > { %13276 = vmatmul.mubr.f32.gmra.mrb[4].mxu0 %v16485_v40 }
 0x2e9   : > { %12571 = vmatmul.mubr.f32.gmra.mrb[2].mxu1 %v16176_v60  ;;  %13278 = vmatprep.mubr.f32.mxu0 %v16487_v27 }
 0x2ea   : > { %12573 = vmatprep.mubr.f32.mxu1 %v16185_v56 }
 0x2ec   : > { %13279 = vmatmul.mubr.f32.gmra.mrb[6].mxu0 %v16513_v7 }
 0x2ed   : > { %12574 = vmatmul.mubr.f32.gmra.mrb[4].mxu1 %v16190_v25  ;;  %13281 = vmatprep.mubr.f32.mxu0 %v16521_v48 }
 0x2ee   : > { %12576 = vmatprep.mubr.f32.mxu1 %v16192_v58 }
 0x2f0   : > { %13282 = vmatmul.mubr.f32.gmra.mrb[8].mxu0 %v16546_v23 }
 0x2f1   : > { %12577 = vmatmul.mubr.f32.gmra.mrb[6].mxu1 %v16218_v46  ;;  %13284 = vmatprep.mubr.f32.mxu0 %v16552_v45 }
 0x2f2   : > { %12579 = vmatprep.mubr.f32.mxu1 %v16228_v22 }
 0x2f4   : > { %13285 = vmatmul.mubr.f32.gmra.mrb[10].mxu0 %v16570_v49 }
 0x2f5   : > { %12580 = vmatmul.mubr.f32.gmra.mrb[8].mxu1 %v17528_v34  ;;  %13287 = vmatprep.mubr.f32.mxu0 %v16576_v44 }
 0x2f6   : > { %12582 = vmatprep.mubr.f32.mxu1 %v17529_v43 }
 0x2f8   : > { %13288 = vmatmul.mubr.f32.gmra.mrb[12].mxu0 %v16595_v39 }
 0x2f9   : > { %12583 = vmatmul.mubr.f32.gmra.mrb[10].mxu1 %v17530_v24  ;;  %13290 = vmatprep.mubr.f32.mxu0 %v16603_v61 }
 0x2fa   : > { %12585 = vmatprep.mubr.f32.mxu1 %v17531_v6 }
 0x2fc   : > { %13291 = vmatmul.mubr.f32.gmra.mrb[14].mxu0 %v16617_v18 }
 0x2fd   : > { %12586 = vmatmul.mubr.f32.gmra.mrb[12].mxu1 %v17532_v5  ;;  %13295 = vmatprep.mubr.f32.mxu0 %v17533_v15 }
 0x2fe   : > { %12588 = vmatprep.mubr.f32.mxu1 %v17534_v62 }
 0x300   : > { %13296 = vmatmul.mubr.f32.vlgmr.msra.gmra.mrb[0].mxu0 %v17537_v30 }
 0x301   : > { %12589 = vmatmul.mubr.f32.gmra.mrb[14].mxu1 %v17538_v31  ;;  %13298 = vmatprep.mubr.f32.mxu0 %v17539_v57 }
 0x302   : > { %12593 = vmatprep.mubr.f32.mxu1 %v16149_v8  ;;  %13320 = vmatpush3.msra.mxu0 %v16378_v42  ;;  %v17544_v8 = vld [vmem:[#allocation66_spill] sm:$0xff] }
 0x303   : > { %13345 = vmatprep.subr.mxu0 %v17540_v32  ;;  %v17555_v11 = vand.u32 4294901760, %v17544_v8 }
 0x304   : > { %13299 = vmatmul.mubr.f32.gmra.mrb[2].mxu0 %v17541_v52 }
 0x305   : > { %12594 = vmatmul.mubr.f32.vlgmr.msra.gmra.mrb[0].mxu1 %v16158_v47  ;;  %13301 = vmatprep.mubr.f32.mxu0 %v17542_v2  ;;  %v17548_v47 = vld [vmem:[#allocation17_spill] sm:$0xff] }
 0x306   : > { %12618 = vmatpush3.msra.mxu1 %v17527_v13  ;;  %12596 = vmatprep.mubr.f32.mxu1 %v16164_v16  ;;  %v17547_v16 = vand.u32 4294901760, %v17539_v57  ;;  %v17556_v13 = vld [vmem:[#allocation31_spill] sm:$0xff]  ;;  %v17582_v57 = vld [vmem:[#allocation28_spill] sm:$0xff] }
 0x307   : > { %12643 = vmatprep.subr.mxu1 %v5173_v0 }
 0x308   : > { %13302 = vmatmul.mubr.f32.gmra.mrb[4].mxu0 %v17543_v28  ;;  %v17587_v28 = vld [vmem:[#allocation41_spill] sm:$0xff] }
 0x309   : > { %12597 = vmatmul.mubr.f32.gmra.mrb[2].mxu1 %v16176_v60  ;;  %13304 = vmatprep.mubr.f32.mxu0 %v17544_v8  ;;  %v17549_v60 = vand.u32 4294901760, %v17541_v52  ;;  %v17585_v52 = vld [vmem:[#allocation36_spill] sm:$0xff] }
 0x30a   : > { %12599 = vmatprep.mubr.f32.mxu1 %v16185_v56  ;;  %v17546_v56 = vand.u32 4294901760, %v17537_v30  ;;  %v17580_v30 = vld [vmem:[#allocation23_spill] sm:$0xff]  ;;  %v17588_v8 = vld [vmem:[#allocation8_spill] sm:$0xff] }
 0x30c   : > { %13305 = vmatmul.mubr.f32.gmra.mrb[6].mxu0 %v16536_v53 }
 0x30d   : > { %12600 = vmatmul.mubr.f32.gmra.mrb[4].mxu1 %v16190_v25  ;;  %13307 = vmatprep.mubr.f32.mxu0 %v16544_v50  ;;  %v17550_v25 = vld [vmem:[#allocation18_spill] sm:$0xff] }
 0x30e   : > { %12602 = vmatprep.mubr.f32.mxu1 %v16192_v58  ;;  %v17545_v58 = vand.u32 4294901760, %v17533_v15  ;;  %v17562_v15 = vld [vmem:[#allocation44_spill] sm:$0xff] }
 0x310   : > { %13308 = vmatmul.mubr.f32.gmra.mrb[8].mxu0 %v16568_v3 }
 0x311   : > { %12603 = vmatmul.mubr.f32.gmra.mrb[6].mxu1 %v16218_v46  ;;  %13310 = vmatprep.mubr.f32.mxu0 %v16574_v29  ;;  %v17551_v46 = vand.u32 4294901760, %v17542_v2  ;;  %v17567_v29 = vld [vmem:[#allocation48_spill] sm:$0xff]  ;;  %v17586_v2 = vld [vmem:[#allocation39_spill] sm:$0xff] }
 0x312   : > { %12605 = vmatprep.mubr.f32.mxu1 %v16228_v22  ;;  %v17552_v22 = vld [vmem:[#allocation20_spill] sm:$0xff] }
 0x314   : > { %13311 = vmatmul.mubr.f32.gmra.mrb[10].mxu0 %v16593_v21  ;;  %v17568_v21 = vld [vmem:[#allocation45_spill] sm:$0xff] }
 0x315   : > { %12606 = vmatmul.mubr.f32.gmra.mrb[8].mxu1 %v17528_v34  ;;  %13313 = vmatprep.mubr.f32.mxu0 %v16601_v14  ;;  %v17557_v34 = vand.u32 4294901760, %v16536_v53  ;;  %v17563_v53 = vld [vmem:[#allocation46_spill] sm:$0xff]  ;;  %v17570_v14 = vld [vmem:[#allocation49_spill] sm:$0xff] }
 0x316   : > { %12608 = vmatprep.mubr.f32.mxu1 %v17529_v43  ;;  %v17558_v43 = vld [vmem:[#allocation34_spill] sm:$0xff] }
 0x318   : > { %13314 = vmatmul.mubr.f32.gmra.mrb[12].mxu0 %v16615_v54 }
 0x319   : > { %12609 = vmatmul.mubr.f32.gmra.mrb[10].mxu1 %v17530_v24  ;;  %13316 = vmatprep.mubr.f32.mxu0 %v16626_v1  ;;  %v17559_v24 = vand.u32 4294901760, %v16544_v50  ;;  %v17564_v50 = vld [vmem:[#allocation47_spill] sm:$0xff]  ;;  %v17572_v1 = vld [vmem:[#allocation5_spill] sm:$0xff] }
 0x31a   : > { %12611 = vmatprep.mubr.f32.mxu1 %v17531_v6  ;;  %v17560_v6 = vld [vmem:[#allocation38_spill] sm:$0xff] }
 0x31c   : > { %13317 = vmatmul.mubr.f32.gmra.mrb[14].mxu0 %v16635_v10  ;;  %v17574_v10 = vld [vmem:[#allocation7_spill] sm:$0xff] }
 0x31d   : > { %12612 = vmatmul.mubr.f32.gmra.mrb[12].mxu1 %v17532_v5  ;;  %13321 = vmatprep.mubr.f32.mxu0 %v17545_v58  ;;  %v17561_v5 = vld [vmem:[#allocation42_spill] sm:$0xff]  ;;  %v17589_v58 = vld [vmem:[#allocation9_spill] sm:$0xff] }
 0x31e   : > { %12614 = vmatprep.mubr.f32.mxu1 %v17534_v62  ;;  %v17565_v62 = vld [vmem:[#allocation43_spill] sm:$0xff] }
 0x31f   : > { %v17566_v3 = vand.u32 4294901760, %v17565_v62 }
 0x320   : > { %13322 = vmatmul.mubr.f32.vlgmr.msra.gmra.mrb[0].mxu0 %v17546_v56  ;;  %v17590_v56 = vld [vmem:[#allocation10_spill] sm:$0xff] }
 0x321   : > { %12615 = vmatmul.mubr.f32.gmra.mrb[14].mxu1 %v17538_v31  ;;  %13324 = vmatprep.mubr.f32.mxu0 %v17547_v16  ;;  %v17581_v31 = vld [vmem:[#allocation25_spill] sm:$0xff] }
 0x322   : > { %12619 = vmatprep.mubr.f32.mxu1 %v17548_v47  ;;  %13346 = vmatpush3.msra.mxu0 %v17540_v32  ;;  %v17584_v32 = vld [vmem:[#allocation33_spill] sm:$0xff] }
 0x323   : > { %13371 = vmatprep.subr.mxu0 %v16378_v42 }
 0x324   : > { %13325 = vmatmul.mubr.f32.gmra.mrb[2].mxu0 %v17549_v60 }
 0x325   : > { %12620 = vmatmul.mubr.f32.vlgmr.msra.gmra.mrb[0].mxu1 %v17550_v25  ;;  %13327 = vmatprep.mubr.f32.mxu0 %v17551_v46 }
 0x326   : > { %12644 = vmatpush3.msra.mxu1 %v5173_v0  ;;  %12622 = vmatprep.mubr.f32.mxu1 %v17552_v22  ;;  %v17583_v0 = vld [vmem:[#allocation29_spill] sm:$0xff] }
 0x327   : > { %12669 = vmatprep.subr.mxu1 %v17536_v26 }
 0x328   : > { %13328 = vmatmul.mubr.f32.gmra.mrb[4].mxu0 %v17553_v63 }
 0x329   : > { %12623 = vmatmul.mubr.f32.gmra.mrb[2].mxu1 %v17554_v59  ;;  %13330 = vmatprep.mubr.f32.mxu0 %v17555_v11 }
 0x32a   : > { %12625 = vmatprep.mubr.f32.mxu1 %v17556_v13 }
 0x32c   : > { %13331 = vmatmul.mubr.f32.gmra.mrb[6].mxu0 %v17557_v34 }
 0x32d   : > { %12626 = vmatmul.mubr.f32.gmra.mrb[4].mxu1 %v17558_v43  ;;  %13333 = vmatprep.mubr.f32.mxu0 %v17559_v24 }
 0x32e   : > { %12628 = vmatprep.mubr.f32.mxu1 %v17560_v6 }
 0x330   : > { %13334 = vmatmul.mubr.f32.gmra.mrb[8].mxu0 %v9807_v20  ;;  %v5151_v20 = vsub.f32 %v17565_v62, %v17566_v3 }
 0x331   : > { %12629 = vmatmul.mubr.f32.gmra.mrb[6].mxu1 %v17561_v5  ;;  %13336 = vmatprep.mubr.f32.mxu0 %v9817_v19  ;;  %v17569_v19 = vand.u32 4294901760, %v17568_v21 }
 0x332   : > { %12631 = vmatprep.mubr.f32.mxu1 %v17562_v15 }
 0x334   : > { %13337 = vmatmul.mubr.f32.gmra.mrb[10].mxu0 %v9827_v41  ;;  %v5161_v41 = vsub.f32 %v17568_v21, %v17569_v19 }
 0x335   : > { %12632 = vmatmul.mubr.f32.gmra.mrb[8].mxu1 %v17563_v53  ;;  %13339 = vmatprep.mubr.f32.mxu0 %v9837_v51  ;;  %v5152_v51 = vand.u32 4294901760, %v5151_v20 }
 0x336   : > { %12634 = vmatprep.mubr.f32.mxu1 %v17564_v50  ;;  %v5162_v54 = vand.u32 4294901760, %v5161_v41 }
 0x338   : > { %13340 = vmatmul.mubr.f32.gmra.mrb[12].mxu0 %v9847_v17  ;;  %v17573_v17 = vld [vmem:[#allocation6_spill] sm:$0xff] }
 0x339   : > { %12635 = vmatmul.mubr.f32.gmra.mrb[10].mxu1 %v17567_v29  ;;  %13342 = vmatprep.mubr.f32.mxu0 %v9857_v36  ;;  %v17575_v36 = vld [vmem:[#allocation11_spill] sm:$0xff] }
 0x33a   : > { %12637 = vmatprep.mubr.f32.mxu1 %v17570_v14 }
 0x33c   : > { %13343 = vmatmul.mubr.f32.gmra.mrb[14].mxu0 %v9867_v9  ;;  %v17576_v9 = vld [vmem:[#allocation13_spill] sm:$0xff] }
 0x33d   : > { %12638 = vmatmul.mubr.f32.gmra.mrb[12].mxu1 %v17571_v4  ;;  %13347 = vmatprep.mubr.f32.mxu0 %v16444_v35 }
 0x33e   : > { %12640 = vmatprep.mubr.f32.mxu1 %v5152_v51 }
 0x340   : > { %13348 = vmatmul.mubr.f32.vlgmr.msra.gmra.mrb[0].mxu0 %v16452_v37 }
 0x341   : > { %12641 = vmatmul.mubr.f32.gmra.mrb[14].mxu1 %v5162_v54  ;;  %13350 = vmatprep.mubr.f32.mxu0 %v16459_v38 }
 0x342   : > { %12645 = vmatprep.mubr.f32.mxu1 %v17572_v1  ;;  %13372 = vmatpush3.msra.mxu0 %v16378_v42  ;;  %v17577_v42 = vld [vmem:[#allocation14_spill] sm:$0xff] }
 0x344   : > { %13351 = vmatmul.mubr.f32.gmra.mrb[2].mxu0 %v16470_v55 }
 0x345   : > { %12646 = vmatmul.mubr.f32.vlgmr.msra.gmra.mrb[0].mxu1 %v17573_v17  ;;  %13353 = vmatprep.mubr.f32.mxu0 %v16480_v12 }
 0x346   : > { %12670 = vmatpush3.msra.mxu1 %v17536_v26  ;;  %12648 = vmatprep.mubr.f32.mxu1 %v17574_v10  ;;  %v17579_v26 = vld [vmem:[#allocation21_spill] sm:$0xff] }
 0x348   : > { %13354 = vmatmul.mubr.f32.gmra.mrb[4].mxu0 %v16485_v40 }
 0x349   : > { %12649 = vmatmul.mubr.f32.gmra.mrb[2].mxu1 %v17575_v36  ;;  %13356 = vmatprep.mubr.f32.mxu0 %v16487_v27 }
 0x34a   : > { %12651 = vmatprep.mubr.f32.mxu1 %v17576_v9 }
 0x34c   : > { %13357 = vmatmul.mubr.f32.gmra.mrb[6].mxu0 %v16513_v7 }
 0x34d   : > { %12652 = vmatmul.mubr.f32.gmra.mrb[4].mxu1 %v17577_v42  ;;  %13359 = vmatprep.mubr.f32.mxu0 %v16521_v48 }
 0x34e   : > { %12654 = vmatprep.mubr.f32.mxu1 %v17578_v33 }
 0x350   : > { %13360 = vmatmul.mubr.f32.gmra.mrb[8].mxu0 %v16546_v23 }
 0x351   : > { %12655 = vmatmul.mubr.f32.gmra.mrb[6].mxu1 %v17579_v26  ;;  %13362 = vmatprep.mubr.f32.mxu0 %v16552_v45 }
 0x352   : > { %12657 = vmatprep.mubr.f32.mxu1 %v17580_v30 }
 0x354   : > { %13363 = vmatmul.mubr.f32.gmra.mrb[10].mxu0 %v16570_v49 }
 0x355   : > { %12658 = vmatmul.mubr.f32.gmra.mrb[8].mxu1 %v17581_v31  ;;  %13365 = vmatprep.mubr.f32.mxu0 %v16576_v44 }
 0x356   : > { %12660 = vmatprep.mubr.f32.mxu1 %v17582_v57 }
 0x358   : > { %13366 = vmatmul.mubr.f32.gmra.mrb[12].mxu0 %v16595_v39 }
 0x359   : > { %12661 = vmatmul.mubr.f32.gmra.mrb[10].mxu1 %v17583_v0  ;;  %13368 = vmatprep.mubr.f32.mxu0 %v16603_v61 }
 0x35a   : > { %12663 = vmatprep.mubr.f32.mxu1 %v17584_v32 }
 0x35c   : > { %13369 = vmatmul.mubr.f32.gmra.mrb[14].mxu0 %v16617_v18 }
 0x35d   : > { %12664 = vmatmul.mubr.f32.gmra.mrb[12].mxu1 %v17585_v52  ;;  %13373 = vmatprep.mubr.f32.mxu0 %v16444_v35  ;;  %v17591_v35 = vld [vmem:[#allocation12_spill] sm:$0xff] }
 0x35e   : > { %12666 = vmatprep.mubr.f32.mxu1 %v17586_v2 }
 0x360   : > { %13374 = vmatmul.mubr.f32.vlgmr.msra.gmra.mrb[0].mxu0 %v16452_v37  ;;  %v17592_v37 = vld [vmem:[#allocation15_spill] sm:$0xff] }
 0x361   : > { %12667 = vmatmul.mubr.f32.gmra.mrb[14].mxu1 %v17587_v28  ;;  %13376 = vmatprep.mubr.f32.mxu0 %v16459_v38  ;;  %v17593_v38 = vld [vmem:[#allocation16_spill] sm:$0xff] }
 0x362   : > { %12671 = vmatprep.mubr.f32.mxu1 %v17588_v8 }
 0x364   : > { %13377 = vmatmul.mubr.f32.gmra.mrb[2].mxu0 %v16470_v55  ;;  %v17594_v55 = vld [vmem:[#allocation22_spill] sm:$0xff] }
 0x365   : > { %12672 = vmatmul.mubr.f32.vlgmr.msra.gmra.mrb[0].mxu1 %v17589_v58  ;;  %13379 = vmatprep.mubr.f32.mxu0 %v16480_v12  ;;  %v17595_v12 = vld [vmem:[#allocation24_spill] sm:$0xff] }
 0x366   : > { %12674 = vmatprep.mubr.f32.mxu1 %v17590_v56 }
 0x368   : > { %13380 = vmatmul.mubr.f32.gmra.mrb[4].mxu0 %v16485_v40  ;;  %v17596_v40 = vld [vmem:[#allocation26_spill] sm:$0xff] }
 0x369   : > { %12675 = vmatmul.mubr.f32.gmra.mrb[2].mxu1 %v17591_v35  ;;  %13382 = vmatprep.mubr.f32.mxu0 %v16487_v27  ;;  %v17597_v27 = vld [vmem:[#allocation27_spill] sm:$0xff] }
 0x36a   : > { %12677 = vmatprep.mubr.f32.mxu1 %v17592_v37 }
 0x36c   : > { %13383 = vmatmul.mubr.f32.gmra.mrb[6].mxu0 %v16513_v7  ;;  %v17598_v7 = vld [vmem:[#allocation32_spill] sm:$0xff] }
 0x36d   : > { %12678 = vmatmul.mubr.f32.gmra.mrb[4].mxu1 %v17593_v38  ;;  %13385 = vmatprep.mubr.f32.mxu0 %v16521_v48  ;;  %v17599_v48 = vld [vmem:[#allocation35_spill] sm:$0xff] }
 0x36e   : > { %12680 = vmatprep.mubr.f32.mxu1 %v17594_v55 }
 0x370   : > { %13386 = vmatmul.mubr.f32.gmra.mrb[8].mxu0 %v16546_v23  ;;  %v17600_v23 = vld [vmem:[#allocation37_spill] sm:$0xff] }
 0x371   : > { %12681 = vmatmul.mubr.f32.gmra.mrb[6].mxu1 %v17595_v12  ;;  %13388 = vmatprep.mubr.f32.mxu0 %v16552_v45  ;;  %v17601_v45 = vld [vmem:[#allocation40_spill] sm:$0xff] }
 0x372   : > { %12683 = vmatprep.mubr.f32.mxu1 %v17596_v40 }
 0x374   : > { %13389 = vmatmul.mubr.f32.gmra.mrb[10].mxu0 %v16570_v49 }
 0x375   : > { %12684 = vmatmul.mubr.f32.gmra.mrb[8].mxu1 %v17597_v27  ;;  %13391 = vmatprep.mubr.f32.mxu0 %v16576_v44 }
 0x376   : > { %12686 = vmatprep.mubr.f32.mxu1 %v17598_v7 }
 0x378   : > { %13392 = vmatmul.mubr.f32.gmra.mrb[12].mxu0 %v16595_v39 }
 0x379   : > { %12687 = vmatmul.mubr.f32.gmra.mrb[10].mxu1 %v17599_v48  ;;  %13394 = vmatprep.mubr.f32.mxu0 %v16603_v61  ;;  %v16872_v61 = vld [vmem:[%s16944_s2] ss:$0 sm:$0xff] }
 0x37a   : > { %12689 = vmatprep.mubr.f32.mxu1 %v17600_v23 }
 0x37c   : > { %13395 = vmatmul.mubr.f32.gmra.mrb[14].mxu0 %v16617_v18 }
 0x37d   : > { %12690 = vmatmul.mubr.f32.gmra.mrb[12].mxu1 %v17601_v45 }
 0x37e   : > { %12692 = vmatprep.mubr.f32.mxu1 %v17565_v62 }
 0x381   : > { %12693 = vmatmul.mubr.f32.gmra.mrb[14].mxu1 %v17568_v21 }
 0x433   : > { %v13375_v49 = vpop.f32.mrb[0].mxu0 }
 0x434   : > { %v10646_v44 = vpop.f32.mrb[1].mxu0 }
 0x437   : > { %v13378_v39 = vpop.f32.mrb[2].mxu0 }
 0x438   : > { %v12673_v16 = vpop.f32.mrb[0].mxu1  ;;  %v10658_v18 = vpop.f32.mrb[3].mxu0 }
 0x439   : > { %v13397_v47 = vadd.f32 %v13375_v49, %v12673_v16  ;;  %v5404_v60 = vpop.f32.mrb[1].mxu1 }
 0x43a   : > { %v13398_v25 = vadd.f32 %v10646_v44, %v5404_v60 }
 0x43b   : > { %v10764_v46 = vadd.f32 %v13397_v47, %v16872_v61  ;;  %v13381_v22 = vpop.f32.mrb[4].mxu0 }
 0x43c   : > { %v10763_v63 = vadd.f32 %v13398_v25, %v16872_v61  ;;  %v12676_v59 = vpop.f32.mrb[2].mxu1  ;;  %v10670_v11 = vpop.f32.mrb[5].mxu0 }
 0x43d   : > { %vm10780_vm2 = vcmp.ge.f32.partialorder %v10764_v46, 0.0  ;;  %v10796_v13 = vmul.f32 0.2, %v10764_v46  ;;  %v13399_v34 = vadd.f32 %v13378_v39, %v12676_v59  ;;  %v5418_v43 = vpop.f32.mrb[3].mxu1 }
 0x43e   : > { %vm10779_vm3 = vcmp.ge.f32.partialorder %v10763_v63, 0.0  ;;  %v10795_v24 = vmul.f32 0.2, %v10763_v63  ;;  %v13400_v6 = vadd.f32 %v10658_v18, %v5418_v43 }
 0x43f   : > { %v10812_v5 = vsel %vm10780_vm2, %v10764_v46, %v10796_v13  ;;  %v10766_v15 = vadd.f32 %v13399_v34, %v16872_v61  ;;  %v13384_v53 = vpop.f32.mrb[6].mxu0 }
 0x440   : > { %v10828_v50 = vmul.f32 1.4142135, %v10812_v5  ;;  %v10811_v62 = vsel %vm10779_vm3, %v10763_v63, %v10795_v24  ;;  %v10765_v3 = vadd.f32 %v13400_v6, %v16872_v61  ;;  %v12679_v20 = vpop.f32.mrb[4].mxu1  ;;  %v10682_v29 = vpop.f32.mrb[7].mxu0 }
 0x441   : > { %v10827_v21 = vmul.f32 1.4142135, %v10811_v62  ;;  %vm10782_vm4 = vcmp.ge.f32.partialorder %v10766_v15, 0.0  ;;  %v10798_v19 = vmul.f32 0.2, %v10766_v15  ;;  %v13401_v41 = vadd.f32 %v13381_v22, %v12679_v20  ;;  %v5432_v14 = vpop.f32.mrb[5].mxu1 }
 0x442   : > { %10844 = vst.msk [vmem:[%s16879_s29 + $0x8] sm:$0xff] %vm232_vm1, %v10828_v50  ;;  %vm10781_vm5 = vcmp.ge.f32.partialorder %v10765_v3, 0.0  ;;  %v10797_v51 = vmul.f32 0.2, %v10765_v3  ;;  %v13402_v4 = vadd.f32 %v10670_v11, %v5432_v14 }
 0x443   : > { %10843 = vst.msk [vmem:[%s16879_s29] sm:$0xff] %vm232_vm1, %v10827_v21  ;;  %v10814_v54 = vsel %vm10782_vm4, %v10766_v15, %v10798_v19  ;;  %v10768_v1 = vadd.f32 %v13401_v41, %v16872_v61  ;;  %v13387_v17 = vpop.f32.mrb[8].mxu0 }
 0x444   : > { %v10830_v10 = vmul.f32 1.4142135, %v10814_v54  ;;  %v10813_v36 = vsel %vm10781_vm5, %v10765_v3, %v10797_v51  ;;  %v10767_v9 = vadd.f32 %v13402_v4, %v16872_v61  ;;  %v12682_v42 = vpop.f32.mrb[6].mxu1  ;;  %v10694_v33 = vpop.f32.mrb[9].mxu0 }
 0x445   : > { %v10829_v26 = vmul.f32 1.4142135, %v10813_v36  ;;  %vm10784_vm6 = vcmp.ge.f32.partialorder %v10768_v1, 0.0  ;;  %v10800_v30 = vmul.f32 0.2, %v10768_v1  ;;  %v13403_v31 = vadd.f32 %v13384_v53, %v12682_v42  ;;  %v5446_v57 = vpop.f32.mrb[7].mxu1 }
 0x446   : > { %10846 = vst.msk [vmem:[%s16879_s29 + $0x18] sm:$0xff] %vm232_vm1, %v10830_v10  ;;  %vm10783_vm7 = vcmp.ge.f32.partialorder %v10767_v9, 0.0  ;;  %v10799_v0 = vmul.f32 0.2, %v10767_v9  ;;  %v13404_v32 = vadd.f32 %v10682_v29, %v5446_v57 }
 0x447   : > { %10845 = vst.msk [vmem:[%s16879_s29 + $0x10] sm:$0xff] %vm232_vm1, %v10829_v26  ;;  %v10816_v52 = vsel %vm10784_vm6, %v10768_v1, %v10800_v30  ;;  %v10770_v2 = vadd.f32 %v13403_v31, %v16872_v61  ;;  %v13390_v28 = vpop.f32.mrb[10].mxu0 }
 0x448   : > { %v10832_v8 = vmul.f32 1.4142135, %v10816_v52  ;;  %v10815_v58 = vsel %vm10783_vm7, %v10767_v9, %v10799_v0  ;;  %v10769_v56 = vadd.f32 %v13404_v32, %v16872_v61  ;;  %v12685_v35 = vpop.f32.mrb[8].mxu1  ;;  %v10706_v37 = vpop.f32.mrb[11].mxu0 }
 0x449   : > { %v10831_v38 = vmul.f32 1.4142135, %v10815_v58  ;;  %vm10786_vm8 = vcmp.ge.f32.partialorder %v10770_v2, 0.0  ;;  %v10802_v55 = vmul.f32 0.2, %v10770_v2  ;;  %v13405_v12 = vadd.f32 %v13387_v17, %v12685_v35  ;;  %v5460_v40 = vpop.f32.mrb[9].mxu1 }
 0x44a   : > { %10848 = vst.msk [vmem:[%s16879_s29 + $0x28] sm:$0xff] %vm232_vm1, %v10832_v8  ;;  %vm10785_vm9 = vcmp.ge.f32.partialorder %v10769_v56, 0.0  ;;  %v10801_v27 = vmul.f32 0.2, %v10769_v56  ;;  %v13406_v7 = vadd.f32 %v10694_v33, %v5460_v40 }
 0x44b   : > { %10847 = vst.msk [vmem:[%s16879_s29 + $0x20] sm:$0xff] %vm232_vm1, %v10831_v38  ;;  %v10818_v48 = vsel %vm10786_vm8, %v10770_v2, %v10802_v55  ;;  %v10772_v23 = vadd.f32 %v13405_v12, %v16872_v61  ;;  %v13393_v45 = vpop.f32.mrb[12].mxu0 }
 0x44c   : > { %v10834_v49 = vmul.f32 1.4142135, %v10818_v48  ;;  %v10817_v44 = vsel %vm10785_vm9, %v10769_v56, %v10801_v27  ;;  %v10771_v39 = vadd.f32 %v13406_v7, %v16872_v61  ;;  %v12688_v16 = vpop.f32.mrb[10].mxu1  ;;  %v10718_v18 = vpop.f32.mrb[13].mxu0 }
 0x44d   : > { %v10833_v47 = vmul.f32 1.4142135, %v10817_v44  ;;  %vm10788_vm10 = vcmp.ge.f32.partialorder %v10772_v23, 0.0  ;;  %v10804_v60 = vmul.f32 0.2, %v10772_v23  ;;  %v13407_v25 = vadd.f32 %v13390_v28, %v12688_v16  ;;  %v5474_v46 = vpop.f32.mrb[11].mxu1 }
 0x44e   : > { %10850 = vst.msk [vmem:[%s16879_s29 + $0x38] sm:$0xff] %vm232_vm1, %v10834_v49  ;;  %vm10787_vm11 = vcmp.ge.f32.partialorder %v10771_v39, 0.0  ;;  %v10803_v22 = vmul.f32 0.2, %v10771_v39  ;;  %v13408_v63 = vadd.f32 %v10706_v37, %v5474_v46 }
 0x44f   : > { %10849 = vst.msk [vmem:[%s16879_s29 + $0x30] sm:$0xff] %vm232_vm1, %v10833_v47  ;;  %v10820_v59 = vsel %vm10788_vm10, %v10772_v23, %v10804_v60  ;;  %v10774_v11 = vadd.f32 %v13407_v25, %v16872_v61  ;;  %v13396_v13 = vpop.f32.mrb[14].mxu0 }
 0x450   : > { %v10836_v34 = vmul.f32 1.4142135, %v10820_v59  ;;  %v10819_v43 = vsel %vm10787_vm11, %v10771_v39, %v10803_v22  ;;  %v10773_v24 = vadd.f32 %v13408_v63, %v16872_v61  ;;  %v12691_v6 = vpop.f32.mrb[12].mxu1  ;;  %v10730_v5 = vpop.f32.mrb[15].mxu0 }
 0x451   : > { %v10835_v15 = vmul.f32 1.4142135, %v10819_v43  ;;  %vm10790_vm12 = vcmp.ge.f32.partialorder %v10774_v11, 0.0  ;;  %v10806_v53 = vmul.f32 0.2, %v10774_v11  ;;  %v13409_v50 = vadd.f32 %v13393_v45, %v12691_v6  ;;  %v5488_v62 = vpop.f32.mrb[13].mxu1 }
 0x452   : > { %10852 = vst.msk [vmem:[%s16879_s29 + $0x48] sm:$0xff] %vm232_vm1, %v10836_v34  ;;  %vm10789_vm13 = vcmp.ge.f32.partialorder %v10773_v24, 0.0  ;;  %v10805_v3 = vmul.f32 0.2, %v10773_v24  ;;  %v13410_v20 = vadd.f32 %v10718_v18, %v5488_v62 }
 0x453   : > { %10851 = vst.msk [vmem:[%s16879_s29 + $0x40] sm:$0xff] %vm232_vm1, %v10835_v15  ;;  %v10822_v29 = vsel %vm10790_vm12, %v10774_v11, %v10806_v53  ;;  %v10776_v21 = vadd.f32 %v13409_v50, %v16872_v61 }
 0x454   : > { %v10838_v19 = vmul.f32 1.4142135, %v10822_v29  ;;  %v10821_v41 = vsel %vm10789_vm13, %v10773_v24, %v10805_v3  ;;  %v10775_v14 = vadd.f32 %v13410_v20, %v16872_v61  ;;  %v12694_v51 = vpop.f32.mrb[14].mxu1 }
 0x455   : > { %v10837_v4 = vmul.f32 1.4142135, %v10821_v41  ;;  %vm10792_vm14 = vcmp.ge.f32.partialorder %v10776_v21, 0.0  ;;  %v10808_v54 = vmul.f32 0.2, %v10776_v21  ;;  %v13411_v1 = vadd.f32 %v13396_v13, %v12694_v51  ;;  %v5502_v17 = vpop.f32.mrb[15].mxu1 }
 0x456   : > { %10854 = vst.msk [vmem:[%s16879_s29 + $0x58] sm:$0xff] %vm232_vm1, %v10838_v19  ;;  %vm10791_vm15 = vcmp.ge.f32.partialorder %v10775_v14, 0.0  ;;  %v10807_v10 = vmul.f32 0.2, %v10775_v14  ;;  %v13412_v36 = vadd.f32 %v10730_v5, %v5502_v17 }
 0x457   : > { %10853 = vst.msk [vmem:[%s16879_s29 + $0x50] sm:$0xff] %vm232_vm1, %v10837_v4  ;;  %v10824_v9 = vsel %vm10792_vm14, %v10776_v21, %v10808_v54  ;;  %v10778_v42 = vadd.f32 %v13411_v1, %v16872_v61 }
 0x458   : > { %v10840_v33 = vmul.f32 1.4142135, %v10824_v9  ;;  %v10823_v26 = vsel %vm10791_vm15, %v10775_v14, %v10807_v10  ;;  %v10777_v30 = vadd.f32 %v13412_v36, %v16872_v61 }
 0x459   : > { %v10839_v31 = vmul.f32 1.4142135, %v10823_v26  ;;  %vm10794_vm0 = vcmp.ge.f32.partialorder %v10778_v42, 0.0  ;;  %v10810_v57 = vmul.f32 0.2, %v10778_v42 }
 0x45a   : > { %10856 = vst.msk [vmem:[%s16879_s29 + $0x68] sm:$0xff] %vm232_vm1, %v10840_v33  ;;  %vm10793_vm2 = vcmp.ge.f32.partialorder %v10777_v30, 0.0  ;;  %v10809_v0 = vmul.f32 0.2, %v10777_v30 }
 0x45b   : > { %10855 = vst.msk [vmem:[%s16879_s29 + $0x60] sm:$0xff] %vm232_vm1, %v10839_v31  ;;  %v10826_v32 = vsel %vm10794_vm0, %v10778_v42, %v10810_v57 }
 0x45c   : > { %v10842_v52 = vmul.f32 1.4142135, %v10826_v32  ;;  %v10825_v2 = vsel %vm10793_vm2, %v10777_v30, %v10809_v0 }
 0x45d   : > { %v10841_v28 = vmul.f32 1.4142135, %v10825_v2 }
 0x45e   : > { %10858 = vst.msk [vmem:[%s16879_s29 + $0x78] sm:$0xff] %vm232_vm1, %v10842_v52 }
 0x45f   : > { %10857 = vst.msk [vmem:[%s16879_s29 + $0x70] sm:$0xff] %vm232_vm1, %v10841_v28 }
 0x460 PF: > { %s13_s16 = sadd.s32 1, %s14324_s16   ;;  %s17602_s12 = smov %s14316_s14 }
 0x461   : > { %p10_p7 = scmp.ge.s32.totalorder %s13_s16, 6   ;;  %s17603_s13 = smov %s14320_s15 }
 0x462   : > { %s17604_s14 = smov %s17607_s17  ;;  %s17605_s15 = smov %s17611_s18 }
 0x463   :  { %12 = sbr.rel (!%p10_p7) target bundleno = 3 (0x3), region = 73 }

</bundles_post_ra>
